<compile_context>
chip_gen: v6e
topology: v6e:2x2x1
jax: 0.10.0
libtpu: 0.0.40
codegen_flags: <defaults>
</compile_context>

<pallas_src>
import functools
import math

import jax
import jax.numpy as jnp
from jax.experimental import pallas as pl
from jax.experimental.pallas import tpu as pltpu

K_ALIGN = 256    # fc1 K padding: full 256-wide systolic passes on v6e/v7x
LANE = 128


def _round_up(n, m):
    return ((n + m - 1) // m) * m


def _pick_tm(n_rows, tm):
    """Largest requested node tile, but keep >= 2 grid steps so both v7x
    TensorCores get work; multiple of 32 keeps every dtype sublane-aligned."""
    tm = max(32, _round_up(tm, 32))
    if pl.cdiv(n_rows, tm) >= 2:
        return tm
    return max(32, min(tm, _round_up(pl.cdiv(n_rows, 2), 32)))


# ----------------------------- kernel ---------------------------------------

def graphmlp_kernel(x_ref, w1_ref, vec_ref, w2_ref, wc_ref, bc_ref, z_ref):
    # fc1: bf16 MXU matmul with f32 accumulation, f32 bias add.
    h = jnp.dot(x_ref[...], w1_ref[...],
                preferred_element_type=jnp.float32) + vec_ref[0:1, :]

    # GELU (tanh approximation -> EUP).  torch's default is exact erf;
    # per-element drift is < 3e-3.  TODO(synk): approximate=False if bit-faithful.
    h = jax.nn.gelu(h, approximate=True)

    # LayerNorm (eps=1e-6): single pass for the two row stats; gamma folded
    # into the rsqrt multiplier so the affine is one multiply-add.
    mean = jnp.mean(h, axis=-1, keepdims=True)
    var = jnp.mean(h * h, axis=-1, keepdims=True) - mean * mean
    scale = jax.lax.rsqrt(var + 1e-6) * vec_ref[1:2, :]         # (tm,1)*(1,H)
    h = (h - mean) * scale + vec_ref[2:3, :]

    # dropout(p=0.6) is identity in eval mode.

    # fc2 (bias folded into bc' on the host) + classifier.
    h = jnp.dot(h.astype(jnp.bfloat16), w2_ref[...],
                preferred_element_type=jnp.float32)
    z = jnp.dot(h.astype(jnp.bfloat16), wc_ref[...],
                preferred_element_type=jnp.float32) + bc_ref[...]
    z_ref[...] = z.astype(z_ref.dtype)


# ----------------------------- forward --------------------------------------

@functools.partial(jax.jit,
                   static_argnames=("tm", "out_dtype", "single_buffer_weights"))
def _forward_padded(xp, w1, vec, w2, wc, bc, *, tm, out_dtype,
                    single_buffer_weights):
    Np, Fp = xp.shape
    H = w1.shape[1]
    Cp = wc.shape[1]
    assert Np % tm == 0

    const_kwargs = {}
    if single_buffer_weights:
        # Constant index_map -> a second pipeline buffer is pure VMEM waste.
        const_kwargs = dict(pipeline_mode=pl.Buffered(buffer_count=1))

    def const(shape):
        return pl.BlockSpec(shape, lambda i: (0, 0), **const_kwargs)

    out_bytes = jnp.dtype(out_dtype).itemsize
    weight_bytes = (Fp * H + H * H + H * Cp) * 2 + (8 * H + Cp) * 4
    weight_bufs = 1 if single_buffer_weights else 2
    est = (2 * tm * Fp * 2                 # x tile (bf16) x 2 buffers
           + 2 * tm * Cp * out_bytes       # z tile x 2 buffers
           + weight_bufs * weight_bytes    # resident weights / vectors
           + 6 * tm * H * 4)               # f32 intermediates
    # Floor 32 MiB, cap 56 MiB: leaves headroom on v7x's 64 MiB physical VMEM.
    vmem_limit = int(min(max(est + (8 << 20), 32 << 20), 56 << 20))

    flops = 2 * Np * (Fp * H + H * H + H * Cp)
    bytes_accessed = Np * Fp * 2 + weight_bytes + Np * Cp * out_bytes
    cost = pl.CostEstimate(flops=flops, transcendentals=Np * H,
                           bytes_accessed=bytes_accessed)

    return pl.pallas_call(
        graphmlp_kernel,
        out_shape=jax.ShapeDtypeStruct((Np, Cp), out_dtype),
        grid=(Np // tm,),
        in_specs=[
            pl.BlockSpec((tm, Fp), lambda i: (i, 0)),   # x, tiled over nodes
            const((Fp, H)),                             # w1       (resident)
            const((8, H)),                              # [b1; gamma; beta; 0]
            const((H, H)),                              # w2       (resident)
            const((H, Cp)),                             # wc       (resident)
            const((1, Cp)),                             # bc' = b2 @ Wc + bc
        ],
        out_specs=pl.BlockSpec((tm, Cp), lambda i: (i, 0)),
        compiler_params=pltpu.CompilerParams(
            dimension_semantics=("parallel",),
            vmem_limit_bytes=vmem_limit),
        cost_estimate=cost,
    )(xp, w1, vec, w2, wc, bc)


_SINGLE_BUFFER_OK = None     # resolved on first call (pl.Buffered(1) fallback)


def graphmlp_forward(xp, padded, *, n_rows, tm, out_dtype=jnp.bfloat16):
    """Run the fused forward on pre-padded inputs; returns (n_rows, C) logits."""
    global _SINGLE_BUFFER_OK
    modes = [True, False] if _SINGLE_BUFFER_OK is None else [_SINGLE_BUFFER_OK]
    err = None
    for sb in modes:
        try:
            z = _forward_padded(xp, padded["w1"], padded["vec"], padded["w2"],
                                padded["wc"], padded["bc"],
                                tm=tm, out_dtype=out_dtype,
                                single_buffer_weights=sb)
            _SINGLE_BUFFER_OK = sb
            return z[:n_rows, :padded["C"]]
        except Exception as e:   # noqa: BLE001 - older jax without pipeline_mode
            err = e
    raise err


# ------------------------- one-time host prep --------------------------------

def pad_params(params):
    """Pad/cast weights to MXU-friendly bf16 blocks, pack the per-feature
    vectors and fold the fc2 bias into the classifier bias.  Done once."""
    F, H = params["w1"].shape
    C = params["wc"].shape[1]
    assert H % LANE == 0, "hidden dim must be a multiple of 128 (pad H explicitly)"
    Fp = _round_up(F, K_ALIGN)
    Cp = _round_up(C, LANE)
    w1 = jnp.zeros((Fp, H), jnp.bfloat16).at[:F, :].set(
        params["w1"].astype(jnp.bfloat16))
    w2 = params["w2"].astype(jnp.bfloat16)
    wc = jnp.zeros((H, Cp), jnp.bfloat16).at[:, :C].set(
        params["wc"].astype(jnp.bfloat16))
    # z = (h@W2 + b2)@Wc + bc  ==  (h@W2)@Wc + (b2@Wc + bc)
    bc = jnp.zeros((1, Cp), jnp.float32).at[:, :C].set(
        params["bc"] + params["b2"] @ params["wc"])
    vec = jnp.concatenate(
        [params["b1"], params["gamma"], params["beta"],
         jnp.zeros((5, H), jnp.float32)], axis=0).astype(jnp.float32)
    return {"w1": w1, "w2": w2, "wc": wc, "bc": bc, "vec": vec, "F": F, "C": C}


def pad_x(x, *, tm=512):
    """One-time prep of the (static) node-feature matrix."""
    N, F = x.shape
    tm = _pick_tm(N, tm)
    Fp = _round_up(F, K_ALIGN)
    Np = _round_up(N, tm)
    xp = jnp.zeros((Np, Fp), jnp.bfloat16).at[:N, :F].set(x.astype(jnp.bfloat16))
    return xp, tm


# ------------------------ init + references ----------------------------------

def xavier_uniform(key, fan_in, fan_out):
    bound = math.sqrt(6.0 / (fan_in + fan_out))
    return jax.random.uniform(key, (fan_in, fan_out), jnp.float32, -bound, bound)


def init_params(key, in_features, hid, out_features):
    k1, k2, k3, k4, k5, k6 = jax.random.split(key, 6)
    cb = 1.0 / math.sqrt(hid)   # torch Linear default init for the classifier
    return {
        "w1": xavier_uniform(k1, in_features, hid),
        "b1": 1e-6 * jax.random.normal(k2, (1, hid), jnp.float32),
        "gamma": jnp.ones((1, hid), jnp.float32),
        "beta": jnp.zeros((1, hid), jnp.float32),
        "w2": xavier_uniform(k3, hid, hid),
        "b2": 1e-6 * jax.random.normal(k4, (1, hid), jnp.float32),
        "wc": jax.random.uniform(k5, (hid, out_features), jnp.float32, -cb, cb),
        "bc": jax.random.uniform(k6, (1, out_features), jnp.float32, -cb, cb),
    }


def reference_forward(x, p):
    # Mirrors the kernel's bf16 MXU operands / tanh GELU so the check isolates
    # kernel correctness from dtype/approximation choices.
    xb = x.astype(jnp.bfloat16)
    w1, w2, wc = (p["w1"].astype(jnp.bfloat16), p["w2"].astype(jnp.bfloat16),
                  p["wc"].astype(jnp.bfloat16))
    h = jnp.dot(xb, w1, preferred_element_type=jnp.float32) + p["b1"]
    h = jax.nn.gelu(h, approximate=True)
    mean = jnp.mean(h, axis=-1, keepdims=True)
    var = jnp.mean((h - mean) ** 2, axis=-1, keepdims=True)
    h = (h - mean) * jax.lax.rsqrt(var + 1e-6) * p["gamma"] + p["beta"]
    h = jnp.dot(h.astype(jnp.bfloat16), w2, preferred_element_type=jnp.float32) + p["b2"]
    return jnp.dot(h.astype(jnp.bfloat16), wc, preferred_element_type=jnp.float32) + p["bc"]


def reference_forward_f32(x, p):
    # Pure-f32, exact-erf reference: the true PyTorch GraphMLP eval forward.
    h = x @ p["w1"] + p["b1"]
    h = jax.nn.gelu(h, approximate=False)
    mean = jnp.mean(h, axis=-1, keepdims=True)
    var = jnp.mean((h - mean) ** 2, axis=-1, keepdims=True)
    h = (h - mean) * jax.lax.rsqrt(var + 1e-6) * p["gamma"] + p["beta"]
    h = h @ p["w2"] + p["b2"]
    return h @ p["wc"] + p["bc"]


if __name__ == "__main__":
    key = jax.random.PRNGKey(0)
    kx, kp = jax.random.split(key)

    # hid=256 matches GraphMLP's default hids=[256]; N and F are deliberately
    # NOT multiples of the tile sizes so the padding path is exercised.
    N, in_features, hid, out_features = 300, 96, 256, 10
    x = jax.random.normal(kx, (N, in_features), jnp.float32)
    params = init_params(kp, in_features, hid, out_features)

    # One-time prep (hoisted out of the per-call path).
    padded = pad_params(params)
    xp, tm = pad_x(x, tm=512)

    z = graphmlp_forward(xp, padded, n_rows=N, tm=tm)
    z = jax.block_until_ready(z)
    assert z.shape == (N, out_features)

    z32 = z.astype(jnp.float32)
    # Matched-precision check (bf16 operands, tanh GELU) ...
    z_ref = reference_forward(x, params)
    assert jnp.allclose(z32, z_ref, atol=2e-2, rtol=2e-2), "mismatch vs matched reference"
    # ... and a loose sanity check vs the pure-f32 erf-GELU PyTorch forward.
    z_f32 = reference_forward_f32(x, params)
    assert float(jnp.max(jnp.abs(z32 - z_f32))) < 0.25, "drift vs f32 reference"

    print("KERNEL_OK")
</pallas_src>

<mosaic_0001>
module attributes {stable_mosaic.version = 11 : i64} {
  func.func @graphmlp_kernel(%arg0: i32, %arg1: memref<160x256xbf16, #tpu.memory_space<vmem>>, %arg2: memref<256x256xbf16, #tpu.memory_space<vmem>>, %arg3: memref<8x256xf32, #tpu.memory_space<vmem>>, %arg4: memref<256x256xbf16, #tpu.memory_space<vmem>>, %arg5: memref<256x128xbf16, #tpu.memory_space<vmem>>, %arg6: memref<1x128xf32, #tpu.memory_space<vmem>>, %arg7: memref<160x128xbf16, #tpu.memory_space<vmem>>) attributes {dimension_semantics = [#tpu.dimension_semantics<parallel>], iteration_bounds = array<i64: 2>, scalar_prefetch = 0 : i64, scratch_operands = 0 : i64, tpu.core_type = #tpu.core_type<tc>, window_params = [{transform_indices = @transform_0, window_bounds = array<i64: 160, 256>}, {pipeline_mode = #tpu.pipeline_mode<synchronous>, transform_indices = @transform_1, window_bounds = array<i64: 256, 256>}, {pipeline_mode = #tpu.pipeline_mode<synchronous>, transform_indices = @transform_2, window_bounds = array<i64: 8, 256>}, {pipeline_mode = #tpu.pipeline_mode<synchronous>, transform_indices = @transform_3, window_bounds = array<i64: 256, 256>}, {pipeline_mode = #tpu.pipeline_mode<synchronous>, transform_indices = @transform_4, window_bounds = array<i64: 256, 128>}, {pipeline_mode = #tpu.pipeline_mode<synchronous>, transform_indices = @transform_5, window_bounds = array<i64: 1, 128>}, {transform_indices = @transform_6, window_bounds = array<i64: 160, 128>}]} {
    %c0 = arith.constant 0 : index
    %c0_0 = arith.constant 0 : index
    %0 = vector.load %arg1[%c0, %c0_0] : memref<160x256xbf16, #tpu.memory_space<vmem>>, vector<160x256xbf16>
    %c0_1 = arith.constant 0 : index
    %c0_2 = arith.constant 0 : index
    %1 = vector.load %arg2[%c0_1, %c0_2] : memref<256x256xbf16, #tpu.memory_space<vmem>>, vector<256x256xbf16>
    %cst = arith.constant dense<0.000000e+00> : vector<160x256xf32>
    %2 = tpu.matmul %0, %1, %cst {dimension_numbers = #tpu.dot_dimension_numbers<[1], [0], [0], [1], [0, 0, 1, 1], [], []>} : vector<160x256xbf16>, vector<256x256xbf16>, vector<160x256xf32> -> vector<160x256xf32>
    %c0_3 = arith.constant 0 : index
    %c0_4 = arith.constant 0 : index
    %3 = vector.load %arg3[%c0_3, %c0_4] : memref<8x256xf32, #tpu.memory_space<vmem>>, vector<1x256xf32>
    %4 = vector.broadcast %3 : vector<1x256xf32> to vector<160x256xf32>
    %5 = arith.addf %2, %4 : vector<160x256xf32>
    %6 = arith.mulf %5, %5 : vector<160x256xf32>
    %7 = arith.mulf %5, %6 : vector<160x256xf32>
    %cst_5 = arith.constant 4.471500e-02 : f32
    %8 = vector.broadcast %cst_5 : f32 to vector<160x256xf32>
    %9 = arith.mulf %8, %7 : vector<160x256xf32>
    %10 = arith.addf %5, %9 : vector<160x256xf32>
    %cst_6 = arith.constant 0.797884583 : f32
    %11 = vector.broadcast %cst_6 : f32 to vector<160x256xf32>
    %12 = arith.mulf %11, %10 : vector<160x256xf32>
    %13 = math.tanh %12 : vector<160x256xf32>
    %cst_7 = arith.constant 1.000000e+00 : f32
    %14 = vector.broadcast %cst_7 : f32 to vector<160x256xf32>
    %15 = arith.addf %14, %13 : vector<160x256xf32>
    %cst_8 = arith.constant 5.000000e-01 : f32
    %16 = vector.broadcast %cst_8 : f32 to vector<160x256xf32>
    %17 = arith.mulf %16, %15 : vector<160x256xf32>
    %18 = arith.mulf %5, %17 : vector<160x256xf32>
    %cst_9 = arith.constant dense<0.000000e+00> : vector<160xf32>
    %19 = vector.multi_reduction <add>, %18, %cst_9 [1] : vector<160x256xf32> to vector<160xf32>
    %20 = vector.shape_cast %19 : vector<160xf32> to vector<160x1xf32>
    %cst_10 = arith.constant 2.560000e+02 : f32
    %21 = vector.broadcast %cst_10 : f32 to vector<160x1xf32>
    %22 = arith.divf %20, %21 : vector<160x1xf32>
    %23 = arith.mulf %18, %18 : vector<160x256xf32>
    %cst_11 = arith.constant dense<0.000000e+00> : vector<160xf32>
    %24 = vector.multi_reduction <add>, %23, %cst_11 [1] : vector<160x256xf32> to vector<160xf32>
    %25 = vector.shape_cast %24 : vector<160xf32> to vector<160x1xf32>
    %cst_12 = arith.constant 2.560000e+02 : f32
    %26 = vector.broadcast %cst_12 : f32 to vector<160x1xf32>
    %27 = arith.divf %25, %26 : vector<160x1xf32>
    %28 = arith.mulf %22, %22 : vector<160x1xf32>
    %29 = arith.subf %27, %28 : vector<160x1xf32>
    %cst_13 = arith.constant 9.99999997E-7 : f32
    %30 = vector.broadcast %cst_13 : f32 to vector<160x1xf32>
    %31 = arith.addf %29, %30 : vector<160x1xf32>
    %32 = math.rsqrt %31 : vector<160x1xf32>
    %c1 = arith.constant 1 : index
    %c0_14 = arith.constant 0 : index
    %33 = vector.load %arg3[%c1, %c0_14] : memref<8x256xf32, #tpu.memory_space<vmem>>, vector<1x256xf32>
    %34 = vector.broadcast %32 : vector<160x1xf32> to vector<160x256xf32>
    %35 = vector.broadcast %33 : vector<1x256xf32> to vector<160x256xf32>
    %36 = arith.mulf %34, %35 : vector<160x256xf32>
    %37 = vector.broadcast %22 : vector<160x1xf32> to vector<160x256xf32>
    %38 = arith.subf %18, %37 : vector<160x256xf32>
    %39 = arith.mulf %38, %36 : vector<160x256xf32>
    %c2 = arith.constant 2 : index
    %c0_15 = arith.constant 0 : index
    %40 = vector.load %arg3[%c2, %c0_15] : memref<8x256xf32, #tpu.memory_space<vmem>>, vector<1x256xf32>
    %41 = vector.broadcast %40 : vector<1x256xf32> to vector<160x256xf32>
    %42 = arith.addf %39, %41 : vector<160x256xf32>
    %43 = arith.truncf %42 : vector<160x256xf32> to vector<160x256xbf16>
    %c0_16 = arith.constant 0 : index
    %c0_17 = arith.constant 0 : index
    %44 = vector.load %arg4[%c0_16, %c0_17] : memref<256x256xbf16, #tpu.memory_space<vmem>>, vector<256x256xbf16>
    %cst_18 = arith.constant dense<0.000000e+00> : vector<160x256xf32>
    %45 = tpu.matmul %43, %44, %cst_18 {dimension_numbers = #tpu.dot_dimension_numbers<[1], [0], [0], [1], [0, 0, 1, 1], [], []>} : vector<160x256xbf16>, vector<256x256xbf16>, vector<160x256xf32> -> vector<160x256xf32>
    %46 = arith.truncf %45 : vector<160x256xf32> to vector<160x256xbf16>
    %c0_19 = arith.constant 0 : index
    %c0_20 = arith.constant 0 : index
    %47 = vector.load %arg5[%c0_19, %c0_20] : memref<256x128xbf16, #tpu.memory_space<vmem>>, vector<256x128xbf16>
    %cst_21 = arith.constant dense<0.000000e+00> : vector<160x128xf32>
    %48 = tpu.matmul %46, %47, %cst_21 {dimension_numbers = #tpu.dot_dimension_numbers<[1], [0], [0], [1], [0, 0, 1, 1], [], []>} : vector<160x256xbf16>, vector<256x128xbf16>, vector<160x128xf32> -> vector<160x128xf32>
    %c0_22 = arith.constant 0 : index
    %c0_23 = arith.constant 0 : index
    %49 = vector.load %arg6[%c0_22, %c0_23] : memref<1x128xf32, #tpu.memory_space<vmem>>, vector<1x128xf32>
    %50 = vector.broadcast %49 : vector<1x128xf32> to vector<160x128xf32>
    %51 = arith.addf %48, %50 : vector<160x128xf32>
    %52 = arith.truncf %51 : vector<160x128xf32> to vector<160x128xbf16>
    %c0_24 = arith.constant 0 : index
    %c0_25 = arith.constant 0 : index
    %53 = vector.load %arg7[%c0_24, %c0_25] : memref<160x128xbf16, #tpu.memory_space<vmem>>, vector<160x128xbf16>
    tpu.vector_store %arg7[%c0_24, %c0_25], %52 {strides = array<i32>} : memref<160x128xbf16, #tpu.memory_space<vmem>>, vector<160x128xbf16>,
    return
  }
  func.func @transform_0(%arg0: i32) -> (i32, i32) {
    %c0_i32 = arith.constant 0 : i32
    %c0_i32_0 = arith.constant 0 : i32
    return %arg0, %c0_i32 : i32, i32
  }
  func.func @transform_1(%arg0: i32) -> (i32, i32) {
    %c0_i32 = arith.constant 0 : i32
    %c0_i32_0 = arith.constant 0 : i32
    %c0_i32_1 = arith.constant 0 : i32
    return %c0_i32, %c0_i32_0 : i32, i32
  }
  func.func @transform_2(%arg0: i32) -> (i32, i32) {
    %c0_i32 = arith.constant 0 : i32
    %c0_i32_0 = arith.constant 0 : i32
    %c0_i32_1 = arith.constant 0 : i32
    return %c0_i32, %c0_i32_0 : i32, i32
  }
  func.func @transform_3(%arg0: i32) -> (i32, i32) {
    %c0_i32 = arith.constant 0 : i32
    %c0_i32_0 = arith.constant 0 : i32
    %c0_i32_1 = arith.constant 0 : i32
    return %c0_i32, %c0_i32_0 : i32, i32
  }
  func.func @transform_4(%arg0: i32) -> (i32, i32) {
    %c0_i32 = arith.constant 0 : i32
    %c0_i32_0 = arith.constant 0 : i32
    %c0_i32_1 = arith.constant 0 : i32
    return %c0_i32, %c0_i32_0 : i32, i32
  }
  func.func @transform_5(%arg0: i32) -> (i32, i32) {
    %c0_i32 = arith.constant 0 : i32
    %c0_i32_0 = arith.constant 0 : i32
    %c0_i32_1 = arith.constant 0 : i32
    return %c0_i32, %c0_i32_0 : i32, i32
  }
  func.func @transform_6(%arg0: i32) -> (i32, i32) {
    %c0_i32 = arith.constant 0 : i32
    %c0_i32_0 = arith.constant 0 : i32
    return %arg0, %c0_i32 : i32, i32
  }
}

module attributes {stable_mosaic.version = 11 : i64} {
  func.func @graphmlp_kernel(%arg0: i32, %arg1: memref<160x256xbf16, #tpu.memory_space<vmem>>, %arg2: memref<256x256xbf16, #tpu.memory_space<vmem>>, %arg3: memref<8x256xf32, #tpu.memory_space<vmem>>, %arg4: memref<256x256xbf16, #tpu.memory_space<vmem>>, %arg5: memref<256x128xbf16, #tpu.memory_space<vmem>>, %arg6: memref<1x128xf32, #tpu.memory_space<vmem>>, %arg7: memref<160x128xbf16, #tpu.memory_space<vmem>>) attributes {dimension_semantics = [#tpu.dimension_semantics<parallel>], iteration_bounds = array<i64: 2>, scalar_prefetch = 0 : i64, scratch_operands = 0 : i64, tpu.core_type = #tpu.core_type<tc>, window_params = [{transform_indices = @transform_0, window_bounds = array<i64: 160, 256>}, {pipeline_mode = #tpu.pipeline_mode<synchronous>, transform_indices = @transform_1, window_bounds = array<i64: 256, 256>}, {pipeline_mode = #tpu.pipeline_mode<synchronous>, transform_indices = @transform_2, window_bounds = array<i64: 8, 256>}, {pipeline_mode = #tpu.pipeline_mode<synchronous>, transform_indices = @transform_3, window_bounds = array<i64: 256, 256>}, {pipeline_mode = #tpu.pipeline_mode<synchronous>, transform_indices = @transform_4, window_bounds = array<i64: 256, 128>}, {pipeline_mode = #tpu.pipeline_mode<synchronous>, transform_indices = @transform_5, window_bounds = array<i64: 1, 128>}, {transform_indices = @transform_6, window_bounds = array<i64: 160, 128>}]} {
    %c0 = arith.constant 0 : index
    %c0_0 = arith.constant 0 : index
    %0 = vector.load %arg1[%c0, %c0_0] : memref<160x256xbf16, #tpu.memory_space<vmem>>, vector<160x256xbf16>
    %c0_1 = arith.constant 0 : index
    %c0_2 = arith.constant 0 : index
    %1 = vector.load %arg2[%c0_1, %c0_2] : memref<256x256xbf16, #tpu.memory_space<vmem>>, vector<256x256xbf16>
    %cst = arith.constant dense<0.000000e+00> : vector<160x256xf32>
    %2 = tpu.matmul %0, %1, %cst {dimension_numbers = #tpu.dot_dimension_numbers<[1], [0], [0], [1], [0, 0, 1, 1], [], []>} : vector<160x256xbf16>, vector<256x256xbf16>, vector<160x256xf32> -> vector<160x256xf32>
    %c0_3 = arith.constant 0 : index
    %c0_4 = arith.constant 0 : index
    %3 = vector.load %arg3[%c0_3, %c0_4] : memref<8x256xf32, #tpu.memory_space<vmem>>, vector<1x256xf32>
    %4 = vector.broadcast %3 : vector<1x256xf32> to vector<160x256xf32>
    %5 = arith.addf %2, %4 : vector<160x256xf32>
    %6 = arith.mulf %5, %5 : vector<160x256xf32>
    %7 = arith.mulf %5, %6 : vector<160x256xf32>
    %cst_5 = arith.constant 4.471500e-02 : f32
    %8 = vector.broadcast %cst_5 : f32 to vector<160x256xf32>
    %9 = arith.mulf %8, %7 : vector<160x256xf32>
    %10 = arith.addf %5, %9 : vector<160x256xf32>
    %cst_6 = arith.constant 0.797884583 : f32
    %11 = vector.broadcast %cst_6 : f32 to vector<160x256xf32>
    %12 = arith.mulf %11, %10 : vector<160x256xf32>
    %13 = math.tanh %12 : vector<160x256xf32>
    %cst_7 = arith.constant 1.000000e+00 : f32
    %14 = vector.broadcast %cst_7 : f32 to vector<160x256xf32>
    %15 = arith.addf %14, %13 : vector<160x256xf32>
    %cst_8 = arith.constant 5.000000e-01 : f32
    %16 = vector.broadcast %cst_8 : f32 to vector<160x256xf32>
    %17 = arith.mulf %16, %15 : vector<160x256xf32>
    %18 = arith.mulf %5, %17 : vector<160x256xf32>
    %cst_9 = arith.constant dense<0.000000e+00> : vector<160xf32>
    %19 = vector.multi_reduction <add>, %18, %cst_9 [1] : vector<160x256xf32> to vector<160xf32>
    %20 = vector.shape_cast %19 : vector<160xf32> to vector<160x1xf32>
    %cst_10 = arith.constant 2.560000e+02 : f32
    %21 = vector.broadcast %cst_10 : f32 to vector<160x1xf32>
    %22 = arith.divf %20, %21 : vector<160x1xf32>
    %23 = arith.mulf %18, %18 : vector<160x256xf32>
    %cst_11 = arith.constant dense<0.000000e+00> : vector<160xf32>
    %24 = vector.multi_reduction <add>, %23, %cst_11 [1] : vector<160x256xf32> to vector<160xf32>
    %25 = vector.shape_cast %24 : vector<160xf32> to vector<160x1xf32>
    %cst_12 = arith.constant 2.560000e+02 : f32
    %26 = vector.broadcast %cst_12 : f32 to vector<160x1xf32>
    %27 = arith.divf %25, %26 : vector<160x1xf32>
    %28 = arith.mulf %22, %22 : vector<160x1xf32>
    %29 = arith.subf %27, %28 : vector<160x1xf32>
    %cst_13 = arith.constant 9.99999997E-7 : f32
    %30 = vector.broadcast %cst_13 : f32 to vector<160x1xf32>
    %31 = arith.addf %29, %30 : vector<160x1xf32>
    %32 = math.rsqrt %31 : vector<160x1xf32>
    %c1 = arith.constant 1 : index
    %c0_14 = arith.constant 0 : index
    %33 = vector.load %arg3[%c1, %c0_14] : memref<8x256xf32, #tpu.memory_space<vmem>>, vector<1x256xf32>
    %34 = vector.broadcast %32 : vector<160x1xf32> to vector<160x256xf32>
    %35 = vector.broadcast %33 : vector<1x256xf32> to vector<160x256xf32>
    %36 = arith.mulf %34, %35 : vector<160x256xf32>
    %37 = vector.broadcast %22 : vector<160x1xf32> to vector<160x256xf32>
    %38 = arith.subf %18, %37 : vector<160x256xf32>
    %39 = arith.mulf %38, %36 : vector<160x256xf32>
    %c2 = arith.constant 2 : index
    %c0_15 = arith.constant 0 : index
    %40 = vector.load %arg3[%c2, %c0_15] : memref<8x256xf32, #tpu.memory_space<vmem>>, vector<1x256xf32>
    %41 = vector.broadcast %40 : vector<1x256xf32> to vector<160x256xf32>
    %42 = arith.addf %39, %41 : vector<160x256xf32>
    %43 = arith.truncf %42 : vector<160x256xf32> to vector<160x256xbf16>
    %c0_16 = arith.constant 0 : index
    %c0_17 = arith.constant 0 : index
    %44 = vector.load %arg4[%c0_16, %c0_17] : memref<256x256xbf16, #tpu.memory_space<vmem>>, vector<256x256xbf16>
    %cst_18 = arith.constant dense<0.000000e+00> : vector<160x256xf32>
    %45 = tpu.matmul %43, %44, %cst_18 {dimension_numbers = #tpu.dot_dimension_numbers<[1], [0], [0], [1], [0, 0, 1, 1], [], []>} : vector<160x256xbf16>, vector<256x256xbf16>, vector<160x256xf32> -> vector<160x256xf32>
    %46 = arith.truncf %45 : vector<160x256xf32> to vector<160x256xbf16>
    %c0_19 = arith.constant 0 : index
    %c0_20 = arith.constant 0 : index
    %47 = vector.load %arg5[%c0_19, %c0_20] : memref<256x128xbf16, #tpu.memory_space<vmem>>, vector<256x128xbf16>
    %cst_21 = arith.constant dense<0.000000e+00> : vector<160x128xf32>
    %48 = tpu.matmul %46, %47, %cst_21 {dimension_numbers = #tpu.dot_dimension_numbers<[1], [0], [0], [1], [0, 0, 1, 1], [], []>} : vector<160x256xbf16>, vector<256x128xbf16>, vector<160x128xf32> -> vector<160x128xf32>
    %c0_22 = arith.constant 0 : index
    %c0_23 = arith.constant 0 : index
    %49 = vector.load %arg6[%c0_22, %c0_23] : memref<1x128xf32, #tpu.memory_space<vmem>>, vector<1x128xf32>
    %50 = vector.broadcast %49 : vector<1x128xf32> to vector<160x128xf32>
    %51 = arith.addf %48, %50 : vector<160x128xf32>
    %52 = arith.truncf %51 : vector<160x128xf32> to vector<160x128xbf16>
    %c0_24 = arith.constant 0 : index
    %c0_25 = arith.constant 0 : index
    %53 = vector.load %arg7[%c0_24, %c0_25] : memref<160x128xbf16, #tpu.memory_space<vmem>>, vector<160x128xbf16>
    tpu.vector_store %arg7[%c0_24, %c0_25], %52 {strides = array<i32>} : memref<160x128xbf16, #tpu.memory_space<vmem>>, vector<160x128xbf16>,
    return
  }
  func.func @transform_0(%arg0: i32) -> (i32, i32) {
    %c0_i32 = arith.constant 0 : i32
    %c0_i32_0 = arith.constant 0 : i32
    return %arg0, %c0_i32 : i32, i32
  }
  func.func @transform_1(%arg0: i32) -> (i32, i32) {
    %c0_i32 = arith.constant 0 : i32
    %c0_i32_0 = arith.constant 0 : i32
    %c0_i32_1 = arith.constant 0 : i32
    return %c0_i32, %c0_i32_0 : i32, i32
  }
  func.func @transform_2(%arg0: i32) -> (i32, i32) {
    %c0_i32 = arith.constant 0 : i32
    %c0_i32_0 = arith.constant 0 : i32
    %c0_i32_1 = arith.constant 0 : i32
    return %c0_i32, %c0_i32_0 : i32, i32
  }
  func.func @transform_3(%arg0: i32) -> (i32, i32) {
    %c0_i32 = arith.constant 0 : i32
    %c0_i32_0 = arith.constant 0 : i32
    %c0_i32_1 = arith.constant 0 : i32
    return %c0_i32, %c0_i32_0 : i32, i32
  }
  func.func @transform_4(%arg0: i32) -> (i32, i32) {
    %c0_i32 = arith.constant 0 : i32
    %c0_i32_0 = arith.constant 0 : i32
    %c0_i32_1 = arith.constant 0 : i32
    return %c0_i32, %c0_i32_0 : i32, i32
  }
  func.func @transform_5(%arg0: i32) -> (i32, i32) {
    %c0_i32 = arith.constant 0 : i32
    %c0_i32_0 = arith.constant 0 : i32
    %c0_i32_1 = arith.constant 0 : i32
    return %c0_i32, %c0_i32_0 : i32, i32
  }
  func.func @transform_6(%arg0: i32) -> (i32, i32) {
    %c0_i32 = arith.constant 0 : i32
    %c0_i32_0 = arith.constant 0 : i32
    return %arg0, %c0_i32 : i32, i32
  }
}

</mosaic_0001>

<bundles_post_ra>
// kernel: _forward_padded.1
= control target key start
LH: loop header
LB: loop body
LE: loop exit
PB: predicated region body
PF: predicated region fallthrough
CT: control target
= control target key end

     0   :  { %11 = vsyncpa [#allocation3], 0  ;;  %s4576_s0 = inlined_call_operand.hbm [shape: bf16[320,256], index: 0, kind: input, shape index: {}]   ;;  %s4577_s1 = inlined_call_operand.hbm [shape: bf16[256,256], index: 1, kind: input, shape index: {}]   ;;  %s4578_s2 = inlined_call_operand.hbm [shape: f32[8,256], index: 2, kind: input, shape index: {}]   ;;  %s4579_s3 = inlined_call_operand.hbm [shape: bf16[256,256], index: 3, kind: input, shape index: {}]   ;;  %s4580_s4 = inlined_call_operand.hbm [shape: bf16[256,128], index: 4, kind: input, shape index: {}]   ;;  %s4581_s5 = inlined_call_operand.vmem [shape: f32[1,128], index: 5, kind: input, shape index: {}]   ;;  %s4582_s6 = inlined_call_operand.hbm [shape: bf16[320,128], index: 6, kind: output, shape index: {}]  }
   0x1   :  { %13 = vsyncpa [#allocation3 + $0x1], 0 }
   0x2   :  { %14 = vsyncpa [#allocation6], 0 }
   0x3   :  { %15 = vsyncpa [#allocation9], 0 }
   0x4   :  { %16 = vsyncpa [#allocation4], 0 }
   0x5   :  { %18 = vsyncpa [#allocation4 + $0x1], 0  ;;  %s3376_s21 = smov 0   ;;  %s3378_s22 = smov 0  }
   0x6   :  { %s3380_s23 = smov 0   ;;  %s3382_s24 = smov 0  }
   0x7 LB: > { %s3397_s25 = sadd.s32 4294967295, %s3327_s24   ;;  %s2452_s26 = sadd.s32 4294967294, %s3327_s24   ;;  %s3327_s24 = sphi %s3382_s24, %s4658_s24   ;;  %s3323_s23 = sphi %s3380_s23, %s4657_s23   ;;  %s3319_s22 = sphi %s3378_s22, %s4656_s22   ;;  %s3315_s21 = sphi %s3376_s21, %s4655_s21  }
   0x8   : > { %p44_p0 = scmp.ne.s32.totalorder %s3319_s22, %s3315_s21  ;;  %p4583_p1 = scmp.eq.s32.totalorder %s3397_s25, 0 }
   0x9   : > { %p179_p3 = scmp.eq.s32.totalorder %s2452_s26, 1  ;;  %p2453_p5 = scmp.ge.s32.totalorder %s3327_s24, 1 }
   0xa   : > { %p3406_p4 = por %p4583_p1, %p44_p0  ;;  %p186_p7 = scmp.lt.s32.totalorder %s3327_s24, 3 }
   0xb   : > { %p3411_p6 = por %p179_p3, %p44_p0  ;;  %s3329_s30 = smov [#allocation5]  }
   0xc   : > { %s4605_s27 = scalar_select %p3406_p4, 1, 0 }
   0xd   : > { %s4606_s28 = scalar_select %p3411_p6, 1, 0 }
   0xe   : > { %p3416_p8 = pnand %p2453_p5, %p186_p7  ;;  %s198_s7 = sshll.u32 %s3329_s30, 4  ;;  %s199_s7 = int_to_ptr.vmem [resolvable:$true] %s198_s7 }
   0xf   : > { %s3330_s9 = smov [#allocation8]   ;;  %s3331_s11 = smov [#allocation7]  }
  0x10   : > { %s4607_s29 = scalar_select %p3416_p8, 1, 0 }
  0x11   : > { %p2788_p9 = pneg %p3416_p8  ;;  %s222_s10 = sshll.u32 %s3330_s9, 4  ;;  %s223_s10 = int_to_ptr.vmem [resolvable:$true] %s222_s10 }
  0x12   : > { %s212_s12 = sshll.u32 %s3331_s11, 4  ;;  %s3134_s13 = scalar_lea.vmem %s199_s7, 4096  ;;  %s213_s12 = int_to_ptr.vmem [resolvable:$true] %s212_s12 }
  0x13   : > { %p3425_p11 = pnand %p2788_p9, %p4583_p1  ;;  %p3135_p13 = scmp.ne.s32.totalorder %s199_s7, %s3134_s13 }
  0x14   : > { %p3142_p5 = scmp.lt.s32.totalorder %s199_s7, %s199_s7  ;;  %p3143_p7 = scmp.lt.s32.totalorder %s3134_s13, %s3134_s13 }
  0x15   : > { %p3125_p12 = pneg %p3425_p11 }
  0x16   : > { %p3144_p9 = por %p3143_p7, %p3142_p5 }
  0x17   : > { %p3137_p0 = pnand %p3135_p13, %p3125_p12 }
  0x19   : > { %p3138_p3 = pneg %p3137_p0 }
  0x1b   : > { %p3145_p10 = pnand %p3144_p9, %p3138_p3 }
  0x1d   : > { %3148 = shalt.err (!%p3145_p10)
}
  0x1e   : > { %s4584_s14 = smov 128   ;;  %s4585_s15 = smov 8  }
  0x1f   : > { %2791 = dma.hbm_to_vmem [thread:$0]  (!%p3425_p11), %s4577_s1, 4096, %s199_s7, [#allocation6], %s4584_s14, %s4584_s14, %s4585_s15  }
  0x20   : > { %s3160_s18 = scalar_lea.vmem %s223_s10, 4096  ;;  %p3168_p3 = scmp.lt.s32.totalorder %s223_s10, %s223_s10 }
  0x21   : > { %p3161_p13 = scmp.ne.s32.totalorder %s223_s10, %s3160_s18  ;;  %p3169_p10 = scmp.lt.s32.totalorder %s3160_s18, %s3160_s18 }
  0x23   : > { %p3163_p0 = pnand %p3161_p13, %p3125_p12  ;;  %p3170_p7 = por %p3169_p10, %p3168_p3 }
  0x25   : > { %p3164_p5 = pneg %p3163_p0 }
  0x27   : > { %p3171_p9 = pnand %p3170_p7, %p3164_p5 }
  0x29   : > { %3174 = shalt.err (!%p3171_p9)
}
  0x2a   : > { %2797 = dma.hbm_to_vmem [thread:$0]  (!%p3425_p11), %s4579_s3, 4096, %s223_s10, [#allocation9], %s4584_s14, %s4584_s14, %s4585_s15  }
  0x2b   : > { %s3186_s26 = scalar_lea.vmem %s213_s12, 256  ;;  %p3194_p3 = scmp.lt.s32.totalorder %s213_s12, %s213_s12 }
  0x2c   : > { %p3187_p1 = scmp.ne.s32.totalorder %s213_s12, %s3186_s26  ;;  %p3195_p5 = scmp.lt.s32.totalorder %s3186_s26, %s3186_s26 }
  0x2e   : > { %p3189_p13 = pnand %p3187_p1, %p3125_p12  ;;  %p3196_p10 = por %p3195_p5, %p3194_p3 }
  0x30   : > { %p3190_p0 = pneg %p3189_p13 }
  0x32   : > { %p3197_p7 = pnand %p3196_p10, %p3190_p0 }
  0x34   : > { %3200 = shalt.err (!%p3197_p7)
}
  0x35   : > { %2794 = dma.hbm_to_vmem [thread:$0]  (!%p3425_p11), %s4578_s2, 256, %s213_s12, [#allocation6]  }
  0x36   : > { %s3334_s9 = smov [#allocation10]  }
  0x37   : > { %s235_s10 = sshll.u32 %s3334_s9, 4  ;;  %s236_s10 = int_to_ptr.vmem [resolvable:$true] %s235_s10 }
  0x38   : > { %s3212_s11 = scalar_lea.vmem %s236_s10, 2048  ;;  %p3220_p2 = scmp.lt.s32.totalorder %s236_s10, %s236_s10 }
  0x39   : > { %p3213_p9 = scmp.ne.s32.totalorder %s236_s10, %s3212_s11  ;;  %p3221_p3 = scmp.lt.s32.totalorder %s3212_s11, %s3212_s11 }
  0x3b   : > { %p3215_p1 = pnand %p3213_p9, %p3125_p12  ;;  %p3222_p0 = por %p3221_p3, %p3220_p2 }
  0x3d   : > { %p3216_p13 = pneg %p3215_p1 }
  0x3f   : > { %p3223_p5 = pnand %p3222_p0, %p3216_p13 }
  0x41   : > { %3226 = shalt.err (!%p3223_p5)
}
  0x42   : > { %s3335_s13 = smov 64   ;;  %s3336_s12 = smov 4  }
  0x43   : > { %2800 = dma.hbm_to_vmem [thread:$0]  (!%p3425_p11), %s4580_s4, 2048, %s236_s10, [#allocation9], %s3335_s13, %s3335_s13, %s3336_s12  }
  0x44   : > { %s3470_s18 = sadd.s32 1, %s3327_s24   ;;  %s31_s20 = sadd.s32 1, %s3323_s23 }
  0x45   : > { %s28_s19 = ssub.s32 %s3327_s24, %s3470_s18  ;;  %p38_p12 = scmp.ne.s32.totalorder %s3323_s23, %s3319_s22 }
  0x46   : > { %p29_p2 = scmp.eq.s32.totalorder %s28_s19, 0  ;;  %p39_p10 = scmp.eq.s32.totalorder %s3327_s24, 0 }
  0x47   : > { %p4609_p9 = scmp.eq.s32.totalorder %s3397_s25, 1  ;;  %p2813_p13 = scmp.lt.s32.totalorder %s3327_s24, 2 }
  0x48   : > { %s3479_s26 = scalar_select %p29_p2, %s3323_s23, %s31_s20  }
  0x49   : > { %p40_p7 = por %p39_p10, %p38_p12  ;;  %p3483_p1 = por %p4609_p9, %p38_p12 }
  0x4a   : > { %s252_s8 = sand.u32 1, %s3323_s23   ;;  %s2663_s9 = smul.u32 2560, %s3327_s24 }
  0x4b   : > { %s4610_s30 = scalar_select %p3483_p1, 1, 0 }
  0x4c   : > { %s2765_s7 = smul.u32 160, %s252_s8  ;;  %p3490_p11 = pnand %p2813_p13, %p40_p7 }
  0x4d   : > { %s3497_s12 = scalar_lea.hbm %s4576_s0, %s2663_s9  ;;  %s3501_s19 = scalar_lea.sflag [#allocation3], %s252_s8 }
  0x4e   : > { %s256_s16 = scalar_lea.vmem [#allocation2], %s2765_s7  ;;  %s3227_s20 = scalar_lea.hbm %s3497_s12, 2560 }
  0x4f   : > { %s264_s17 = sshll.u32 %s256_s16, 4  ;;  %p3228_p3 = scmp.ne.s32.totalorder %s3497_s12, %s3227_s20  ;;  %s3499_s17 = int_to_ptr.vmem [resolvable:$true] %s264_s17 }
  0x50   : > { %p3229_p0 = pneg %p3490_p11  ;;  %s3232_s9 = scalar_lea.hbm %s4576_s0, 5120 }
  0x51   : > { %p3233_p12 = scmp.lt.s32.totalorder %s3497_s12, %s4576_s0  ;;  %p3234_p10 = scmp.lt.s32.totalorder %s3232_s9, %s3227_s20 }
  0x52   : > { %p3230_p5 = pnand %p3229_p0, %p3228_p3 }
  0x53   : > { %p3235_p7 = por %p3234_p10, %p3233_p12 }
  0x54   : > { %p3231_p2 = pneg %p3230_p5 }
  0x56   : > { %p3236_p9 = pnand %p3235_p7, %p3231_p2 }
  0x58   : > { %3239 = shalt.err (!%p3236_p9)
}
  0x59   : > { %s3240_s8 = scalar_lea.vmem %s3499_s17, 2560  ;;  %s3337_s7 = smov [#allocation2]  }
  0x5a   : > { %p3241_p13 = scmp.ne.s32.totalorder %s3499_s17, %s3240_s8  ;;  %s3245_s16 = sshll.u32 %s3337_s7, 4  ;;  %s3246_s16 = int_to_ptr.vmem [resolvable:$false] %s3245_s16 }
  0x5b   : > { %s3247_s14 = scalar_lea.vmem %s3246_s16, 5120  ;;  %p3248_p5 = scmp.lt.s32.totalorder %s3499_s17, %s3246_s16 }
  0x5c   : > { %p3243_p6 = pnand %p3241_p13, %p3229_p0  ;;  %p3249_p1 = scmp.lt.s32.totalorder %s3247_s14, %s3240_s8 }
  0x5e   : > { %p3244_p3 = pneg %p3243_p6  ;;  %p3250_p4 = por %p3249_p1, %p3248_p5 }
  0x60   : > { %p3251_p8 = pnand %p3250_p4, %p3244_p3 }
  0x62   : > { %3254 = shalt.err (!%p3251_p8)
}
  0x63   : > { %s4612_s15 = smov 8   ;;  %s4613_s20 = smov 128  }
  0x64   : > { %2804 = dma.hbm_to_vmem [thread:$0]  (!%p3490_p11), %s3497_s12, 2560, %s3499_s17, %s3501_s19, %s4613_s20, %s4613_s20, %s4612_s15  }
  0x65   : > { %p4614_p6 = scmp.ne.s32.totalorder %s4607_s29, 0 }
  0x67   : > { %276 = sbr.rel (%p4614_p6) target bundleno = 1112 (0x458), region = 44 }
  0x6c   : > { %s3528_s11 = sand.u32 1, %s3319_s22   ;;  %p4615_p4 = scmp.ne.s32.totalorder %s4605_s27, 0 }
  0x6d   : > { %s2766_s9 = smul.u32 160, %s3528_s11  ;;  %s279_s13 = scalar_lea.sflag [#allocation3], %s3528_s11 }
  0x6f   : > { %s3532_s8 = scalar_lea.vmem [#allocation2], %s2766_s9 }
  0x70   : > { %3298 = dma.done.wait (%p4615_p4), %s279_s13, 2560  }
  0x71   : > { %3300 = vsyncadd (%p4615_p4), %s279_s13, 4294964736  ;;  %p4616_p8 = scmp.eq.s32.totalorder %s3397_s25, 0 }
  0x73   : > { %3302 = dma.done.wait (%p4616_p8), [#allocation6], 4352   ;;  %p4617_p1 = pmov %p4616_p8 }
  0x75   : > { %3304 = vsyncadd (%p4617_p1), [#allocation6], 4294962944  ;;  %p4618_p11 = pmov %p4617_p1 }
  0x76   : > { %p4619_p0 = pmov %p4617_p1 }
  0x77   : > { %3306 = dma.done.wait (%p4618_p11), [#allocation9], 6144  }
  0x78   : > { %3308 = vsyncadd (%p4619_p0), [#allocation9], 4294961152  ;;  %v2861_v0 = vld [vmem:[#allocation5 + $0x74] ss:$8 sps:$4 sm:$0xff]   ;;  %v2863_v1 = vld [vmem:[#allocation5 + $0x70] ss:$8 sps:$4 sm:$0xff]   ;;  %v384_v52 = vlaneseq }
  0x79   : > { %654 = vmatprep.subr.bf16.mxu0 %v2861_v0  ;;  %v2864_v2 = vld [vmem:[#allocation5 + $0x64] ss:$8 sps:$4 sm:$0xff]   ;;  %v2866_v3 = vld [vmem:[#allocation5 + $0x60] ss:$8 sps:$4 sm:$0xff]   ;;  %v2867_v4 = vld [vmem:[#allocation5 + $0x54] ss:$8 sps:$4 sm:$0xff]  }
  0x7a   : > { %655 = vmatpush1.bf16.msra.mxu0 %v2863_v1  ;;  %v2869_v5 = vld [vmem:[#allocation5 + $0x50] ss:$8 sps:$4 sm:$0xff]   ;;  %v2870_v6 = vld [vmem:[#allocation5 + $0x44] ss:$8 sps:$4 sm:$0xff]   ;;  %v2872_v7 = vld [vmem:[#allocation5 + $0x40] ss:$8 sps:$4 sm:$0xff]  }
  0x7b   : > { %656 = vmatprep.subr.bf16.mxu0 %v2864_v2  ;;  %v2873_v8 = vld [vmem:[#allocation5 + $0x34] ss:$8 sps:$4 sm:$0xff]   ;;  %v2875_v9 = vld [vmem:[#allocation5 + $0x30] ss:$8 sps:$4 sm:$0xff]   ;;  %v2876_v10 = vld [vmem:[#allocation5 + $0x24] ss:$8 sps:$4 sm:$0xff]  }
  0x7c   : > { %v2878_v11 = vld [vmem:[#allocation5 + $0x20] ss:$8 sps:$4 sm:$0xff]   ;;  %v2879_v12 = vld [vmem:[#allocation5 + $0x14] ss:$8 sps:$4 sm:$0xff]   ;;  %v2911_v13 = vld [vmem:[%s3532_s8 + $0x4] ss:$8 sps:$4 sm:$0xff]  }
  0x7d   : > { %v2881_v14 = vld [vmem:[#allocation5 + $0x10] ss:$8 sps:$4 sm:$0xff]   ;;  %v2882_v15 = vld [vmem:[#allocation5 + $0x4] ss:$8 sps:$4 sm:$0xff]   ;;  %686 = vmatprep.mubr.bf16.mxu0 %v2911_v13  ;;  %v2884_v16 = vld [vmem:[#allocation5] ss:$8 sps:$4 sm:$0xff]  }
  0x7e   : > { %657 = vmatpush1.bf16.msra.mxu0 %v2866_v3  ;;  %v2885_v17 = vld [vmem:[#allocation5 + $0xf4] ss:$8 sps:$4 sm:$0xff]   ;;  %v2887_v18 = vld [vmem:[#allocation5 + $0xf0] ss:$8 sps:$4 sm:$0xff]   ;;  %v2888_v19 = vld [vmem:[#allocation5 + $0xe4] ss:$8 sps:$4 sm:$0xff]  }
  0x7f   : > { %658 = vmatprep.subr.bf16.mxu0 %v2867_v4  ;;  %v2890_v20 = vld [vmem:[#allocation5 + $0xe0] ss:$8 sps:$4 sm:$0xff]   ;;  %v2891_v21 = vld [vmem:[#allocation5 + $0xd4] ss:$8 sps:$4 sm:$0xff]   ;;  %v2893_v22 = vld [vmem:[#allocation5 + $0xd0] ss:$8 sps:$4 sm:$0xff]  }
  0x80   : > { %v2894_v23 = vld [vmem:[#allocation5 + $0xc4] ss:$8 sps:$4 sm:$0xff]   ;;  %v2896_v24 = vld [vmem:[#allocation5 + $0xc0] ss:$8 sps:$4 sm:$0xff]   ;;  %v2897_v25 = vld [vmem:[#allocation5 + $0xb4] ss:$8 sps:$4 sm:$0xff]  }
  0x81   : > { %v2899_v26 = vld [vmem:[#allocation5 + $0xb0] ss:$8 sps:$4 sm:$0xff]   ;;  %v2900_v27 = vld [vmem:[#allocation5 + $0xa4] ss:$8 sps:$4 sm:$0xff]   ;;  %v2902_v28 = vld [vmem:[#allocation5 + $0xa0] ss:$8 sps:$4 sm:$0xff]  }
  0x82   : > { %659 = vmatpush1.bf16.msra.mxu0 %v2869_v5  ;;  %v2903_v29 = vld [vmem:[#allocation5 + $0x94] ss:$8 sps:$4 sm:$0xff]   ;;  %v2905_v30 = vld [vmem:[#allocation5 + $0x90] ss:$8 sps:$4 sm:$0xff]   ;;  %v2906_v31 = vld [vmem:[#allocation5 + $0x84] ss:$8 sps:$4 sm:$0xff]  }
  0x83   : > { %660 = vmatprep.subr.bf16.mxu0 %v2870_v6  ;;  %v2908_v32 = vld [vmem:[#allocation5 + $0x80] ss:$8 sps:$4 sm:$0xff]   ;;  %v2912_v34 = vld [vmem:[%s3532_s8 + $0x14] ss:$8 sps:$4 sm:$0xff]   ;;  %v2914_v35 = vld [vmem:[%s3532_s8 + $0x10] ss:$8 sps:$4 sm:$0xff]  }
  0x84   : > { %v2909_v33 = vld [vmem:[%s3532_s8] ss:$8 sps:$4 sm:$0xff]   ;;  %v2915_v36 = vld [vmem:[%s3532_s8 + $0x24] ss:$8 sps:$4 sm:$0xff]   ;;  %v2918_v38 = vld [vmem:[%s3532_s8 + $0x34] ss:$8 sps:$4 sm:$0xff]  }
  0x85   : > { %v2917_v37 = vld [vmem:[%s3532_s8 + $0x20] ss:$8 sps:$4 sm:$0xff]   ;;  %v2920_v39 = vld [vmem:[%s3532_s8 + $0x30] ss:$8 sps:$4 sm:$0xff]   ;;  %v2921_v40 = vld [vmem:[%s3532_s8 + $0x44] ss:$8 sps:$4 sm:$0xff]  }
  0x86   : > { %661 = vmatpush1.bf16.msra.mxu0 %v2872_v7  ;;  %v2923_v41 = vld [vmem:[%s3532_s8 + $0x40] ss:$8 sps:$4 sm:$0xff]   ;;  %v2924_v42 = vld [vmem:[%s3532_s8 + $0x54] ss:$8 sps:$4 sm:$0xff]   ;;  %v2926_v43 = vld [vmem:[%s3532_s8 + $0x50] ss:$8 sps:$4 sm:$0xff]  }
  0x87   : > { %662 = vmatprep.subr.bf16.mxu0 %v2873_v8  ;;  %v2927_v44 = vld [vmem:[%s3532_s8 + $0x64] ss:$8 sps:$4 sm:$0xff]   ;;  %v2929_v45 = vld [vmem:[%s3532_s8 + $0x60] ss:$8 sps:$4 sm:$0xff]   ;;  %v2930_v46 = vld [vmem:[%s3532_s8 + $0x74] ss:$8 sps:$4 sm:$0xff]  }
  0x88   : > { %v2932_v47 = vld [vmem:[%s3532_s8 + $0x70] ss:$8 sps:$4 sm:$0xff]   ;;  %v2933_v48 = vld [vmem:[%s3532_s8 + $0x84] ss:$8 sps:$4 sm:$0xff]   ;;  %v2935_v49 = vld [vmem:[%s3532_s8 + $0x80] ss:$8 sps:$4 sm:$0xff]  }
  0x89   : > { %v2936_v50 = vld [vmem:[%s3532_s8 + $0x94] ss:$8 sps:$4 sm:$0xff]   ;;  %v2938_v51 = vld [vmem:[%s3532_s8 + $0x90] ss:$8 sps:$4 sm:$0xff]   ;;  %v385_v53 = vshrl.u32 %v384_v52, 7  ;;  %s2767_s10 = smul.u32 80, %s3528_s11 }
  0x8a   : > { %663 = vmatpush1.bf16.msra.mxu0 %v2875_v9  ;;  %v382_v55 = vld [vmem:[#allocation7] ss:$8 sm:$0x3]  ;;  %s2612_s17 = smul.u32 1280, %s3397_s25  ;;  %s2328_s15 = scalar_lea.sflag [#allocation4], %s3528_s11 }
  0x8b   : > { %664 = vmatprep.subr.bf16.mxu0 %v2876_v10  ;;  %v3566_v54 = vsub.s32 0, %v385_v53  ;;  %v3568_v56 = vsub.s32 1, %v385_v53  ;;  %s4496_s12 = scalar_lea.vmem [#allocation11], %s2767_s10  ;;  %p4652_p12 = scmp.ne.s32.totalorder %s4610_s30, 0 }
  0x8c   : > { %s2341_s19 = sshll.u32 %s4496_s12, 4  ;;  %s4530_s14 = scalar_lea.hbm %s4582_s6, %s2612_s17  ;;  %s4532_s19 = int_to_ptr.vmem [resolvable:$true] %s2341_s19 }
  0x8d   : > { %v3571_v57 = vrot.slane %v382_v55, %v3566_v54  ;;  %v3574_v58 = vrot.slane %v382_v55, %v3568_v56  ;;  %s3255_s25 = scalar_lea.vmem %s4532_s19, 1280  ;;  %s3338_s20 = smov [#allocation11]  }
  0x8e   : > { %665 = vmatpush1.bf16.msra.mxu0 %v2878_v11  ;;  %p3256_p2 = scmp.ne.s32.totalorder %s4532_s19, %s3255_s25  ;;  %s3259_s9 = sshll.u32 %s3338_s20, 4  ;;  %s3260_s9 = int_to_ptr.vmem [resolvable:$false] %s3259_s9 }
  0x8f   : > { %666 = vmatprep.subr.bf16.mxu0 %v2879_v12  ;;  %s3261_s13 = scalar_lea.vmem %s3260_s9, 2560  ;;  %p3262_p9 = scmp.lt.s32.totalorder %s4532_s19, %s3260_s9 }
  0x90   : > { %p3257_p10 = pnand %p3256_p2, %p4652_p12  ;;  %p3263_p13 = scmp.lt.s32.totalorder %s3261_s13, %s3255_s25 }
  0x92   : > { %667 = vmatpush1.bf16.msra.mxu0 %v2881_v14  ;;  %p3258_p7 = pneg %p3257_p10  ;;  %p3264_p3 = por %p3263_p13, %p3262_p9 }
  0x93   : > { %668 = vmatprep.subr.bf16.mxu0 %v2882_v15 }
  0x94   : > { %p3265_p5 = pnand %p3264_p3, %p3258_p7 }
  0x96   : > { %669 = vmatpush1.bf16.msra.mxu0 %v2884_v16 }
  0x97   : > { %670 = vmatprep.subr.bf16.mxu0 %v2885_v17 }
  0x9a   : > { %671 = vmatpush2.bf16.msra.mxu0 %v2887_v18 }
  0x9b   : > { %672 = vmatprep.subr.bf16.mxu0 %v2888_v19 }
  0x9e   : > { %673 = vmatpush2.bf16.msra.mxu0 %v2890_v20 }
  0x9f   : > { %674 = vmatprep.subr.bf16.mxu0 %v2891_v21 }
  0xa2   : > { %675 = vmatpush2.bf16.msra.mxu0 %v2893_v22 }
  0xa3   : > { %676 = vmatprep.subr.bf16.mxu0 %v2894_v23 }
  0xa6   : > { %677 = vmatpush2.bf16.msra.mxu0 %v2896_v24 }
  0xa7   : > { %678 = vmatprep.subr.bf16.mxu0 %v2897_v25 }
  0xaa   : > { %679 = vmatpush2.bf16.msra.mxu0 %v2899_v26 }
  0xab   : > { %680 = vmatprep.subr.bf16.mxu0 %v2900_v27 }
  0xae   : > { %681 = vmatpush2.bf16.msra.mxu0 %v2902_v28 }
  0xaf   : > { %682 = vmatprep.subr.bf16.mxu0 %v2903_v29 }
  0xb2   : > { %683 = vmatpush2.bf16.msra.mxu0 %v2905_v30 }
  0xb3   : > { %684 = vmatprep.subr.bf16.mxu0 %v2906_v31 }
  0xb6   : > { %685 = vmatpush2.bf16.msra.mxu0 %v2908_v32 }
  0xb9   : > { %687 = vmatmul.mubr.bf16.vlgmr.msra.gmra.mxu0 %v2909_v33 }
  0xba   : > { %696 = vmatprep.mubr.bf16.mxu0 %v2912_v34 }
  0xc1   : > { %697 = vmatmul.mubr.bf16.gmra.mxu0 %v2914_v35 }
  0xc2   : > { %706 = vmatprep.mubr.bf16.mxu0 %v2915_v36 }
  0xc9   : > { %707 = vmatmul.mubr.bf16.gmra.mxu0 %v2917_v37 }
  0xca   : > { %716 = vmatprep.mubr.bf16.mxu0 %v2918_v38 }
  0xd1   : > { %717 = vmatmul.mubr.bf16.gmra.mxu0 %v2920_v39 }
  0xd2   : > { %726 = vmatprep.mubr.bf16.mxu0 %v2921_v40 }
  0xd9   : > { %727 = vmatmul.mubr.bf16.gmra.mxu0 %v2923_v41 }
  0xda   : > { %736 = vmatprep.mubr.bf16.mxu0 %v2924_v42 }
  0xe1   : > { %737 = vmatmul.mubr.bf16.gmra.mxu0 %v2926_v43 }
  0xe2   : > { %746 = vmatprep.mubr.bf16.mxu0 %v2927_v44 }
  0xe9   : > { %747 = vmatmul.mubr.bf16.gmra.mxu0 %v2929_v45 }
  0xea   : > { %756 = vmatprep.mubr.bf16.mxu0 %v2930_v46 }
  0xf1   : > { %757 = vmatmul.mubr.bf16.gmra.mxu0 %v2932_v47  ;;  %v2939_v47 = vld [vmem:[#allocation8 + $0x74] ss:$8 sps:$4 sm:$0xff]  }
  0xf2   : > { %766 = vmatprep.mubr.bf16.mxu0 %v2933_v48  ;;  %v2941_v48 = vld [vmem:[#allocation8 + $0x70] ss:$8 sps:$4 sm:$0xff]   ;;  %1826 = vmatprep.subr.bf16.mxu1 %v2939_v47  ;;  %v2950_v47 = vld [vmem:[#allocation8 + $0x40] ss:$8 sps:$4 sm:$0xff]  }
  0xf3   : > { %1827 = vmatpush1.bf16.msra.mxu1 %v2941_v48 }
  0xf9   : > { %767 = vmatmul.mubr.bf16.gmra.mxu0 %v2935_v49  ;;  %v2942_v49 = vld [vmem:[#allocation8 + $0x64] ss:$8 sps:$4 sm:$0xff]  }
  0xfa   : > { %776 = vmatprep.mubr.bf16.mxu0 %v2936_v50  ;;  %1828 = vmatprep.subr.bf16.mxu1 %v2942_v49 }
 0x101   : > { %777 = vmatmul.mubr.bf16.gmra.mxu0 %v2938_v51 }
 0x179   : > { %v688_v59 = vpop.f32.mrf.mxu0 }
 0x17a   : > { %v3577_v60 = vadd.f32 %v688_v59, %v3571_v57 }
 0x17b   : > { %v690_v61 = vpop.f32.mrf.mxu0 }
 0x17c   : > { %v787_v62 = vmul.f32 %v3577_v60, %v3577_v60  ;;  %v3582_v63 = vadd.f32 %v690_v61, %v3574_v58 }
 0x17d   : > { %v692_v0 = vpop.f32.mrf.mxu0 }
 0x17e   : > { %v827_v1 = vmul.f32 %v787_v62, %v3577_v60  ;;  %v788_v2 = vmul.f32 %v3582_v63, %v3582_v63  ;;  %v3588_v3 = vadd.f32 %v692_v0, %v3571_v57 }
 0x17f   : > { %v694_v4 = vpop.f32.mrf.mxu0 }
 0x180   : > { %v867_v5 = vmul.f32 0.044715, %v827_v1  ;;  %v828_v6 = vmul.f32 %v788_v2, %v3582_v63  ;;  %v789_v7 = vmul.f32 %v3588_v3, %v3588_v3  ;;  %v3594_v8 = vadd.f32 %v694_v4, %v3574_v58  ;;  %v2944_v4 = vld [vmem:[#allocation8 + $0x60] ss:$8 sps:$4 sm:$0xff]  }
 0x181   : > { %v698_v9 = vpop.f32.mrf.mxu0  ;;  %1829 = vmatpush1.bf16.msra.mxu1 %v2944_v4 }
 0x182   : > { %v907_v10 = vadd.f32 %v867_v5, %v3577_v60  ;;  %v868_v11 = vmul.f32 0.044715, %v828_v6  ;;  %v829_v12 = vmul.f32 %v789_v7, %v3588_v3  ;;  %v790_v13 = vmul.f32 %v3594_v8, %v3594_v8 }
 0x183   : > { %v3601_v14 = vadd.f32 %v698_v9, %v3571_v57  ;;  %v700_v15 = vpop.f32.mrf.mxu0 }
 0x184   : > { %v947_v16 = vmul.f32 0.7978846, %v907_v10  ;;  %v908_v17 = vadd.f32 %v868_v11, %v3582_v63  ;;  %v869_v18 = vmul.f32 0.044715, %v829_v12  ;;  %v830_v19 = vmul.f32 %v790_v13, %v3594_v8  ;;  %v2945_v10 = vld [vmem:[#allocation8 + $0x54] ss:$8 sps:$4 sm:$0xff]  }
 0x185   : > { %v791_v20 = vmul.f32 %v3601_v14, %v3601_v14  ;;  %v3608_v21 = vadd.f32 %v700_v15, %v3574_v58  ;;  %v702_v22 = vpop.f32.mrf.mxu0  ;;  %1830 = vmatprep.subr.bf16.mxu1 %v2945_v10 }
 0x186   : > { %3003 = vtanh.f32 %v947_v16  ;;  %v948_v23 = vmul.f32 0.7978846, %v908_v17  ;;  %v909_v24 = vadd.f32 %v869_v18, %v3588_v3  ;;  %v870_v25 = vmul.f32 0.044715, %v830_v19 }
 0x187   : > { %v831_v26 = vmul.f32 %v791_v20, %v3601_v14  ;;  %v792_v27 = vmul.f32 %v3608_v21, %v3608_v21  ;;  %v3615_v28 = vadd.f32 %v702_v22, %v3571_v57  ;;  %v704_v29 = vpop.f32.mrf.mxu0 }
 0x188   : > { %3005 = vtanh.f32 %v948_v23  ;;  %v949_v30 = vmul.f32 0.7978846, %v909_v24  ;;  %v910_v31 = vadd.f32 %v870_v25, %v3594_v8  ;;  %v3619_v32 = vadd.f32 %v704_v29, %v3574_v58  ;;  %v2947_v24 = vld [vmem:[#allocation8 + $0x50] ss:$8 sps:$4 sm:$0xff]   ;;  %v2948_v29 = vld [vmem:[#allocation8 + $0x44] ss:$8 sps:$4 sm:$0xff]  }
 0x189   : > { %v871_v33 = vmul.f32 0.044715, %v831_v26  ;;  %v832_v34 = vmul.f32 %v792_v27, %v3608_v21  ;;  %v793_v35 = vmul.f32 %v3615_v28, %v3615_v28  ;;  %v708_v36 = vpop.f32.mrf.mxu0  ;;  %1831 = vmatpush1.bf16.msra.mxu1 %v2947_v24 }
 0x18a   : > { %v950_v37 = vmul.f32 0.7978846, %v910_v31  ;;  %v794_v38 = vmul.f32 %v3619_v32, %v3619_v32  ;;  %v3627_v39 = vadd.f32 %v708_v36, %v3571_v57  ;;  %3007 = vtanh.f32 %v949_v30  ;;  %1832 = vmatprep.subr.bf16.mxu1 %v2948_v29 }
 0x18b   : > { %v911_v40 = vadd.f32 %v871_v33, %v3601_v14  ;;  %v872_v41 = vmul.f32 0.044715, %v832_v34  ;;  %v833_v42 = vmul.f32 %v793_v35, %v3615_v28  ;;  %v710_v43 = vpop.f32.mrf.mxu0 }
 0x18c   : > { %v834_v44 = vmul.f32 %v794_v38, %v3619_v32  ;;  %v795_v45 = vmul.f32 %v3627_v39, %v3627_v39  ;;  %v3635_v46 = vadd.f32 %v710_v43, %v3574_v58  ;;  %3009 = vtanh.f32 %v950_v37 }
 0x18d   : > { %v951_v50 = vmul.f32 0.7978846, %v911_v40  ;;  %v912_v51 = vadd.f32 %v872_v41, %v3608_v21  ;;  %v873_v52 = vmul.f32 0.044715, %v833_v42  ;;  %v712_v53 = vpop.f32.mrf.mxu0  ;;  %1833 = vmatpush1.bf16.msra.mxu1 %v2950_v47 }
 0x18e   : > { %v874_v55 = vmul.f32 0.044715, %v834_v44  ;;  %v835_v59 = vmul.f32 %v795_v45, %v3627_v39  ;;  %v796_v61 = vmul.f32 %v3635_v46, %v3635_v46  ;;  %v3642_v62 = vadd.f32 %v712_v53, %v3571_v57 }
 0x18f   : > { %3011 = vtanh.f32 %v951_v50  ;;  %v952_v0 = vmul.f32 0.7978846, %v912_v51  ;;  %v913_v1 = vadd.f32 %v873_v52, %v3615_v28  ;;  %v714_v2 = vpop.f32.mrf.mxu0  ;;  %v2951_v51 = vld [vmem:[#allocation8 + $0x34] ss:$8 sps:$4 sm:$0xff]  }
 0x190   : > { %v914_v5 = vadd.f32 %v874_v55, %v3619_v32  ;;  %v875_v6 = vmul.f32 0.044715, %v835_v59  ;;  %v836_v7 = vmul.f32 %v796_v61, %v3635_v46  ;;  %v797_v9 = vmul.f32 %v3642_v62, %v3642_v62  ;;  %1834 = vmatprep.subr.bf16.mxu1 %v2951_v51 }
 0x191   : > { %3013 = vtanh.f32 %v952_v0  ;;  %v953_v11 = vmul.f32 0.7978846, %v913_v1  ;;  %v3650_v12 = vadd.f32 %v714_v2, %v3574_v58  ;;  %v718_v13 = vpop.f32.mrf.mxu0 }
 0x192   : > { %v954_v15 = vmul.f32 0.7978846, %v914_v5  ;;  %v915_v16 = vadd.f32 %v875_v6, %v3627_v39  ;;  %v876_v17 = vmul.f32 0.044715, %v836_v7  ;;  %v837_v18 = vmul.f32 %v797_v9, %v3642_v62  ;;  %v2953_v6 = vld [vmem:[#allocation8 + $0x30] ss:$8 sps:$4 sm:$0xff]  }
 0x193   : > { %v3004_v19 = vpop.eup %3003  ;;  %3015 = vtanh.f32 %v953_v11  ;;  %v798_v20 = vmul.f32 %v3650_v12, %v3650_v12  ;;  %v3657_v22 = vadd.f32 %v718_v13, %v3571_v57  ;;  %v720_v23 = vpop.f32.mrf.mxu0  ;;  %1835 = vmatpush1.bf16.msra.mxu1 %v2953_v6 }
 0x194   : > { %3017 = vtanh.f32 %v954_v15  ;;  %v955_v25 = vmul.f32 0.7978846, %v915_v16  ;;  %v916_v26 = vadd.f32 %v876_v17, %v3635_v46  ;;  %v877_v27 = vmul.f32 0.044715, %v837_v18 }
 0x195   : > { %v3006_v30 = vpop.eup %3005  ;;  %v838_v31 = vmul.f32 %v798_v20, %v3650_v12  ;;  %v799_v33 = vmul.f32 %v3657_v22, %v3657_v22  ;;  %v3664_v34 = vadd.f32 %v720_v23, %v3574_v58  ;;  %v722_v35 = vpop.f32.mrf.mxu0  ;;  %v1027_v36 = vadd.f32 1.0, %v3004_v19  ;;  %v2954_v20 = vld [vmem:[#allocation8 + $0x24] ss:$8 sps:$4 sm:$0xff]  }
 0x196   : > { %3019 = vtanh.f32 %v955_v25  ;;  %v956_v37 = vmul.f32 0.7978846, %v916_v26  ;;  %v917_v38 = vadd.f32 %v877_v27, %v3642_v62  ;;  %v3668_v40 = vadd.f32 %v722_v35, %v3571_v57  ;;  %1836 = vmatprep.subr.bf16.mxu1 %v2954_v20 }
 0x197   : > { %v878_v41 = vmul.f32 0.044715, %v838_v31  ;;  %v839_v42 = vmul.f32 %v799_v33, %v3657_v22  ;;  %v800_v43 = vmul.f32 %v3664_v34, %v3664_v34  ;;  %v724_v44 = vpop.f32.mrf.mxu0  ;;  %v1028_v45 = vadd.f32 1.0, %v3006_v30  ;;  %v3678_v52 = vpop.eup %3007 }
 0x198   : > { %3021 = vtanh.f32 %v956_v37  ;;  %v957_v48 = vmul.f32 0.7978846, %v917_v38  ;;  %v801_v49 = vmul.f32 %v3668_v40, %v3668_v40  ;;  %v3676_v50 = vadd.f32 %v724_v44, %v3574_v58 }
 0x199   : > { %v918_v53 = vadd.f32 %v878_v41, %v3650_v12  ;;  %v879_v55 = vmul.f32 0.044715, %v839_v42  ;;  %v840_v59 = vmul.f32 %v800_v43, %v3664_v34  ;;  %v728_v61 = vpop.f32.mrf.mxu0  ;;  %v1067_v0 = vmul.f32 0.5, %v1027_v36  ;;  %v3682_v1 = vpop.eup %3009 }
 0x19a   : > { %3023 = vtanh.f32 %v957_v48  ;;  %v841_v2 = vmul.f32 %v801_v49, %v3668_v40  ;;  %v802_v4 = vmul.f32 %v3676_v50, %v3676_v50  ;;  %v3688_v5 = vadd.f32 %v728_v61, %v3571_v57 }
 0x19b   : > { %v958_v7 = vmul.f32 0.7978846, %v918_v53  ;;  %v919_v9 = vadd.f32 %v879_v55, %v3657_v22  ;;  %v880_v10 = vmul.f32 0.044715, %v840_v59  ;;  %v730_v11 = vpop.f32.mrf.mxu0  ;;  %v1068_v13 = vmul.f32 0.5, %v1028_v45 }
 0x19c   : > { %v3691_v15 = vpop.eup %3011  ;;  %v881_v16 = vmul.f32 0.044715, %v841_v2  ;;  %v842_v17 = vmul.f32 %v802_v4, %v3676_v50  ;;  %v803_v18 = vmul.f32 %v3688_v5, %v3688_v5  ;;  %v3697_v19 = vadd.f32 %v730_v11, %v3574_v58  ;;  %v2956_v45 = vld [vmem:[#allocation8 + $0x20] ss:$8 sps:$4 sm:$0xff]   ;;  %v2957_v53 = vld [vmem:[#allocation8 + $0x14] ss:$8 sps:$4 sm:$0xff]  }
 0x19d   : > { %3025 = vtanh.f32 %v958_v7  ;;  %v959_v23 = vmul.f32 0.7978846, %v919_v9  ;;  %v920_v24 = vadd.f32 %v880_v10, %v3664_v34  ;;  %v732_v25 = vpop.f32.mrf.mxu0  ;;  %v3701_v26 = vmul.f32 %v1067_v0, %v3577_v60  ;;  %1837 = vmatpush1.bf16.msra.mxu1 %v2956_v45 }
 0x19e   : > { %v3703_v27 = vpop.eup %3013  ;;  %v921_v29 = vadd.f32 %v881_v16, %v3668_v40  ;;  %v882_v30 = vmul.f32 0.044715, %v842_v17  ;;  %v843_v31 = vmul.f32 %v803_v18, %v3688_v5  ;;  %v804_v33 = vmul.f32 %v3697_v19, %v3697_v19  ;;  %v2959_v16 = vld [vmem:[#allocation8 + $0x10] ss:$8 sps:$4 sm:$0xff]   ;;  %1838 = vmatprep.subr.bf16.mxu1 %v2957_v53 }
 0x19f   : > { %3027 = vtanh.f32 %v959_v23  ;;  %v960_v35 = vmul.f32 0.7978846, %v920_v24  ;;  %v3710_v36 = vadd.f32 %v732_v25, %v3571_v57  ;;  %v3713_v37 = vmul.f32 %v1068_v13, %v3582_v63  ;;  %v734_v60 = vpop.f32.mrf.mxu0 }
 0x1a0   : > { %v3715_v38 = vpop.eup %3015  ;;  %v961_v41 = vmul.f32 0.7978846, %v921_v29  ;;  %v922_v42 = vadd.f32 %v882_v30, %v3676_v50  ;;  %v883_v43 = vmul.f32 0.044715, %v843_v31  ;;  %v844_v44 = vmul.f32 %v804_v33, %v3697_v19  ;;  %v2960_v29 = vld [vmem:[#allocation8 + $0x4] ss:$8 sps:$4 sm:$0xff]  }
 0x1a1   : > { %v3719_v47 = vpop.eup %3017  ;;  %3029 = vtanh.f32 %v960_v35  ;;  %v805_v48 = vmul.f32 %v3710_v36, %v3710_v36  ;;  %v1147_v63 = vadd.f32 %v3713_v37, %v3701_v26  ;;  %v3726_v49 = vadd.f32 %v734_v60, %v3574_v58  ;;  %v738_v51 = vpop.f32.mrf.mxu0  ;;  %1839 = vmatpush1.bf16.msra.mxu1 %v2959_v16 }
 0x1a2   : > { %3031 = vtanh.f32 %v961_v41  ;;  %v962_v55 = vmul.f32 0.7978846, %v922_v42  ;;  %v923_v59 = vadd.f32 %v883_v43, %v3688_v5  ;;  %v884_v61 = vmul.f32 0.044715, %v844_v44  ;;  %1840 = vmatprep.subr.bf16.mxu1 %v2960_v29 }
 0x1a3   : > { %v3729_v0 = vpop.eup %3019  ;;  %v845_v2 = vmul.f32 %v805_v48, %v3710_v36  ;;  %1148 = vadd.xlane.f32.xlu0 %v1147_v63  ;;  %v806_v4 = vmul.f32 %v3726_v49, %v3726_v49  ;;  %v1228_v6 = vmul.f32 %v3701_v26, %v3701_v26  ;;  %v1229_v7 = vmul.f32 %v3713_v37, %v3713_v37  ;;  %v740_v9 = vpop.f32.mrf.mxu0 }
 0x1a4   : > { %3033 = vtanh.f32 %v962_v55  ;;  %v963_v10 = vmul.f32 0.7978846, %v923_v59  ;;  %v924_v11 = vadd.f32 %v884_v61, %v3697_v19  ;;  %v3740_v13 = vadd.f32 %v738_v51, %v3571_v57 }
 0x1a5   : > { %v3742_v17 = vpop.eup %3021  ;;  %v885_v18 = vmul.f32 0.044715, %v845_v2  ;;  %v846_v20 = vmul.f32 %v806_v4, %v3726_v49  ;;  %v1268_v23 = vadd.f32 %v1229_v7, %v1228_v6  ;;  %v1029_v24 = vadd.f32 1.0, %v3678_v52  ;;  %v742_v25 = vpop.f32.mrf.mxu0 }
 0x1a6   : > { %3035 = vtanh.f32 %v963_v10  ;;  %v964_v30 = vmul.f32 0.7978846, %v924_v11  ;;  %v807_v31 = vmul.f32 %v3740_v13, %v3740_v13  ;;  %v1030_v33 = vadd.f32 1.0, %v3682_v1 }
 0x1a7   : > { %v3749_v35 = vpop.eup %3023  ;;  %v925_v60 = vadd.f32 %v885_v18, %v3710_v36  ;;  %v886_v41 = vmul.f32 0.044715, %v846_v20  ;;  %1269 = vadd.xlane.f32.xlu1 %v1268_v23  ;;  %v1069_v42 = vmul.f32 0.5, %v1029_v24  ;;  %v3753_v43 = vadd.f32 %v740_v9, %v3574_v58  ;;  %v744_v52 = vpop.f32.mrf.mxu0 }
 0x1a8   : > { %3037 = vtanh.f32 %v964_v30  ;;  %v847_v44 = vmul.f32 %v807_v31, %v3740_v13  ;;  %v1070_v45 = vmul.f32 0.5, %v1030_v33  ;;  %v3757_v48 = vadd.f32 %v742_v25, %v3571_v57 }
 0x1a9   : > { %v965_v1 = vmul.f32 0.7978846, %v925_v60  ;;  %v926_v63 = vadd.f32 %v886_v41, %v3726_v49  ;;  %v3761_v51 = vmul.f32 %v1069_v42, %v3588_v3  ;;  %v808_v53 = vmul.f32 %v3753_v43, %v3753_v43  ;;  %v748_v55 = vpop.f32.mrf.mxu0 }
 0x1aa   : > { %v3765_v59 = vpop.eup %3025  ;;  %v887_v61 = vmul.f32 0.044715, %v847_v44  ;;  %v3768_v2 = vmul.f32 %v1070_v45, %v3594_v8  ;;  %v809_v4 = vmul.f32 %v3757_v48, %v3757_v48  ;;  %v1031_v6 = vadd.f32 1.0, %v3691_v15 }
 0x1ab   : > { %3039 = vtanh.f32 %v965_v1  ;;  %v966_v7 = vmul.f32 0.7978846, %v926_v63  ;;  %v848_v3 = vmul.f32 %v808_v53, %v3753_v43  ;;  %v1230_v9 = vmul.f32 %v3761_v51, %v3761_v51  ;;  %v750_v10 = vpop.f32.mrf.mxu0  ;;  %v2962_v63 = vld [vmem:[#allocation8] ss:$8 sps:$4 sm:$0xff]  }
 0x1ac   : > { %v3776_v11 = vpop.eup %3027  ;;  %v927_v16 = vadd.f32 %v887_v61, %v3740_v13  ;;  %v1150_v8 = vadd.f32 %v3768_v2, %v3761_v51  ;;  %v1231_v18 = vmul.f32 %v3768_v2, %v3768_v2  ;;  %v849_v15 = vmul.f32 %v809_v4, %v3757_v48  ;;  %1841 = vmatpush1.bf16.msra.mxu1 %v2962_v63 }
 0x1ad   : > { %3041 = vtanh.f32 %v966_v7  ;;  %v888_v20 = vmul.f32 0.044715, %v848_v3  ;;  %v1032_v23 = vadd.f32 1.0, %v3703_v27  ;;  %v1071_v24 = vmul.f32 0.5, %v1031_v6  ;;  %v752_v25 = vpop.f32.mrf.mxu0 }
 0x1ae   : > { %v3785_v29 = vpop.eup %3029  ;;  %v967_v30 = vmul.f32 0.7978846, %v927_v16  ;;  %1151 = vadd.xlane.f32.xlu0 %v1150_v8  ;;  %v1271_v31 = vadd.f32 %v1231_v18, %v1230_v9  ;;  %v889_v33 = vmul.f32 0.044715, %v849_v15  ;;  %v3788_v60 = vadd.f32 %v744_v52, %v3574_v58 }
 0x1af   : > { %v3790_v41 = vpop.eup %3031  ;;  %v928_v42 = vadd.f32 %v888_v20, %v3753_v43  ;;  %v1072_v44 = vmul.f32 0.5, %v1032_v23  ;;  %v3794_v45 = vmul.f32 %v1071_v24, %v3601_v14  ;;  %v3797_v27 = vadd.f32 %v748_v55, %v3571_v57  ;;  %v754_v1 = vpop.f32.mrf.mxu0 }
 0x1b0   : > { %3043 = vtanh.f32 %v967_v30  ;;  %1272 = vadd.xlane.f32.xlu1 %v1271_v31  ;;  %v929_v53 = vadd.f32 %v889_v33, %v3757_v48  ;;  %v810_v52 = vmul.f32 %v3788_v60, %v3788_v60  ;;  %v1033_v61 = vadd.f32 1.0, %v3715_v38 }
 0x1b1   : > { %v3803_v4 = vpop.eup %3033  ;;  %v968_v6 = vmul.f32 0.7978846, %v928_v42  ;;  %v3806_v14 = vmul.f32 %v1072_v44, %v3608_v21  ;;  %v811_v55 = vmul.f32 %v3797_v27, %v3797_v27  ;;  %v1034_v7 = vadd.f32 1.0, %v3719_v47  ;;  %v758_v3 = vpop.f32.mrf.mxu0 }
 0x1b2   : > { %v969_v9 = vmul.f32 0.7978846, %v929_v53  ;;  %v850_v16 = vmul.f32 %v810_v52, %v3788_v60  ;;  %v1073_v8 = vmul.f32 0.5, %v1033_v61  ;;  %v1232_v38 = vmul.f32 %v3794_v45, %v3794_v45 }
 0x1b3   : > { %v3814_v18 = vpop.eup %3035  ;;  %3045 = vtanh.f32 %v968_v6  ;;  %v1153_v21 = vadd.f32 %v3806_v14, %v3794_v45  ;;  %v851_v15 = vmul.f32 %v811_v55, %v3797_v27  ;;  %v1074_v20 = vmul.f32 0.5, %v1034_v7  ;;  %v3819_v23 = vpop.f32.mrf.mxu0  ;;  %v2963_v7 = vld [vmem:[#allocation8 + $0xf4] ss:$8 sps:$4 sm:$0xff]  }
 0x1b4   : > { %3047 = vtanh.f32 %v969_v9  ;;  %v890_v47 = vmul.f32 0.044715, %v850_v16  ;;  %v3822_v24 = vmul.f32 %v1073_v8, %v3615_v28  ;;  %v1233_v30 = vmul.f32 %v3806_v14, %v3806_v14  ;;  %1842 = vmatprep.subr.bf16.mxu1 %v2963_v7 }
 0x1b5   : > { %v3826_v31 = vpop.eup %3037  ;;  %1154 = vadd.xlane.f32.xlu0 %v1153_v21  ;;  %v891_v33 = vmul.f32 0.044715, %v851_v15  ;;  %v3829_v42 = vmul.f32 %v1074_v20, %v3619_v32  ;;  %v3832_v44 = vadd.f32 %v750_v10, %v3574_v58  ;;  %v3835_v63 = vadd.f32 %v752_v25, %v3571_v57  ;;  %v762_v6 = vpop.f32.mrf.mxu0 }
 0x1b6   : > { %4620 = vst [vmem:[#allocation16_spill] sm:$0xff] %v3822_v24  ;;  %v930_v53 = vadd.f32 %v890_v47, %v3788_v60  ;;  %v1274_v28 = vadd.f32 %v1233_v30, %v1232_v38  ;;  %v1234_v52 = vmul.f32 %v3822_v24, %v3822_v24  ;;  %v1035_v61 = vadd.f32 1.0, %v3729_v0 }
 0x1b7   : > { %v931_v55 = vadd.f32 %v891_v33, %v3797_v27  ;;  %v1156_v32 = vadd.f32 %v3829_v42, %v3822_v24  ;;  %v812_v10 = vmul.f32 %v3832_v44, %v3832_v44  ;;  %v813_v25 = vmul.f32 %v3835_v63, %v3835_v63 }
 0x1b8   : > { %v3848_v9 = vpop.eup %3039  ;;  %v970_v16 = vmul.f32 0.7978846, %v930_v53  ;;  %v1235_v8 = vmul.f32 %v3829_v42, %v3829_v42  ;;  %v1036_v0 = vadd.f32 1.0, %v3742_v17  ;;  %v1075_v38 = vmul.f32 0.5, %v1035_v61  ;;  %v764_v17 = vpop.f32.mrf.mxu0  ;;  %v2965_v61 = vld [vmem:[#allocation8 + $0xf0] ss:$8 sps:$4 sm:$0xff]  }
 0x1b9   : > { %v971_v21 = vmul.f32 0.7978846, %v931_v55  ;;  %1157 = vadd.xlane.f32.xlu1 %v1156_v32  ;;  %1275 = vadd.xlane.f32.xlu0 %v1274_v28  ;;  %v852_v15 = vmul.f32 %v812_v10, %v3832_v44  ;;  %v853_v20 = vmul.f32 %v813_v25, %v3835_v63  ;;  %v3856_v47 = vadd.f32 %v754_v1, %v3574_v58 }
 0x1ba   : > { %v3858_v30 = vpop.eup %3041  ;;  %3049 = vtanh.f32 %v970_v16  ;;  %v1277_v33 = vadd.f32 %v1235_v8, %v1234_v52  ;;  %v1076_v53 = vmul.f32 0.5, %v1036_v0  ;;  %v3861_v24 = vmul.f32 %v1075_v38, %v3627_v39  ;;  %1843 = vmatpush2.bf16.msra.mxu1 %v2965_v61  ;;  %v768_v38 = vpop.f32.mrf.mxu0 }
 0x1bb   : > { %3051 = vtanh.f32 %v971_v21  ;;  %v892_v28 = vmul.f32 0.044715, %v852_v15  ;;  %v893_v55 = vmul.f32 0.044715, %v853_v20  ;;  %v814_v32 = vmul.f32 %v3856_v47, %v3856_v47 }
 0x1bc   : > { %4621 = vst [vmem:[#allocation17_spill] sm:$0xff] %v3861_v24  ;;  %v3866_v1 = vmul.f32 %v1076_v53, %v3635_v46  ;;  %v3869_v10 = vadd.f32 %v758_v3, %v3571_v57  ;;  %v1037_v52 = vadd.f32 1.0, %v3749_v35  ;;  %v1038_v39 = vadd.f32 1.0, %v3765_v59 }
 0x1bd   : > { %v3873_v25 = vpop.eup %3043  ;;  %v932_v7 = vadd.f32 %v892_v28, %v3832_v44  ;;  %v933_v16 = vadd.f32 %v893_v55, %v3835_v63  ;;  %1278 = vadd.xlane.f32.xlu1 %v1277_v33  ;;  %v854_v8 = vmul.f32 %v814_v32, %v3856_v47  ;;  %v1236_v46 = vmul.f32 %v3861_v24, %v3861_v24 }
 0x1be   : > { %v1159_v3 = vadd.f32 %v3866_v1, %v3861_v24  ;;  %v815_v35 = vmul.f32 %v3869_v10, %v3869_v10  ;;  %v1077_v59 = vmul.f32 0.5, %v1037_v52  ;;  %v1078_v0 = vmul.f32 0.5, %v1038_v39  ;;  %v2966_v52 = vld [vmem:[#allocation8 + $0xe4] ss:$8 sps:$4 sm:$0xff]  }
 0x1bf   : > { %v972_v21 = vmul.f32 0.7978846, %v932_v7  ;;  %v973_v15 = vmul.f32 0.7978846, %v933_v16  ;;  %v894_v20 = vmul.f32 0.044715, %v854_v8  ;;  %v1237_v33 = vmul.f32 %v3866_v1, %v3866_v1  ;;  %1844 = vmatprep.subr.bf16.mxu1 %v2966_v52 }
 0x1c0   : > { %v3886_v53 = vpop.eup %3045  ;;  %1160 = vadd.xlane.f32.xlu0 %v1159_v3  ;;  %v855_v61 = vmul.f32 %v815_v35, %v3869_v10  ;;  %v3890_v28 = vmul.f32 %v1077_v59, %v3642_v62  ;;  %v3893_v55 = vmul.f32 %v1078_v0, %v3650_v12  ;;  %v3897_v32 = vadd.f32 %v3819_v23, %v3574_v58  ;;  %v2968_v3 = vld [vmem:[#allocation8 + $0xe0] ss:$8 sps:$4 sm:$0xff]   ;;  %v2969_v62 = vld [vmem:[#allocation8 + $0xd4] ss:$8 sps:$4 sm:$0xff]   ;;  %v770_v59 = vpop.f32.mrf.mxu0 }
 0x1c1   : > { %v3899_v39 = vpop.eup %3047  ;;  %3053 = vtanh.f32 %v972_v21  ;;  %v934_v7 = vadd.f32 %v894_v20, %v3856_v47  ;;  %v1280_v16 = vadd.f32 %v1237_v33, %v1236_v46  ;;  %v3903_v8 = vadd.f32 %v762_v6, %v3571_v57  ;;  %1845 = vmatpush2.bf16.msra.mxu1 %v2968_v3 }
 0x1c2   : > { %4622 = vst [vmem:[#allocation18_spill] sm:$0xff] %v3890_v28  ;;  %4623 = vst [vmem:[#allocation19_spill] sm:$0xff] %v3893_v55  ;;  %3055 = vtanh.f32 %v973_v15  ;;  %v895_v35 = vmul.f32 0.044715, %v855_v61  ;;  %v1162_v12 = vadd.f32 %v3893_v55, %v3890_v28  ;;  %v816_v23 = vmul.f32 %v3897_v32, %v3897_v32  ;;  %1846 = vmatprep.subr.bf16.mxu1 %v2969_v62 }
 0x1c3   : > { %v974_v0 = vmul.f32 0.7978846, %v934_v7  ;;  %v817_v21 = vmul.f32 %v3903_v8, %v3903_v8  ;;  %v1238_v6 = vmul.f32 %v3890_v28, %v3890_v28  ;;  %v1239_v46 = vmul.f32 %v3893_v55, %v3893_v55 }
 0x1c4   : > { %v935_v15 = vadd.f32 %v895_v35, %v3869_v10  ;;  %1163 = vadd.xlane.f32.xlu1 %v1162_v12  ;;  %1281 = vadd.xlane.f32.xlu0 %v1280_v16  ;;  %v856_v20 = vmul.f32 %v816_v23, %v3897_v32  ;;  %v1039_v33 = vadd.f32 1.0, %v3776_v11  ;;  %v1040_v61 = vadd.f32 1.0, %v3785_v29  ;;  %v772_v12 = vpop.f32.mrf.mxu0 }
 0x1c5   : > { %3057 = vtanh.f32 %v974_v0  ;;  %v857_v52 = vmul.f32 %v817_v21, %v3903_v8  ;;  %v1283_v7 = vadd.f32 %v1239_v46, %v1238_v6  ;;  %v3921_v28 = vadd.f32 %v764_v17, %v3574_v58 }
 0x1c6   : > { %v975_v55 = vmul.f32 0.7978846, %v935_v15  ;;  %v896_v3 = vmul.f32 0.044715, %v856_v20  ;;  %v1079_v24 = vmul.f32 0.5, %v1039_v33  ;;  %v1080_v35 = vmul.f32 0.5, %v1040_v61 }
 0x1c7   : > { %v3923_v16 = vpop.eup %3049  ;;  %v897_v23 = vmul.f32 0.044715, %v857_v52  ;;  %v818_v11 = vmul.f32 %v3921_v28, %v3921_v28  ;;  %v3928_v29 = vadd.f32 %v768_v38, %v3571_v57  ;;  %v1041_v0 = vadd.f32 1.0, %v3790_v41  ;;  %v2971_v20 = vld [vmem:[#allocation8 + $0xd0] ss:$8 sps:$4 sm:$0xff]  }
 0x1c8   : > { %v3931_v21 = vpop.eup %3051  ;;  %3059 = vtanh.f32 %v975_v55  ;;  %v936_v17 = vadd.f32 %v896_v3, %v3897_v32  ;;  %1284 = vadd.xlane.f32.xlu1 %v1283_v7  ;;  %v3935_v62 = vmul.f32 %v1079_v24, %v3657_v22  ;;  %v3938_v6 = vmul.f32 %v1080_v35, %v3664_v34  ;;  %v2972_v55 = vld [vmem:[#allocation8 + $0xc4] ss:$8 sps:$4 sm:$0xff]   ;;  %v774_v24 = vpop.f32.mrf.mxu0  ;;  %1847 = vmatpush2.bf16.msra.mxu1 %v2971_v20 }
 0x1c9   : > { %v937_v46 = vadd.f32 %v897_v23, %v3903_v8  ;;  %v858_v15 = vmul.f32 %v818_v11, %v3921_v28  ;;  %v819_v38 = vmul.f32 %v3928_v29, %v3928_v29  ;;  %v1042_v41 = vadd.f32 1.0, %v3803_v4  ;;  %1848 = vmatprep.subr.bf16.mxu1 %v2972_v55 }
 0x1ca   : > { %4624 = vst [vmem:[#allocation20_spill] sm:$0xff] %v3938_v6  ;;  %v976_v33 = vmul.f32 0.7978846, %v936_v17  ;;  %v1165_v61 = vadd.f32 %v3938_v6, %v3935_v62  ;;  %v1081_v22 = vmul.f32 0.5, %v1041_v0  ;;  %v1240_v34 = vmul.f32 %v3935_v62, %v3935_v62  ;;  %v778_v55 = vpop.f32.mrf.mxu0 }
 0x1cb   : > { %v977_v52 = vmul.f32 0.7978846, %v937_v46  ;;  %v898_v7 = vmul.f32 0.044715, %v858_v15  ;;  %v859_v3 = vmul.f32 %v819_v38, %v3928_v29  ;;  %v1082_v35 = vmul.f32 0.5, %v1042_v41 }
 0x1cc   : > { %3061 = vtanh.f32 %v976_v33  ;;  %1166 = vadd.xlane.f32.xlu0 %v1165_v61  ;;  %v3951_v4 = vmul.f32 %v1081_v22, %v3668_v40  ;;  %v1241_v23 = vmul.f32 %v3938_v6, %v3938_v6  ;;  %v3956_v11 = vadd.f32 %v770_v59, %v3574_v58  ;;  %v2974_v15 = vld [vmem:[#allocation8 + $0xc0] ss:$8 sps:$4 sm:$0xff]   ;;  %v2975_v38 = vld [vmem:[#allocation8 + $0xb4] ss:$8 sps:$4 sm:$0xff]   ;;  %v780_v6 = vpop.f32.mrf.mxu0 }
 0x1cd   : > { %3063 = vtanh.f32 %v977_v52  ;;  %v938_v0 = vadd.f32 %v898_v7, %v3921_v28  ;;  %v899_v17 = vmul.f32 0.044715, %v859_v3  ;;  %v3960_v46 = vmul.f32 %v1082_v35, %v3676_v50  ;;  %1849 = vmatpush2.bf16.msra.mxu1 %v2974_v15 }
 0x1ce   : > { %4625 = vst [vmem:[#allocation21_spill] sm:$0xff] %v3951_v4  ;;  %v3962_v41 = vpop.eup %3053  ;;  %v1286_v40 = vadd.f32 %v1241_v23, %v1240_v34  ;;  %v820_v20 = vmul.f32 %v3956_v11, %v3956_v11  ;;  %v3967_v33 = vadd.f32 %v772_v12, %v3571_v57  ;;  %v1242_v59 = vmul.f32 %v3951_v4, %v3951_v4 }
 0x1cf   : > { %4626 = vst [vmem:[#allocation22_spill] sm:$0xff] %v3960_v46  ;;  %v3971_v61 = vpop.eup %3055  ;;  %v978_v22 = vmul.f32 0.7978846, %v938_v0  ;;  %v939_v50 = vadd.f32 %v899_v17, %v3928_v29  ;;  %v1168_v52 = vadd.f32 %v3960_v46, %v3951_v4  ;;  %v1243_v34 = vmul.f32 %v3960_v46, %v3960_v46  ;;  %1850 = vmatprep.subr.bf16.mxu1 %v2975_v38 }
 0x1d0   : > { %1287 = vadd.xlane.f32.xlu0 %v1286_v40  ;;  %v860_v12 = vmul.f32 %v820_v20, %v3956_v11  ;;  %v821_v7 = vmul.f32 %v3967_v33, %v3967_v33  ;;  %v1043_v3 = vadd.f32 1.0, %v3814_v18  ;;  %v1044_v35 = vadd.f32 1.0, %v3826_v31 }
 0x1d1   : > { %3065 = vtanh.f32 %v978_v22  ;;  %v979_v23 = vmul.f32 0.7978846, %v939_v50  ;;  %1169 = vadd.xlane.f32.xlu1 %v1168_v52  ;;  %v1289_v0 = vadd.f32 %v1243_v34, %v1242_v59  ;;  %v3984_v17 = vadd.f32 %v774_v24, %v3574_v58  ;;  %v2977_v52 = vld [vmem:[#allocation8 + $0xb0] ss:$8 sps:$4 sm:$0xff]   ;;  %v2978_v34 = vld [vmem:[#allocation8 + $0xa4] ss:$8 sps:$4 sm:$0xff]  }
 0x1d2   : > { %v3986_v46 = vpop.eup %3057  ;;  %v900_v15 = vmul.f32 0.044715, %v860_v12  ;;  %v861_v40 = vmul.f32 %v821_v7, %v3967_v33  ;;  %v1083_v20 = vmul.f32 0.5, %v1043_v3  ;;  %v1084_v4 = vmul.f32 0.5, %v1044_v35  ;;  %1851 = vmatpush2.bf16.msra.mxu1 %v2977_v52 }
 0x1d3   : > { %3067 = vtanh.f32 %v979_v23  ;;  %v822_v18 = vmul.f32 %v3984_v17, %v3984_v17  ;;  %v3992_v31 = vadd.f32 %v778_v55, %v3571_v57  ;;  %v1045_v38 = vadd.f32 1.0, %v3848_v9  ;;  %v782_v23 = vpop.f32.mrf.mxu0  ;;  %1852 = vmatprep.subr.bf16.mxu1 %v2978_v34 }
 0x1d4   : > { %v940_v24 = vadd.f32 %v900_v15, %v3956_v11  ;;  %v901_v59 = vmul.f32 0.044715, %v861_v40  ;;  %v3997_v22 = vmul.f32 %v1083_v20, %v3688_v5  ;;  %v4000_v50 = vmul.f32 %v1084_v4, %v3697_v19 }
 0x1d5   : > { %v4002_v12 = vpop.eup %3059  ;;  %1290 = vadd.xlane.f32.xlu1 %v1289_v0  ;;  %v862_v7 = vmul.f32 %v822_v18, %v3984_v17  ;;  %v823_v55 = vmul.f32 %v3992_v31, %v3992_v31  ;;  %v1046_v9 = vadd.f32 1.0, %v3858_v30  ;;  %v1085_v3 = vmul.f32 0.5, %v1045_v38 }
 0x1d6   : > { %v980_v35 = vmul.f32 0.7978846, %v940_v24  ;;  %v941_v5 = vadd.f32 %v901_v59, %v3967_v33  ;;  %v1171_v19 = vadd.f32 %v4000_v50, %v3997_v22  ;;  %v1244_v4 = vmul.f32 %v3997_v22, %v3997_v22  ;;  %v2980_v24 = vld [vmem:[#allocation8 + $0xa0] ss:$8 sps:$4 sm:$0xff]   ;;  %v2981_v59 = vld [vmem:[#allocation8 + $0x94] ss:$8 sps:$4 sm:$0xff]  }
 0x1d7   : > { %v902_v0 = vmul.f32 0.044715, %v862_v7  ;;  %v863_v15 = vmul.f32 %v823_v55, %v3992_v31  ;;  %v1086_v40 = vmul.f32 0.5, %v1046_v9  ;;  %v4015_v20 = vmul.f32 %v1085_v3, %v3710_v36  ;;  %1853 = vmatpush2.bf16.msra.mxu1 %v2980_v24 }
 0x1d8   : > { %3069 = vtanh.f32 %v980_v35  ;;  %v981_v30 = vmul.f32 0.7978846, %v941_v5  ;;  %1172 = vadd.xlane.f32.xlu0 %v1171_v19  ;;  %v1245_v18 = vmul.f32 %v4000_v50, %v4000_v50  ;;  %v4020_v38 = vadd.f32 %v780_v6, %v3574_v58  ;;  %v784_v5 = vpop.f32.mrf.mxu0  ;;  %1854 = vmatprep.subr.bf16.mxu1 %v2981_v59 }
 0x1d9   : > { %v4022_v52 = vpop.eup %3061  ;;  %v942_v7 = vadd.f32 %v902_v0, %v3984_v17  ;;  %v903_v55 = vmul.f32 0.044715, %v863_v15  ;;  %v4026_v36 = vmul.f32 %v1086_v40, %v3726_v49  ;;  %v4029_v34 = vadd.f32 %v782_v23, %v3571_v57 }
 0x1da   : > { %v4031_v9 = vpop.eup %3063  ;;  %3071 = vtanh.f32 %v981_v30  ;;  %v1292_v3 = vadd.f32 %v1245_v18, %v1244_v4  ;;  %v824_v6 = vmul.f32 %v4020_v38, %v4020_v38  ;;  %v1246_v35 = vmul.f32 %v4015_v20, %v4015_v20 }
 0x1db   : > { %4627 = vst [vmem:[#allocation23_spill] sm:$0xff] %v4026_v36  ;;  %v982_v19 = vmul.f32 0.7978846, %v942_v7  ;;  %v943_v0 = vadd.f32 %v903_v55, %v3992_v31  ;;  %v1174_v49 = vadd.f32 %v4026_v36, %v4015_v20  ;;  %v825_v57 = vmul.f32 %v4029_v34, %v4029_v34 }
 0x1dc   : > { %1293 = vadd.xlane.f32.xlu0 %v1292_v3  ;;  %v864_v4 = vmul.f32 %v824_v6, %v4020_v38  ;;  %v1247_v23 = vmul.f32 %v4026_v36, %v4026_v36  ;;  %v1047_v15 = vadd.f32 1.0, %v3873_v25  ;;  %v1048_v40 = vadd.f32 1.0, %v3886_v53 }
 0x1dd   : > { %3073 = vtanh.f32 %v982_v19  ;;  %v983_v30 = vmul.f32 0.7978846, %v943_v0  ;;  %1175 = vadd.xlane.f32.xlu1 %v1174_v49  ;;  %v865_v18 = vmul.f32 %v825_v57, %v4029_v34  ;;  %v4049_v24 = vadd.f32 %v784_v5, %v3574_v58  ;;  %v2983_v49 = vld [vmem:[#allocation8 + $0x90] ss:$8 sps:$4 sm:$0xff]   ;;  %v2984_v57 = vld [vmem:[#allocation8 + $0x84] ss:$8 sps:$4 sm:$0xff]  }
 0x1de   : > { %v4051_v7 = vpop.eup %3065  ;;  %v904_v59 = vmul.f32 0.044715, %v864_v4  ;;  %v1295_v55 = vadd.f32 %v1247_v23, %v1246_v35  ;;  %v1087_v3 = vmul.f32 0.5, %v1047_v15  ;;  %v1088_v6 = vmul.f32 0.5, %v1048_v40  ;;  %1855 = vmatpush2.bf16.msra.mxu1 %v2983_v49 }
 0x1df   : > { %3075 = vtanh.f32 %v983_v30  ;;  %v905_v36 = vmul.f32 0.044715, %v865_v18  ;;  %v826_v25 = vmul.f32 %v4049_v24, %v4049_v24  ;;  %v1049_v53 = vadd.f32 1.0, %v3899_v39  ;;  %1856 = vmatprep.subr.bf16.mxu1 %v2984_v57 }
 0x1e0   : > { %v4056_v19 = vpop.eup %3067  ;;  %v944_v0 = vadd.f32 %v904_v59, %v4020_v38  ;;  %v4060_v58 = vmul.f32 %v1087_v3, %v3740_v13  ;;  %v4063_v5 = vmul.f32 %v1088_v6, %v3753_v43  ;;  %v1050_v35 = vadd.f32 1.0, %v3923_v16 }
 0x1e1   : > { %v945_v4 = vadd.f32 %v905_v36, %v4029_v34  ;;  %1296 = vadd.xlane.f32.xlu1 %v1295_v55  ;;  %v866_v23 = vmul.f32 %v826_v25, %v4049_v24  ;;  %v1089_v39 = vmul.f32 0.5, %v1049_v53  ;;  %v1051_v15 = vadd.f32 1.0, %v3931_v21 }
 0x1e2   : > { %v984_v40 = vmul.f32 0.7978846, %v944_v0  ;;  %v1177_v13 = vadd.f32 %v4063_v5, %v4060_v58  ;;  %v1090_v30 = vmul.f32 0.5, %v1050_v35  ;;  %v1248_v43 = vmul.f32 %v4060_v58, %v4060_v58  ;;  %v2986_v0 = vld [vmem:[#allocation8 + $0x80] ss:$8 sps:$4 sm:$0xff]  }
 0x1e3   : > { %v985_v16 = vmul.f32 0.7978846, %v945_v4  ;;  %v906_v18 = vmul.f32 0.044715, %v866_v23  ;;  %v4074_v59 = vmul.f32 %v1089_v39, %v3757_v48  ;;  %v1249_v36 = vmul.f32 %v4063_v5, %v4063_v5  ;;  %1857 = vmatpush2.bf16.msra.mxu1 %v2986_v0 }
 0x1e4   : > { %3077 = vtanh.f32 %v984_v40  ;;  %1178 = vadd.xlane.f32.xlu0 %v1177_v13  ;;  %v4079_v21 = vmul.f32 %v1090_v30, %v3788_v60  ;;  %v1052_v55 = vadd.f32 1.0, %v3962_v41  ;;  %v1091_v3 = vmul.f32 0.5, %v1051_v15 }
 0x1e5   : > { %v3070_v6 = vpop.eup %3069  ;;  %3079 = vtanh.f32 %v985_v16  ;;  %v946_v25 = vadd.f32 %v906_v18, %v4049_v24  ;;  %v1298_v53 = vadd.f32 %v1249_v36, %v1248_v43  ;;  %v1250_v35 = vmul.f32 %v4074_v59, %v4074_v59 }
 0x1e6   : > { %v1180_v48 = vadd.f32 %v4079_v21, %v4074_v59  ;;  %v1251_v49 = vmul.f32 %v4079_v21, %v4079_v21  ;;  %v1092_v60 = vmul.f32 0.5, %v1052_v55  ;;  %v1053_v41 = vadd.f32 1.0, %v3971_v61 }
 0x1e7   : > { %v3072_v57 = vpop.eup %3071  ;;  %v986_v4 = vmul.f32 0.7978846, %v946_v25  ;;  %v1054_v23 = vadd.f32 1.0, %v3986_v46  ;;  %v1055_v39 = vadd.f32 1.0, %v4002_v12  ;;  %v4093_v40 = vmul.f32 %v1091_v3, %v3797_v27 }
 0x1e8   : > { %1181 = vadd.xlane.f32.xlu1 %v1180_v48  ;;  %1299 = vadd.xlane.f32.xlu0 %v1298_v53  ;;  %v1301_v15 = vadd.f32 %v1251_v49, %v1250_v35  ;;  %v4096_v13 = vmul.f32 %v1092_v60, %v3832_v44  ;;  %v1056_v30 = vadd.f32 1.0, %v4022_v52  ;;  %v1093_v43 = vmul.f32 0.5, %v1053_v41 }
 0x1e9   : > { %3081 = vtanh.f32 %v986_v4  ;;  %v1094_v16 = vmul.f32 0.5, %v1054_v23  ;;  %v1095_v61 = vmul.f32 0.5, %v1055_v39  ;;  %v1057_v27 = vadd.f32 1.0, %v4031_v9 }
 0x1ea   : > { %v3074_v18 = vpop.eup %3073  ;;  %v1183_v46 = vadd.f32 %v4096_v13, %v4093_v40  ;;  %v1253_v12 = vmul.f32 %v4096_v13, %v4096_v13  ;;  %v1096_v36 = vmul.f32 0.5, %v1056_v30  ;;  %v4105_v55 = vmul.f32 %v1093_v43, %v3835_v63 }
 0x1eb   : > { %v4108_v44 = vmul.f32 %v1094_v16, %v3856_v47  ;;  %v1058_v52 = vadd.f32 1.0, %v4051_v7  ;;  %v1252_v25 = vmul.f32 %v4093_v40, %v4093_v40  ;;  %v1097_v0 = vmul.f32 0.5, %v1057_v27 }
 0x1ec   : > { %v3076_v3 = vpop.eup %3075  ;;  %1302 = vadd.xlane.f32.xlu1 %v1301_v15  ;;  %1184 = vadd.xlane.f32.xlu0 %v1183_v46  ;;  %v4114_v53 = vmul.f32 %v1096_v36, %v3897_v32  ;;  %v4121_v7 = vmul.f32 %v1095_v61, %v3869_v10  ;;  %v1059_v35 = vadd.f32 1.0, %v4056_v19  ;;  %v1060_v49 = vadd.f32 1.0, %v3070_v6 }
 0x1ed   : > { %v1186_v9 = vadd.f32 %v4108_v44, %v4105_v55  ;;  %v1098_v63 = vmul.f32 0.5, %v1058_v52  ;;  %v1304_v48 = vadd.f32 %v1253_v12, %v1252_v25  ;;  %v1255_v47 = vmul.f32 %v4108_v44, %v4108_v44 }
 0x1ee   : > { %v1254_v32 = vmul.f32 %v4105_v55, %v4105_v55  ;;  %v1189_v60 = vadd.f32 %v4114_v53, %v4121_v7  ;;  %v1062_v41 = vadd.f32 1.0, %v3074_v18  ;;  %v4132_v39 = vmul.f32 %v1097_v0, %v3903_v8 }
 0x1ef   : > { %v4129_v4 = vmul.f32 %v1098_v63, %v3921_v28  ;;  %v1100_v10 = vmul.f32 0.5, %v1060_v49  ;;  %v1257_v6 = vmul.f32 %v4114_v53, %v4114_v53  ;;  %v1099_v30 = vmul.f32 0.5, %v1059_v35 }
 0x1f0   : > { %1187 = vadd.xlane.f32.xlu1 %v1186_v9  ;;  %1305 = vadd.xlane.f32.xlu0 %v1304_v48  ;;  %v1307_v19 = vadd.f32 %v1255_v47, %v1254_v32  ;;  %v1061_v43 = vadd.f32 1.0, %v3072_v57  ;;  %v1256_v16 = vmul.f32 %v4121_v7, %v4121_v7  ;;  %v1102_v8 = vmul.f32 0.5, %v1062_v41 }
 0x1f1   : > { %v3078_v23 = vpop.eup %3077  ;;  %v1192_v28 = vadd.f32 %v4129_v4, %v4132_v39  ;;  %v4141_v61 = vmul.f32 %v1100_v10, %v3956_v11  ;;  %v1259_v46 = vmul.f32 %v4129_v4, %v4129_v4  ;;  %v4146_v57 = vmul.f32 %v1099_v30, %v3928_v29 }
 0x1f2   : > { %v3080_v15 = vpop.eup %3079  ;;  %v1064_v18 = vadd.f32 1.0, %v3078_v23  ;;  %v1310_v36 = vadd.f32 %v1257_v6, %v1256_v16  ;;  %v1101_v27 = vmul.f32 0.5, %v1061_v43  ;;  %v1063_v52 = vadd.f32 1.0, %v3076_v3 }
 0x1f3   : > { %4628 = vst [vmem:[#allocation24_spill] sm:$0xff] %v4141_v61  ;;  %4629 = vst [vmem:[#allocation25_spill] sm:$0xff] %v4146_v57  ;;  %v1258_v25 = vmul.f32 %v4132_v39, %v4132_v39  ;;  %v1195_v11 = vadd.f32 %v4141_v61, %v4146_v57  ;;  %v4153_v9 = vmul.f32 %v1102_v8, %v3984_v17  ;;  %v1065_v35 = vadd.f32 1.0, %v3080_v15 }
 0x1f4   : > { %1308 = vadd.xlane.f32.xlu1 %v1307_v19  ;;  %1190 = vadd.xlane.f32.xlu0 %v1189_v60  ;;  %v1104_v0 = vmul.f32 0.5, %v1064_v18  ;;  %v4156_v47 = vmul.f32 %v1101_v27, %v3967_v33  ;;  %v1261_v29 = vmul.f32 %v4141_v61, %v4141_v61  ;;  %v1103_v3 = vmul.f32 0.5, %v1063_v52 }
 0x1f5   : > { %4630 = vst [vmem:[#allocation26_spill] sm:$0xff] %v4153_v9  ;;  %v1313_v48 = vadd.f32 %v1259_v46, %v1258_v25  ;;  %v1260_v17 = vmul.f32 %v4146_v57, %v4146_v57  ;;  %v1263_v33 = vmul.f32 %v4153_v9, %v4153_v9  ;;  %v1105_v10 = vmul.f32 0.5, %v1065_v35  ;;  %v2987_v25 = vld [vmem:[#allocation10 + $0x78] sm:$0xff]   ;;  %v4206_v35 = vld [vmem:[#allocation10 + $0x68] sm:$0xff]  }
 0x1f6   : > { %v3082_v12 = vpop.eup %3081  ;;  %4631 = vst [vmem:[#allocation27_spill] sm:$0xff] %v4156_v47  ;;  %v1198_v49 = vadd.f32 %v4153_v9, %v4156_v47  ;;  %v4165_v32 = vmul.f32 %v1104_v0, %v4020_v38  ;;  %v4170_v23 = vmul.f32 %v1103_v3, %v3992_v31  ;;  %v1262_v15 = vmul.f32 %v4156_v47, %v4156_v47  ;;  %v4198_v0 = vld [vmem:[#allocation10 + $0x70] sm:$0xff]  }
 0x1f7   : > { %v1066_v63 = vadd.f32 1.0, %v3082_v12  ;;  %v1316_v41 = vadd.f32 %v1261_v29, %v1260_v17  ;;  %v4180_v30 = vmul.f32 %v1105_v10, %v4029_v34  ;;  %2673 = vmatprep.subr.bf16.mxu0 %v2987_v25  ;;  %2749 = vmatprep.subr.bf16.mxu1 %v2987_v25  ;;  %v4201_v29 = vld [vmem:[#allocation10 + $0x30] sm:$0xff]   ;;  %v4214_v10 = vld [vmem:[#allocation10 + $0x60] sm:$0xff]  }
 0x1f8   : > { %1193 = vadd.xlane.f32.xlu1 %v1192_v28  ;;  %1311 = vadd.xlane.f32.xlu0 %v1310_v36  ;;  %4632 = vst [vmem:[#allocation28_spill] sm:$0xff] %v4165_v32  ;;  %4633 = vst [vmem:[#allocation29_spill] sm:$0xff] %v4170_v23  ;;  %v1201_v19 = vadd.f32 %v4165_v32, %v4170_v23  ;;  %v1319_v6 = vadd.f32 %v1263_v33, %v1262_v15 }
 0x1f9   : > { %v1106_v60 = vmul.f32 0.5, %v1066_v63  ;;  %4635 = vst [vmem:[#allocation31_spill] sm:$0xff] %v4180_v30  ;;  %v1265_v31 = vmul.f32 %v4165_v32, %v4165_v32  ;;  %v1264_v16 = vmul.f32 %v4170_v23, %v4170_v23  ;;  %v1266_v34 = vmul.f32 %v4180_v30, %v4180_v30 }
 0x1fb   : > { %v4177_v38 = vmul.f32 %v1106_v60, %v4049_v24  ;;  %v1322_v28 = vadd.f32 %v1265_v31, %v1264_v16  ;;  %v4219_v31 = vld [vmem:[#allocation10 + $0x20] sm:$0xff]  }
 0x1fc   : > { %1314 = vadd.xlane.f32.xlu1 %v1313_v48  ;;  %1196 = vadd.xlane.f32.xlu0 %v1195_v11  ;;  %v4196_v11 = vld [vmem:[#allocation10 + $0x38] sm:$0xff]  }
 0x1fd   : > { %4634 = vst [vmem:[#allocation30_spill] sm:$0xff] %v4177_v38  ;;  %v1204_v43 = vadd.f32 %v4177_v38, %v4180_v30  ;;  %v1267_v24 = vmul.f32 %v4177_v38, %v4177_v38  ;;  %2674 = vmatpush3.bf16.msra.mxu0 %v4196_v11 }
 0x1fe   : > { %2675 = vmatprep.subr.bf16.mxu0 %v4198_v0 }
 0x1ff   : > { %v1325_v8 = vadd.f32 %v1267_v24, %v1266_v34 }
 0x200   : > { %1199 = vadd.xlane.f32.xlu1 %v1198_v49  ;;  %1317 = vadd.xlane.f32.xlu0 %v1316_v41  ;;  %v4211_v41 = vld [vmem:[#allocation10 + $0x28] sm:$0xff]  }
 0x201   : > { %2676 = vmatpush3.bf16.msra.mxu0 %v4201_v29 }
 0x202   : > { %2677 = vmatprep.subr.bf16.mxu0 %v4206_v35 }
 0x204   : > { %1320 = vadd.xlane.f32.xlu1 %v1319_v6  ;;  %1202 = vadd.xlane.f32.xlu0 %v1201_v19 }
 0x205   : > { %2678 = vmatpush3.bf16.msra.mxu0 %v4211_v41 }
 0x206   : > { %2679 = vmatprep.subr.bf16.mxu0 %v4214_v10 }
 0x208   : > { %1205 = vadd.xlane.f32.xlu1 %v1204_v43  ;;  %1323 = vadd.xlane.f32.xlu0 %v1322_v28  ;;  %v4222_v43 = vld [vmem:[#allocation10 + $0x58] sm:$0xff]  }
 0x209   : > { %2680 = vmatpush3.bf16.msra.mxu0 %v4219_v31 }
 0x20a   : > { %2681 = vmatprep.subr.bf16.mxu0 %v4222_v43 }
 0x20c   : > { %1326 = vadd.xlane.f32.xlu1 %v1325_v8 }
 0x22c   : > { %v1149_v18 = vpop.xlane.xlu0 %1148 }
 0x22d   : > { %v4192_v46 = vmul.f32 0.00390625, %v1149_v18  ;;  %v1429_v18 = vld [vmem:[#allocation7 + $0x1] ss:$8 sm:$0x3] }
 0x22e   : > { %v4235_v25 = vrot.slane %v1429_v18, %v3566_v54 }
 0x22f   : > { %v1348_v12 = vmul.f32 %v4192_v46, %v4192_v46 }
 0x230   : > { %v1270_v36 = vpop.xlane.xlu1 %1269 }
 0x231   : > { %v1328_v27 = vmul.f32 0.00390625, %v1270_v36  ;;  %v4232_v36 = vld [vmem:[#allocation10 + $0x50] sm:$0xff]  }
 0x233   : > { %v1368_v52 = vsub.f32 %v1328_v27, %v1348_v12  ;;  %v4229_v12 = vld [vmem:[#allocation10 + $0x18] sm:$0xff]  }
 0x234   : > { %2682 = vmatpush3.bf16.msra.mxu0 %v4229_v12 }
 0x235   : > { %v1388_v63 = vadd.f32 1e-06, %v1368_v52  ;;  %2683 = vmatprep.subr.bf16.mxu0 %v4232_v36 }
 0x237   : > { %v1152_v48 = vpop.xlane.xlu0 %1151  ;;  %3083 = vrsqrt.f32 %v1388_v63 }
 0x238   : > { %v4203_v3 = vmul.f32 0.00390625, %v1152_v48 }
 0x239   : > { %v1273_v49 = vpop.xlane.xlu1 %1272 }
 0x23a   : > { %v1329_v17 = vmul.f32 0.00390625, %v1273_v49  ;;  %v1349_v60 = vmul.f32 %v4203_v3, %v4203_v3 }
 0x23c   : > { %v1369_v33 = vsub.f32 %v1329_v17, %v1349_v60  ;;  %v4240_v17 = vrot.slane %v1429_v18, %v3568_v56  ;;  %v4243_v60 = vld [vmem:[#allocation10 + $0x10] sm:$0xff]  }
 0x23d   : > { %2684 = vmatpush3.bf16.msra.mxu0 %v4243_v60 }
 0x23e   : > { %v1389_v15 = vadd.f32 1e-06, %v1369_v33  ;;  %v1155_v19 = vpop.xlane.xlu0 %1154 }
 0x23f   : > { %v4216_v6 = vmul.f32 0.00390625, %v1155_v19 }
 0x240   : > { %3085 = vrsqrt.f32 %v1389_v15 }
 0x241   : > { %v1350_v34 = vmul.f32 %v4216_v6, %v4216_v6 }
 0x242   : > { %v1158_v16 = vpop.xlane.xlu1 %1157  ;;  %v1276_v28 = vpop.xlane.xlu0 %1275 }
 0x243   : > { %v4224_v24 = vmul.f32 0.00390625, %v1158_v16  ;;  %v1330_v8 = vmul.f32 0.00390625, %v1276_v28  ;;  %v1562_v16 = vld [vmem:[#allocation7 + $0x2] ss:$8 sm:$0x3] }
 0x244   : > { %v3084_v33 = vpop.eup %3083  ;;  %v4252_v18 = vrot.slane %v1562_v16, %v3566_v54 }
 0x245   : > { %v1370_v27 = vsub.f32 %v1330_v8, %v1350_v34  ;;  %v1351_v48 = vmul.f32 %v4224_v24, %v4224_v24  ;;  %v1442_v8 = vmul.f32 %v3084_v33, %v4240_v17 }
 0x246   : > { %v1279_v52 = vpop.xlane.xlu1 %1278 }
 0x247   : > { %v1390_v63 = vadd.f32 1e-06, %v1370_v27  ;;  %v1331_v49 = vmul.f32 0.00390625, %v1279_v52  ;;  %v1441_v27 = vmul.f32 %v3084_v33, %v4235_v25  ;;  %v4255_v52 = vrot.slane %v1562_v16, %v3568_v56 }
 0x248   : > { %v1483_v16 = vsub.f32 %v3761_v51, %v4203_v3 }
 0x249   : > { %3087 = vrsqrt.f32 %v1390_v63  ;;  %v1371_v15 = vsub.f32 %v1331_v49, %v1351_v48  ;;  %v1161_v19 = vpop.xlane.xlu0 %1160  ;;  %v1481_v63 = vsub.f32 %v3701_v26, %v4192_v46  ;;  %v1482_v48 = vsub.f32 %v3713_v37, %v4192_v46 }
 0x24a   : > { %v4246_v28 = vmul.f32 0.00390625, %v1161_v19  ;;  %v1484_v26 = vsub.f32 %v3768_v2, %v4203_v3 }
 0x24b   : > { %v1391_v34 = vadd.f32 1e-06, %v1371_v15  ;;  %v1522_v37 = vmul.f32 %v1482_v48, %v1442_v8  ;;  %v1521_v46 = vmul.f32 %v1481_v63, %v1441_v27 }
 0x24c   : > { %v1352_v33 = vmul.f32 %v4246_v28, %v4246_v28 }
 0x24d   : > { %v3086_v38 = vpop.eup %3085  ;;  %3089 = vrsqrt.f32 %v1391_v34  ;;  %v1164_v49 = vpop.xlane.xlu1 %1163  ;;  %v1575_v61 = vadd.f32 %v4255_v52, %v1522_v37  ;;  %v1574_v51 = vadd.f32 %v4252_v18, %v1521_v46  ;;  %v4636_v46 = vld [vmem:[#allocation16_spill] sm:$0xff] }
 0x24e   : > { %v1282_v15 = vpop.xlane.xlu0 %1281  ;;  %v4263_v19 = vmul.f32 0.00390625, %v1164_v49  ;;  %v1444_v30 = vmul.f32 %v3086_v38, %v4240_v17  ;;  %v1443_v56 = vmul.f32 %v3086_v38, %v4235_v25 }
 0x24f   : > { %v1332_v54 = vmul.f32 0.00390625, %v1282_v15 }
 0x250   : > { %v1524_v23 = vmul.f32 %v1484_v26, %v1444_v30  ;;  %v1523_v9 = vmul.f32 %v1483_v16, %v1443_v56  ;;  %v1353_v49 = vmul.f32 %v4263_v19, %v4263_v19 }
 0x251   : > { %v1372_v34 = vsub.f32 %v1332_v54, %v1352_v33  ;;  %v1285_v32 = vpop.xlane.xlu1 %1284  ;;  %v1486_v33 = vsub.f32 %v3806_v14, %v4216_v6 }
 0x252   : > { %v1333_v15 = vmul.f32 0.00390625, %v1285_v32  ;;  %v1577_v38 = vadd.f32 %v4255_v52, %v1524_v23  ;;  %v1576_v57 = vadd.f32 %v4252_v18, %v1523_v9 }
 0x253   : > { %v1392_v47 = vadd.f32 1e-06, %v1372_v34 }
 0x254   : > { %v1373_v2 = vsub.f32 %v1333_v15, %v1353_v49  ;;  %v1615_v8 = vpack.c.bf16 %v1577_v38, %v1575_v61  ;;  %v1614_v27 = vpack.c.bf16 %v1576_v57, %v1574_v51  ;;  %v1485_v61 = vsub.f32 %v3794_v45, %v4216_v6 }
 0x255   : > { %3091 = vrsqrt.f32 %v1392_v47  ;;  %v1167_v3 = vpop.xlane.xlu0 %1166  ;;  %v1488_v57 = vsub.f32 %v3829_v42, %v4224_v24  ;;  %v1487_v45 = vsub.f32 %v4636_v46, %v4224_v24 }
 0x256   : > { %v3088_v30 = vpop.eup %3087  ;;  %v1393_v63 = vadd.f32 1e-06, %v1373_v2  ;;  %v4277_v48 = vmul.f32 0.00390625, %v1167_v3  ;;  %1858 = vmatprep.mubr.bf16.mxu1 %v1615_v8 }
 0x257   : > { %v1446_v32 = vmul.f32 %v3088_v30, %v4240_v17  ;;  %1859 = vmatmul.mubr.bf16.vlgmr.msra.gmra.mxu1 %v1614_v27  ;;  %v1445_v23 = vmul.f32 %v3088_v30, %v4235_v25 }
 0x258   : > { %3093 = vrsqrt.f32 %v1393_v63  ;;  %2757 = vmatpush3.bf16.msra.mxu1 %v4196_v11  ;;  %v1354_v56 = vmul.f32 %v4277_v48, %v4277_v48 }
 0x259   : > { %v1288_v9 = vpop.xlane.xlu0 %1287  ;;  %2750 = vmatprep.subr.bf16.mxu1 %v4198_v0  ;;  %v1526_v37 = vmul.f32 %v1486_v33, %v1446_v32  ;;  %v1525_v34 = vmul.f32 %v1485_v61, %v1445_v23  ;;  %v4637_v61 = vld [vmem:[#allocation17_spill] sm:$0xff] }
 0x25a   : > { %v3090_v47 = vpop.eup %3089  ;;  %v1170_v54 = vpop.xlane.xlu1 %1169  ;;  %v1334_v16 = vmul.f32 0.00390625, %v1288_v9  ;;  %v1490_v9 = vsub.f32 %v3866_v1, %v4246_v28 }
 0x25b   : > { %v4291_v26 = vmul.f32 0.00390625, %v1170_v54  ;;  %v1448_v14 = vmul.f32 %v3090_v47, %v4240_v17  ;;  %v1447_v11 = vmul.f32 %v3090_v47, %v4235_v25  ;;  %v1579_v2 = vadd.f32 %v4255_v52, %v1526_v37  ;;  %v4638_v54 = vld [vmem:[#allocation18_spill] sm:$0xff] }
 0x25c   : > { %v1374_v6 = vsub.f32 %v1334_v16, %v1354_v56  ;;  %2758 = vmatpush3.bf16.msra.mxu1 %v4201_v29  ;;  %v1578_v24 = vadd.f32 %v4252_v18, %v1525_v34  ;;  %v4639_v16 = vld [vmem:[#allocation19_spill] sm:$0xff] }
 0x25d   : > { %v1528_v42 = vmul.f32 %v1488_v57, %v1448_v14  ;;  %v1527_v38 = vmul.f32 %v1487_v45, %v1447_v11  ;;  %2751 = vmatprep.subr.bf16.mxu1 %v4206_v35  ;;  %v1355_v0 = vmul.f32 %v4291_v26, %v4291_v26  ;;  %v1489_v57 = vsub.f32 %v4637_v61, %v4246_v28 }
 0x25e   : > { %v1394_v49 = vadd.f32 1e-06, %v1374_v6  ;;  %v1291_v15 = vpop.xlane.xlu1 %1290  ;;  %v1492_v14 = vsub.f32 %v4639_v16, %v4263_v19 }
 0x25f   : > { %v1335_v51 = vmul.f32 0.00390625, %v1291_v15  ;;  %v1581_v3 = vadd.f32 %v4255_v52, %v1528_v42  ;;  %v1580_v8 = vadd.f32 %v4252_v18, %v1527_v38 }
 0x260   : > { %3095 = vrsqrt.f32 %v1394_v49  ;;  %2759 = vmatpush3.bf16.msra.mxu1 %v4211_v41  ;;  %v1491_v41 = vsub.f32 %v4638_v54, %v4263_v19 }
 0x261   : > { %v1375_v29 = vsub.f32 %v1335_v51, %v1355_v0  ;;  %v1173_v30 = vpop.xlane.xlu0 %1172  ;;  %v1617_v63 = vpack.c.bf16 %v1581_v3, %v1579_v2  ;;  %v1616_v32 = vpack.c.bf16 %v1580_v8, %v1578_v24  ;;  %2752 = vmatprep.subr.bf16.mxu1 %v4214_v10 }
 0x262   : > { %v3092_v27 = vpop.eup %3091  ;;  %v4306_v35 = vmul.f32 0.00390625, %v1173_v30 }
 0x263   : > { %v1450_v23 = vmul.f32 %v3092_v27, %v4240_v17  ;;  %v1449_v33 = vmul.f32 %v3092_v27, %v4235_v25  ;;  %v1395_v47 = vadd.f32 1e-06, %v1375_v29  ;;  %1868 = vmatprep.mubr.bf16.mxu1 %v1617_v63 }
 0x264   : > { %1869 = vmatmul.mubr.bf16.gmra.mxu1 %v1616_v32  ;;  %v1356_v10 = vmul.f32 %v4306_v35, %v4306_v35 }
 0x265   : > { %v3094_v56 = vpop.eup %3093  ;;  %3097 = vrsqrt.f32 %v1395_v47  ;;  %v1294_v37 = vpop.xlane.xlu0 %1293  ;;  %v1530_v11 = vmul.f32 %v1490_v9, %v1450_v23  ;;  %2760 = vmatpush3.bf16.msra.mxu1 %v4219_v31  ;;  %v1529_v6 = vmul.f32 %v1489_v57, %v1449_v33  ;;  %v1493_v23 = vsub.f32 %v3935_v62, %v4277_v48  ;;  %v4640_v33 = vld [vmem:[#allocation20_spill] sm:$0xff]  ;;  %v4641_v47 = vld [vmem:[#allocation21_spill] sm:$0xff] }
 0x266   : > { %v1176_v1 = vpop.xlane.xlu1 %1175  ;;  %v1336_v46 = vmul.f32 0.00390625, %v1294_v37  ;;  %v1452_v28 = vmul.f32 %v3094_v56, %v4240_v17  ;;  %v1451_v45 = vmul.f32 %v3094_v56, %v4235_v25  ;;  %2753 = vmatprep.subr.bf16.mxu1 %v4222_v43  ;;  %v1494_v9 = vsub.f32 %v4640_v33, %v4277_v48 }
 0x267   : > { %v4325_v34 = vmul.f32 0.00390625, %v1176_v1  ;;  %v1583_v15 = vadd.f32 %v4255_v52, %v1530_v11  ;;  %v1582_v51 = vadd.f32 %v4252_v18, %v1529_v6  ;;  %v1495_v61 = vsub.f32 %v4641_v47, %v4291_v26 }
 0x268   : > { %v1376_v19 = vsub.f32 %v1336_v46, %v1356_v10  ;;  %v1532_v42 = vmul.f32 %v1492_v14, %v1452_v28  ;;  %v1531_v49 = vmul.f32 %v1491_v41, %v1451_v45  ;;  %v4642_v41 = vld [vmem:[#allocation22_spill] sm:$0xff]  ;;  %v1497_v33 = vsub.f32 %v3997_v22, %v4306_v35 }
 0x269   : > { %2761 = vmatpush3.bf16.msra.mxu1 %v4229_v12  ;;  %v1357_v43 = vmul.f32 %v4325_v34, %v4325_v34  ;;  %v1496_v56 = vsub.f32 %v4642_v41, %v4291_v26  ;;  %v1499_v47 = vsub.f32 %v4015_v20, %v4325_v34 }
 0x26a   : > { %v1396_v38 = vadd.f32 1e-06, %v1376_v19  ;;  %v1297_v31 = vpop.xlane.xlu1 %1296  ;;  %v1585_v0 = vadd.f32 %v4255_v52, %v1532_v42  ;;  %v1584_v2 = vadd.f32 %v4252_v18, %v1531_v49  ;;  %2754 = vmatprep.subr.bf16.mxu1 %v4232_v36 }
 0x26b   : > { %v1337_v3 = vmul.f32 0.00390625, %v1297_v31 }
 0x26c   : > { %3099 = vrsqrt.f32 %v1396_v38  ;;  %v1619_v24 = vpack.c.bf16 %v1585_v0, %v1583_v15  ;;  %v1618_v8 = vpack.c.bf16 %v1584_v2, %v1582_v51 }
 0x26d   : > { %v3096_v27 = vpop.eup %3095  ;;  %v1377_v29 = vsub.f32 %v1337_v3, %v1357_v43  ;;  %v1179_v12 = vpop.xlane.xlu0 %1178  ;;  %2762 = vmatpush3.bf16.msra.mxu1 %v4243_v60 }
 0x26e   : > { %v4336_v30 = vmul.f32 0.00390625, %v1179_v12  ;;  %1878 = vmatprep.mubr.bf16.mxu1 %v1619_v24  ;;  %v1454_v32 = vmul.f32 %v3096_v27, %v4240_v17  ;;  %v1453_v36 = vmul.f32 %v3096_v27, %v4235_v25 }
 0x26f   : > { %v1397_v63 = vadd.f32 1e-06, %v1377_v29  ;;  %1879 = vmatmul.mubr.bf16.gmra.mxu1 %v1618_v8 }
 0x270   : > { %v1358_v14 = vmul.f32 %v4336_v30, %v4336_v30  ;;  %v1534_v37 = vmul.f32 %v1494_v9, %v1454_v32  ;;  %v1533_v11 = vmul.f32 %v1493_v23, %v1453_v36  ;;  %v1498_v9 = vsub.f32 %v4000_v50, %v4306_v35 }
 0x271   : > { %3101 = vrsqrt.f32 %v1397_v63  ;;  %v1182_v60 = vpop.xlane.xlu1 %1181  ;;  %v1300_v57 = vpop.xlane.xlu0 %1299 }
 0x272   : > { %v3098_v54 = vpop.eup %3097  ;;  %v4348_v16 = vmul.f32 0.00390625, %v1182_v60  ;;  %v1338_v10 = vmul.f32 0.00390625, %v1300_v57  ;;  %v1587_v15 = vadd.f32 %v4255_v52, %v1534_v37  ;;  %v1586_v31 = vadd.f32 %v4252_v18, %v1533_v11 }
 0x273   : > { %v1456_v62 = vmul.f32 %v3098_v54, %v4240_v17  ;;  %v1455_v48 = vmul.f32 %v3098_v54, %v4235_v25 }
 0x274   : > { %v1378_v1 = vsub.f32 %v1338_v10, %v1358_v14  ;;  %v1359_v26 = vmul.f32 %v4348_v16, %v4348_v16 }
 0x275   : > { %v1303_v46 = vpop.xlane.xlu1 %1302  ;;  %v1185_v28 = vpop.xlane.xlu0 %1184  ;;  %v1536_v45 = vmul.f32 %v1496_v56, %v1456_v62  ;;  %v1535_v6 = vmul.f32 %v1495_v61, %v1455_v48  ;;  %v4643_v61 = vld [vmem:[#allocation23_spill] sm:$0xff] }
 0x276   : > { %v1398_v19 = vadd.f32 1e-06, %v1378_v1  ;;  %v1339_v42 = vmul.f32 0.00390625, %v1303_v46  ;;  %v4356_v49 = vmul.f32 0.00390625, %v1185_v28  ;;  %v1500_v60 = vsub.f32 %v4643_v61, %v4325_v34 }
 0x277   : > { %v1589_v38 = vadd.f32 %v4255_v52, %v1536_v45  ;;  %v1588_v0 = vadd.f32 %v4252_v18, %v1535_v6 }
 0x278   : > { %3103 = vrsqrt.f32 %v1398_v19  ;;  %v1379_v51 = vsub.f32 %v1339_v42, %v1359_v26  ;;  %v1360_v12 = vmul.f32 %v4356_v49, %v4356_v49 }
 0x279   : > { %v3100_v2 = vpop.eup %3099  ;;  %v1188_v43 = vpop.xlane.xlu1 %1187  ;;  %v1621_v24 = vpack.c.bf16 %v1589_v38, %v1587_v15  ;;  %v1620_v8 = vpack.c.bf16 %v1588_v0, %v1586_v31 }
 0x27a   : > { %v1306_v3 = vpop.xlane.xlu0 %1305  ;;  %v1399_v27 = vadd.f32 1e-06, %v1379_v51  ;;  %v4362_v29 = vmul.f32 0.00390625, %v1188_v43  ;;  %v1458_v32 = vmul.f32 %v3100_v2, %v4240_v17  ;;  %v1457_v36 = vmul.f32 %v3100_v2, %v4235_v25 }
 0x27b   : > { %v1340_v63 = vmul.f32 0.00390625, %v1306_v3  ;;  %1888 = vmatprep.mubr.bf16.mxu1 %v1621_v24 }
 0x27c   : > { %3105 = vrsqrt.f32 %v1399_v27  ;;  %1889 = vmatmul.mubr.bf16.gmra.mxu1 %v1620_v8  ;;  %v1361_v14 = vmul.f32 %v4362_v29, %v4362_v29  ;;  %v1538_v37 = vmul.f32 %v1498_v9, %v1458_v32  ;;  %v1537_v35 = vmul.f32 %v1497_v33, %v1457_v36 }
 0x27d   : > { %v1380_v23 = vsub.f32 %v1340_v63, %v1360_v12  ;;  %v1309_v57 = vpop.xlane.xlu1 %1308  ;;  %v1501_v63 = vsub.f32 %v4060_v58, %v4336_v30  ;;  %v1502_v32 = vsub.f32 %v4063_v5, %v4336_v30  ;;  %v1503_v30 = vsub.f32 %v4074_v59, %v4348_v16 }
 0x27e   : > { %v1191_v54 = vpop.xlane.xlu0 %1190  ;;  %v3102_v41 = vpop.eup %3101  ;;  %v1341_v10 = vmul.f32 0.00390625, %v1309_v57  ;;  %v1591_v19 = vadd.f32 %v4255_v52, %v1538_v37  ;;  %v1590_v42 = vadd.f32 %v4252_v18, %v1537_v35 }
 0x27f   : > { %v1400_v56 = vadd.f32 1e-06, %v1380_v23  ;;  %v4378_v62 = vmul.f32 0.00390625, %v1191_v54  ;;  %v1460_v22 = vmul.f32 %v3102_v41, %v4240_v17  ;;  %v1459_v50 = vmul.f32 %v3102_v41, %v4235_v25 }
 0x280   : > { %v1381_v20 = vsub.f32 %v1341_v10, %v1361_v14 }
 0x281   : > { %3107 = vrsqrt.f32 %v1400_v56  ;;  %v1194_v48 = vpop.xlane.xlu1 %1193  ;;  %v1540_v11 = vmul.f32 %v1500_v60, %v1460_v22  ;;  %v1539_v1 = vmul.f32 %v1499_v47, %v1459_v50  ;;  %v1362_v45 = vmul.f32 %v4378_v62, %v4378_v62 }
 0x282   : > { %v1312_v34 = vpop.xlane.xlu0 %1311  ;;  %v1401_v46 = vadd.f32 1e-06, %v1381_v20  ;;  %v4382_v28 = vmul.f32 0.00390625, %v1194_v48  ;;  %v1504_v56 = vsub.f32 %v4079_v21, %v4348_v16 }
 0x283   : > { %v1342_v6 = vmul.f32 0.00390625, %v1312_v34  ;;  %v1593_v26 = vadd.f32 %v4255_v52, %v1540_v11  ;;  %v1592_v15 = vadd.f32 %v4252_v18, %v1539_v1 }
 0x284   : > { %3109 = vrsqrt.f32 %v1401_v46  ;;  %v1363_v0 = vmul.f32 %v4382_v28, %v4382_v28 }
 0x285   : > { %v1382_v38 = vsub.f32 %v1342_v6, %v1362_v45  ;;  %v3104_v31 = vpop.eup %3103  ;;  %v1315_v51 = vpop.xlane.xlu1 %1314  ;;  %v1623_v43 = vpack.c.bf16 %v1593_v26, %v1591_v19  ;;  %v1622_v3 = vpack.c.bf16 %v1592_v15, %v1590_v42  ;;  %v1505_v19 = vsub.f32 %v4093_v40, %v4356_v49 }
 0x286   : > { %v1197_v2 = vpop.xlane.xlu0 %1196  ;;  %v1343_v8 = vmul.f32 0.00390625, %v1315_v51  ;;  %v1462_v12 = vmul.f32 %v3104_v31, %v4240_v17  ;;  %v1461_v36 = vmul.f32 %v3104_v31, %v4235_v25  ;;  %v1506_v26 = vsub.f32 %v4096_v13, %v4356_v49 }
 0x287   : > { %v1402_v24 = vadd.f32 1e-06, %v1382_v38  ;;  %v4392_v27 = vmul.f32 0.00390625, %v1197_v2  ;;  %1898 = vmatprep.mubr.bf16.mxu1 %v1623_v43  ;;  %v1507_v38 = vsub.f32 %v4105_v55, %v4362_v29  ;;  %v1508_v13 = vsub.f32 %v4108_v44, %v4362_v29 }
 0x288   : > { %v1383_v23 = vsub.f32 %v1343_v8, %v1363_v0  ;;  %1899 = vmatmul.mubr.bf16.gmra.mxu1 %v1622_v3  ;;  %v1542_v60 = vmul.f32 %v1502_v32, %v1462_v12  ;;  %v1541_v57 = vmul.f32 %v1501_v63, %v1461_v36  ;;  %v1509_v63 = vsub.f32 %v4121_v7, %v4378_v62 }
 0x289   : > { %3111 = vrsqrt.f32 %v1402_v24  ;;  %v3106_v33 = vpop.eup %3105  ;;  %v1200_v9 = vpop.xlane.xlu1 %1199  ;;  %v1364_v47 = vmul.f32 %v4392_v27, %v4392_v27 }
 0x28a   : > { %v1318_v61 = vpop.xlane.xlu0 %1317  ;;  %v1403_v54 = vadd.f32 1e-06, %v1383_v23  ;;  %v4402_v41 = vmul.f32 0.00390625, %v1200_v9  ;;  %v1464_v5 = vmul.f32 %v3106_v33, %v4240_v17  ;;  %v1463_v14 = vmul.f32 %v3106_v33, %v4235_v25 }
 0x28b   : > { %v1344_v58 = vmul.f32 0.00390625, %v1318_v61  ;;  %v1595_v20 = vadd.f32 %v4255_v52, %v1542_v60  ;;  %v1594_v34 = vadd.f32 %v4252_v18, %v1541_v57  ;;  %v1510_v23 = vsub.f32 %v4114_v53, %v4378_v62 }
 0x28c   : > { %3113 = vrsqrt.f32 %v1403_v54  ;;  %v1544_v35 = vmul.f32 %v1504_v56, %v1464_v5  ;;  %v1543_v48 = vmul.f32 %v1503_v30, %v1463_v14  ;;  %v1365_v59 = vmul.f32 %v4402_v41, %v4402_v41 }
 0x28d   : > { %v1384_v10 = vsub.f32 %v1344_v58, %v1364_v47  ;;  %v1321_v37 = vpop.xlane.xlu1 %1320  ;;  %v1511_v62 = vsub.f32 %v4132_v39, %v4382_v28 }
 0x28e   : > { %v3108_v22 = vpop.eup %3107  ;;  %v1203_v50 = vpop.xlane.xlu0 %1202  ;;  %v1345_v1 = vmul.f32 0.00390625, %v1321_v37  ;;  %v1597_v21 = vadd.f32 %v4255_v52, %v1544_v35  ;;  %v1596_v16 = vadd.f32 %v4252_v18, %v1543_v48  ;;  %v1512_v37 = vsub.f32 %v4129_v4, %v4382_v28  ;;  %v2999_v48 = vld [vmem:[#allocation10 + $0x48] sm:$0xff]  }
 0x28f   : > { %v1404_v11 = vadd.f32 1e-06, %v1384_v10  ;;  %v4414_v46 = vmul.f32 0.00390625, %v1203_v50  ;;  %v1466_v45 = vmul.f32 %v3108_v22, %v4240_v17  ;;  %v1465_v6 = vmul.f32 %v3108_v22, %v4235_v25  ;;  %2685 = vmatprep.subr.bf16.mxu0 %v2999_v48  ;;  %2755 = vmatprep.subr.bf16.mxu1 %v2999_v48 }
 0x290   : > { %v1385_v42 = vsub.f32 %v1345_v1, %v1365_v59  ;;  %v1625_v2 = vpack.c.bf16 %v1597_v21, %v1595_v20  ;;  %v1624_v43 = vpack.c.bf16 %v1596_v16, %v1594_v34  ;;  %v3000_v34 = vld [vmem:[#allocation10 + $0x8] sm:$0xff]  }
 0x291   : > { %3115 = vrsqrt.f32 %v1404_v11  ;;  %v3110_v15 = vpop.eup %3109  ;;  %v1206_v31 = vpop.xlane.xlu1 %1205  ;;  %v1366_v0 = vmul.f32 %v4414_v46, %v4414_v46  ;;  %v1546_v49 = vmul.f32 %v1506_v26, %v1466_v45  ;;  %v1545_v12 = vmul.f32 %v1505_v19, %v1465_v6  ;;  %2686 = vmatpush3.bf16.msra.mxu0 %v3000_v34  ;;  %2763 = vmatpush3.bf16.msra.mxu1 %v3000_v34  ;;  %v4644_v6 = vld [vmem:[#allocation25_spill] sm:$0xff]  ;;  %v4645_v26 = vld [vmem:[#allocation24_spill] sm:$0xff] }
 0x292   : > { %v1324_v51 = vpop.xlane.xlu0 %1323  ;;  %v1405_v3 = vadd.f32 1e-06, %v1385_v42  ;;  %v4428_v24 = vmul.f32 0.00390625, %v1206_v31  ;;  %v1468_v8 = vmul.f32 %v3110_v15, %v4240_v17  ;;  %1908 = vmatprep.mubr.bf16.mxu1 %v1625_v2  ;;  %v1467_v55 = vmul.f32 %v3110_v15, %v4235_v25  ;;  %v3001_v15 = vld [vmem:[#allocation10 + $0x40] sm:$0xff]  }
 0x293   : > { %v1346_v40 = vmul.f32 0.00390625, %v1324_v51  ;;  %1909 = vmatmul.mubr.bf16.gmra.mxu1 %v1624_v43  ;;  %v1599_v7 = vadd.f32 %v4255_v52, %v1546_v49  ;;  %v1598_v58 = vadd.f32 %v4252_v18, %v1545_v12  ;;  %v1513_v19 = vsub.f32 %v4644_v6, %v4392_v27  ;;  %2687 = vmatprep.subr.bf16.mxu0 %v3001_v15 }
 0x294   : > { %3117 = vrsqrt.f32 %v1405_v3  ;;  %v1367_v33 = vmul.f32 %v4428_v24, %v4428_v24  ;;  %v1548_v44 = vmul.f32 %v1508_v13, %v1468_v8  ;;  %v1547_v29 = vmul.f32 %v1507_v38, %v1467_v55  ;;  %v3002_v38 = vld [vmem:[#allocation10] sm:$0xff]   ;;  %2756 = vmatprep.subr.bf16.mxu1 %v3001_v15  ;;  %v4646_v3 = vld [vmem:[#allocation27_spill] sm:$0xff]  ;;  %v4647_v8 = vld [vmem:[#allocation26_spill] sm:$0xff] }
 0x295   : > { %v1386_v32 = vsub.f32 %v1346_v40, %v1366_v0  ;;  %v1327_v9 = vpop.xlane.xlu1 %1326  ;;  %v1514_v42 = vsub.f32 %v4645_v26, %v4392_v27  ;;  %v1515_v40 = vsub.f32 %v4646_v3, %v4402_v41  ;;  %v1516_v13 = vsub.f32 %v4647_v8, %v4402_v41  ;;  %2688 = vmatpush3.bf16.msra.mxu0 %v3002_v38 }
 0x296   : > { %v3112_v36 = vpop.eup %3111  ;;  %v1347_v61 = vmul.f32 0.00390625, %v1327_v9  ;;  %v1601_v54 = vadd.f32 %v4255_v52, %v1548_v44  ;;  %v1600_v53 = vadd.f32 %v4252_v18, %v1547_v29  ;;  %2764 = vmatpush3.bf16.msra.mxu1 %v3002_v38  ;;  %v4648_v44 = vld [vmem:[#allocation29_spill] sm:$0xff] }
 0x297   : > { %v1406_v47 = vadd.f32 1e-06, %v1386_v32  ;;  %v1470_v60 = vmul.f32 %v3112_v36, %v4240_v17  ;;  %v1469_v57 = vmul.f32 %v3112_v36, %v4235_v25  ;;  %v1517_v29 = vsub.f32 %v4648_v44, %v4414_v46 }
 0x298   : > { %v1387_v5 = vsub.f32 %v1347_v61, %v1367_v33  ;;  %v1627_v56 = vpack.c.bf16 %v1601_v54, %v1599_v7  ;;  %v1626_v14 = vpack.c.bf16 %v1600_v53, %v1598_v58  ;;  %v4650_v54 = vld [vmem:[#allocation31_spill] sm:$0xff]  ;;  %v4651_v53 = vld [vmem:[#allocation30_spill] sm:$0xff] }
 0x299   : > { %3119 = vrsqrt.f32 %v1406_v47  ;;  %v3114_v30 = vpop.eup %3113  ;;  %v1550_v10 = vmul.f32 %v1510_v23, %v1470_v60  ;;  %v1549_v22 = vmul.f32 %v1509_v63, %v1469_v57  ;;  %v4649_v47 = vld [vmem:[#allocation28_spill] sm:$0xff]  ;;  %v1519_v58 = vsub.f32 %v4650_v54, %v4428_v24 }
 0x29a   : > { %v1407_v50 = vadd.f32 1e-06, %v1387_v5  ;;  %v1472_v35 = vmul.f32 %v3114_v30, %v4240_v17  ;;  %v1471_v20 = vmul.f32 %v3114_v30, %v4235_v25  ;;  %1918 = vmatprep.mubr.bf16.mxu1 %v1627_v56  ;;  %v1518_v61 = vsub.f32 %v4649_v47, %v4414_v46 }
 0x29b   : > { %1919 = vmatmul.mubr.bf16.gmra.mxu1 %v1626_v14  ;;  %v1603_v1 = vadd.f32 %v4255_v52, %v1550_v10  ;;  %v1602_v21 = vadd.f32 %v4252_v18, %v1549_v22 }
 0x29c   : > { %3121 = vrsqrt.f32 %v1407_v50  ;;  %v1552_v39 = vmul.f32 %v1512_v37, %v1472_v35  ;;  %v1551_v11 = vmul.f32 %v1511_v62, %v1471_v20  ;;  %v1520_v62 = vsub.f32 %v4651_v53, %v4428_v24 }
 0x29e   : > { %v3116_v59 = vpop.eup %3115  ;;  %v1605_v4 = vadd.f32 %v4255_v52, %v1552_v39  ;;  %v1604_v28 = vadd.f32 %v4252_v18, %v1551_v11 }
 0x29f   : > { %v1474_v16 = vmul.f32 %v3116_v59, %v4240_v17  ;;  %v1473_v45 = vmul.f32 %v3116_v59, %v4235_v25 }
 0x2a0   : > { %v1629_v31 = vpack.c.bf16 %v1605_v4, %v1603_v1  ;;  %v1628_v0 = vpack.c.bf16 %v1604_v28, %v1602_v21 }
 0x2a1   : > { %v3118_v51 = vpop.eup %3117  ;;  %v1554_v2 = vmul.f32 %v1514_v42, %v1474_v16  ;;  %v1553_v43 = vmul.f32 %v1513_v19, %v1473_v45 }
 0x2a2   : > { %1928 = vmatprep.mubr.bf16.mxu1 %v1629_v31  ;;  %v1476_v49 = vmul.f32 %v3118_v51, %v4240_v17  ;;  %v1475_v27 = vmul.f32 %v3118_v51, %v4235_v25 }
 0x2a3   : > { %1929 = vmatmul.mubr.bf16.gmra.mxu1 %v1628_v0  ;;  %v1607_v32 = vadd.f32 %v4255_v52, %v1554_v2  ;;  %v1606_v36 = vadd.f32 %v4252_v18, %v1553_v43 }
 0x2a4   : > { %v1556_v55 = vmul.f32 %v1516_v13, %v1476_v49  ;;  %v1555_v12 = vmul.f32 %v1515_v40, %v1475_v27 }
 0x2a6   : > { %v3120_v63 = vpop.eup %3119  ;;  %v1609_v23 = vadd.f32 %v4255_v52, %v1556_v55  ;;  %v1608_v33 = vadd.f32 %v4252_v18, %v1555_v12 }
 0x2a7   : > { %v1478_v41 = vmul.f32 %v3120_v63, %v4240_v17  ;;  %v1477_v9 = vmul.f32 %v3120_v63, %v4235_v25 }
 0x2a8   : > { %v1631_v60 = vpack.c.bf16 %v1609_v23, %v1607_v32  ;;  %v1630_v57 = vpack.c.bf16 %v1608_v33, %v1606_v36 }
 0x2a9   : > { %v3122_v7 = vpop.eup %3121  ;;  %v1558_v30 = vmul.f32 %v1518_v61, %v1478_v41  ;;  %v1557_v14 = vmul.f32 %v1517_v29, %v1477_v9 }
 0x2aa   : > { %1938 = vmatprep.mubr.bf16.mxu1 %v1631_v60  ;;  %v1480_v5 = vmul.f32 %v3122_v7, %v4240_v17  ;;  %v1479_v56 = vmul.f32 %v3122_v7, %v4235_v25 }
 0x2ab   : > { %1939 = vmatmul.mubr.bf16.gmra.mxu1 %v1630_v57  ;;  %v1611_v46 = vadd.f32 %v4255_v52, %v1558_v30  ;;  %v1610_v50 = vadd.f32 %v4252_v18, %v1557_v14 }
 0x2ac   : > { %v1560_v10 = vmul.f32 %v1520_v62, %v1480_v5  ;;  %v1559_v22 = vmul.f32 %v1519_v58, %v1479_v56 }
 0x2ae   : > { %v1613_v37 = vadd.f32 %v4255_v52, %v1560_v10  ;;  %v1612_v35 = vadd.f32 %v4252_v18, %v1559_v22 }
 0x2b0   : > { %v1633_v20 = vpack.c.bf16 %v1613_v37, %v1611_v46  ;;  %v1632_v24 = vpack.c.bf16 %v1612_v35, %v1610_v50 }
 0x2b2   : > { %1948 = vmatprep.mubr.bf16.mxu1 %v1633_v20 }
 0x2b3   : > { %1949 = vmatmul.mubr.bf16.gmra.mxu1 %v1632_v24 }
 0x317   : > { %v1860_v17 = vpop.f32.mrf.mxu1 }
 0x319   : > { %v1862_v48 = vpop.f32.mrf.mxu1 }
 0x31b   : > { %v1864_v34 = vpop.f32.mrf.mxu1 }
 0x31c   : > { %v1959_v11 = vpack.c.bf16 %v1864_v34, %v1860_v17  ;;  %v4491_v17 = vld [vmem:[%s4581_s5] ss:$0 sm:$0xff] }
 0x31d   : > { %v1866_v25 = vpop.f32.mrf.mxu1 }
 0x31e   : > { %v1960_v39 = vpack.c.bf16 %v1866_v25, %v1862_v48 }
 0x320   : > { %2146 = vmatprep.mubr.bf16.mxu0 %v1960_v39 }
 0x321   : > { %2147 = vmatmul.mubr.bf16.vlgmr.msra.gmra.mxu0 %v1959_v11 }
 0x324   : > { %v1870_v59 = vpop.f32.mrf.mxu1 }
 0x326   : > { %v1872_v1 = vpop.f32.mrf.mxu1 }
 0x328   : > { %v1874_v21 = vpop.f32.mrf.mxu1 }
 0x329   : > { %v1961_v28 = vpack.c.bf16 %v1874_v21, %v1870_v59 }
 0x32a   : > { %v1876_v52 = vpop.f32.mrf.mxu1 }
 0x32b   : > { %v1962_v4 = vpack.c.bf16 %v1876_v52, %v1872_v1 }
 0x32d   : > { %2154 = vmatprep.mubr.bf16.mxu0 %v1962_v4 }
 0x32e   : > { %2155 = vmatmul.mubr.bf16.gmra.mxu0 %v1961_v28 }
 0x32f   : > { %v1880_v18 = vpop.f32.mrf.mxu1 }
 0x331   : > { %v1882_v16 = vpop.f32.mrf.mxu1 }
 0x333   : > { %v1884_v45 = vpop.f32.mrf.mxu1 }
 0x334   : > { %v1963_v26 = vpack.c.bf16 %v1884_v45, %v1880_v18 }
 0x335   : > { %v1886_v6 = vpop.f32.mrf.mxu1 }
 0x336   : > { %v1964_v19 = vpack.c.bf16 %v1886_v6, %v1882_v16 }
 0x338   : > { %2162 = vmatprep.mubr.bf16.mxu0 %v1964_v19 }
 0x339   : > { %2163 = vmatmul.mubr.bf16.gmra.mxu0 %v1963_v26 }
 0x33c   : > { %v1890_v42 = vpop.f32.mrf.mxu1 }
 0x33e   : > { %v1892_v15 = vpop.f32.mrf.mxu1 }
 0x340   : > { %v1894_v38 = vpop.f32.mrf.mxu1 }
 0x341   : > { %v1965_v51 = vpack.c.bf16 %v1894_v38, %v1890_v42 }
 0x342   : > { %v1896_v31 = vpop.f32.mrf.mxu1 }
 0x343   : > { %v1966_v0 = vpack.c.bf16 %v1896_v31, %v1892_v15 }
 0x345   : > { %2170 = vmatprep.mubr.bf16.mxu0 %v1966_v0 }
 0x346   : > { %2171 = vmatmul.mubr.bf16.gmra.mxu0 %v1965_v51 }
 0x348   : > { %v1900_v2 = vpop.f32.mrf.mxu1 }
 0x34a   : > { %v1902_v43 = vpop.f32.mrf.mxu1 }
 0x34c   : > { %v1904_v3 = vpop.f32.mrf.mxu1 }
 0x34d   : > { %v1967_v13 = vpack.c.bf16 %v1904_v3, %v1900_v2 }
 0x34e   : > { %v1906_v40 = vpop.f32.mrf.mxu1 }
 0x34f   : > { %v1968_v8 = vpack.c.bf16 %v1906_v40, %v1902_v43 }
 0x351   : > { %2178 = vmatprep.mubr.bf16.mxu0 %v1968_v8 }
 0x352   : > { %2179 = vmatmul.mubr.bf16.gmra.mxu0 %v1967_v13 }
 0x353   : > { %v1910_v49 = vpop.f32.mrf.mxu1 }
 0x355   : > { %v1912_v27 = vpop.f32.mrf.mxu1 }
 0x357   : > { %v1914_v55 = vpop.f32.mrf.mxu1 }
 0x358   : > { %v1969_v32 = vpack.c.bf16 %v1914_v55, %v1910_v49 }
 0x359   : > { %v1916_v12 = vpop.f32.mrf.mxu1 }
 0x35a   : > { %v1970_v63 = vpack.c.bf16 %v1916_v12, %v1912_v27 }
 0x35b   : > { %v1920_v36 = vpop.f32.mrf.mxu1 }
 0x35c   : > { %2186 = vmatprep.mubr.bf16.mxu1 %v1970_v63 }
 0x35d   : > { %v1922_v23 = vpop.f32.mrf.mxu1  ;;  %2187 = vmatmul.mubr.bf16.vlgmr.msra.gmra.mxu1 %v1969_v32 }
 0x35f   : > { %v1924_v33 = vpop.f32.mrf.mxu1 }
 0x360   : > { %v1971_v44 = vpack.c.bf16 %v1924_v33, %v1920_v36 }
 0x361   : > { %v1926_v41 = vpop.f32.mrf.mxu1 }
 0x362   : > { %v1972_v9 = vpack.c.bf16 %v1926_v41, %v1922_v23 }
 0x363   : > { %v1930_v29 = vpop.f32.mrf.mxu1 }
 0x364   : > { %2194 = vmatprep.mubr.bf16.mxu1 %v1972_v9 }
 0x365   : > { %v1932_v47 = vpop.f32.mrf.mxu1  ;;  %2195 = vmatmul.mubr.bf16.gmra.mxu1 %v1971_v44 }
 0x367   : > { %v1934_v61 = vpop.f32.mrf.mxu1 }
 0x368   : > { %v1973_v7 = vpack.c.bf16 %v1934_v61, %v1930_v29 }
 0x369   : > { %v1936_v60 = vpop.f32.mrf.mxu1 }
 0x36a   : > { %v1974_v57 = vpack.c.bf16 %v1936_v60, %v1932_v47 }
 0x36b   : > { %v1940_v54 = vpop.f32.mrf.mxu1 }
 0x36c   : > { %2202 = vmatprep.mubr.bf16.mxu1 %v1974_v57 }
 0x36d   : > { %v1942_v58 = vpop.f32.mrf.mxu1  ;;  %2203 = vmatmul.mubr.bf16.gmra.mxu1 %v1973_v7 }
 0x36f   : > { %v1944_v53 = vpop.f32.mrf.mxu1 }
 0x370   : > { %v1975_v30 = vpack.c.bf16 %v1944_v53, %v1940_v54 }
 0x371   : > { %v1946_v62 = vpop.f32.mrf.mxu1 }
 0x372   : > { %v1976_v5 = vpack.c.bf16 %v1946_v62, %v1942_v58 }
 0x373   : > { %v1950_v56 = vpop.f32.mrf.mxu1 }
 0x374   : > { %2210 = vmatprep.mubr.bf16.mxu1 %v1976_v5 }
 0x375   : > { %v1952_v14 = vpop.f32.mrf.mxu1  ;;  %2211 = vmatmul.mubr.bf16.gmra.mxu1 %v1975_v30 }
 0x377   : > { %v1954_v10 = vpop.f32.mrf.mxu1 }
 0x378   : > { %v1977_v37 = vpack.c.bf16 %v1954_v10, %v1950_v56 }
 0x379   : > { %v1956_v22 = vpop.f32.mrf.mxu1 }
 0x37a   : > { %v1978_v46 = vpack.c.bf16 %v1956_v22, %v1952_v14 }
 0x37c   : > { %2218 = vmatprep.mubr.bf16.mxu1 %v1978_v46 }
 0x37d   : > { %2219 = vmatmul.mubr.bf16.gmra.mxu1 %v1977_v37 }
 0x3e1   : > { %v2689_v50 = vpop.f32.mrf.mxu0 }
 0x3e3   : > { %v2690_v35 = vpop.f32.mrf.mxu0 }
 0x3e4   : > { %v2691_v24 = vadd.f32 %v2690_v35, %v2689_v50 }
 0x3e5   : > { %v2692_v20 = vpop.f32.mrf.mxu0 }
 0x3e6   : > { %v2149_v25 = vadd.f32 %v2691_v24, %v4491_v17 }
 0x3e7   : > { %v2693_v48 = vpop.f32.mrf.mxu0 }
 0x3e8   : > { %v2694_v34 = vadd.f32 %v2693_v48, %v2692_v20 }
 0x3ea   : > { %v2152_v39 = vadd.f32 %v2694_v34, %v4491_v17 }
 0x3ec   : > { %v2616_v11 = vpack.c.bf16 %v2152_v39, %v2149_v25 }
 0x3ee   : > { %v2695_v59 = vpop.f32.mrf.mxu0  ;;  %2617 = vst [vmem:[%s4496_s12] sm:$0xff] %v2616_v11  }
 0x3f0   : > { %v2696_v1 = vpop.f32.mrf.mxu0 }
 0x3f1   : > { %v2697_v52 = vadd.f32 %v2696_v1, %v2695_v59 }
 0x3f2   : > { %v2698_v21 = vpop.f32.mrf.mxu0 }
 0x3f3   : > { %v2157_v18 = vadd.f32 %v2697_v52, %v4491_v17 }
 0x3f4   : > { %v2699_v4 = vpop.f32.mrf.mxu0 }
 0x3f5   : > { %v2700_v28 = vadd.f32 %v2699_v4, %v2698_v21 }
 0x3f7   : > { %v2160_v16 = vadd.f32 %v2700_v28, %v4491_v17 }
 0x3f9   : > { %v2621_v45 = vpack.c.bf16 %v2160_v16, %v2157_v18  ;;  %v2701_v6 = vpop.f32.mrf.mxu0 }
 0x3fb   : > { %2664 = vst [vmem:[%s4496_s12 + $0x8] sm:$0xff] %v2621_v45   ;;  %v2702_v19 = vpop.f32.mrf.mxu0 }
 0x3fc   : > { %v2703_v42 = vadd.f32 %v2702_v19, %v2701_v6 }
 0x3fd   : > { %v2704_v26 = vpop.f32.mrf.mxu0 }
 0x3fe   : > { %v2165_v31 = vadd.f32 %v2703_v42, %v4491_v17 }
 0x3ff   : > { %v2705_v15 = vpop.f32.mrf.mxu0 }
 0x400   : > { %v2706_v38 = vadd.f32 %v2705_v15, %v2704_v26 }
 0x402   : > { %v2168_v0 = vadd.f32 %v2706_v38, %v4491_v17 }
 0x404   : > { %v2626_v51 = vpack.c.bf16 %v2168_v0, %v2165_v31 }
 0x406   : > { %2665 = vst [vmem:[%s4496_s12 + $0x10] sm:$0xff] %v2626_v51   ;;  %v2707_v2 = vpop.f32.mrf.mxu0 }
 0x408   : > { %v2708_v43 = vpop.f32.mrf.mxu0 }
 0x409   : > { %v2709_v40 = vadd.f32 %v2708_v43, %v2707_v2 }
 0x40a   : > { %v2710_v3 = vpop.f32.mrf.mxu0 }
 0x40b   : > { %v2173_v49 = vadd.f32 %v2709_v40, %v4491_v17 }
 0x40c   : > { %v2711_v8 = vpop.f32.mrf.mxu0 }
 0x40d   : > { %v2712_v13 = vadd.f32 %v2711_v8, %v2710_v3 }
 0x40f   : > { %v2176_v27 = vadd.f32 %v2712_v13, %v4491_v17 }
 0x411   : > { %v2631_v55 = vpack.c.bf16 %v2176_v27, %v2173_v49 }
 0x412   : > { %v2713_v12 = vpop.f32.mrf.mxu0 }
 0x413   : > { %2666 = vst [vmem:[%s4496_s12 + $0x18] sm:$0xff] %v2631_v55  }
 0x414   : > { %v2714_v63 = vpop.f32.mrf.mxu0 }
 0x415   : > { %v2715_v36 = vadd.f32 %v2714_v63, %v2713_v12 }
 0x416   : > { %v2716_v32 = vpop.f32.mrf.mxu0 }
 0x417   : > { %v2181_v41 = vadd.f32 %v2715_v36, %v4491_v17 }
 0x418   : > { %v2717_v23 = vpop.f32.mrf.mxu0 }
 0x419   : > { %v2718_v33 = vadd.f32 %v2717_v23, %v2716_v32 }
 0x41b   : > { %v2184_v9 = vadd.f32 %v2718_v33, %v4491_v17 }
 0x41d   : > { %v2636_v44 = vpack.c.bf16 %v2184_v9, %v2181_v41  ;;  %v2719_v29 = vpop.f32.mrf.mxu1 }
 0x41f   : > { %2667 = vst [vmem:[%s4496_s12 + $0x20] sm:$0xff] %v2636_v44   ;;  %v2720_v47 = vpop.f32.mrf.mxu1 }
 0x420   : > { %v2721_v60 = vadd.f32 %v2720_v47, %v2719_v29 }
 0x421   : > { %v2722_v61 = vpop.f32.mrf.mxu1 }
 0x422   : > { %v2189_v58 = vadd.f32 %v2721_v60, %v4491_v17 }
 0x423   : > { %v2723_v57 = vpop.f32.mrf.mxu1 }
 0x424   : > { %v2724_v7 = vadd.f32 %v2723_v57, %v2722_v61 }
 0x425   : > { %v2725_v54 = vpop.f32.mrf.mxu1 }
 0x426   : > { %v2192_v53 = vadd.f32 %v2724_v7, %v4491_v17 }
 0x427   : > { %v2726_v62 = vpop.f32.mrf.mxu1 }
 0x428   : > { %v2641_v5 = vpack.c.bf16 %v2192_v53, %v2189_v58  ;;  %v2727_v56 = vadd.f32 %v2726_v62, %v2725_v54 }
 0x429   : > { %v2728_v30 = vpop.f32.mrf.mxu1 }
 0x42a   : > { %2668 = vst [vmem:[%s4496_s12 + $0x28] sm:$0xff] %v2641_v5   ;;  %v2197_v46 = vadd.f32 %v2727_v56, %v4491_v17 }
 0x42b   : > { %v2729_v14 = vpop.f32.mrf.mxu1 }
 0x42c   : > { %v2730_v10 = vadd.f32 %v2729_v14, %v2728_v30 }
 0x42d   : > { %v2731_v22 = vpop.f32.mrf.mxu1 }
 0x42e   : > { %v2200_v37 = vadd.f32 %v2730_v10, %v4491_v17 }
 0x42f   : > { %v2732_v50 = vpop.f32.mrf.mxu1 }
 0x430   : > { %v2646_v35 = vpack.c.bf16 %v2200_v37, %v2197_v46  ;;  %v2733_v24 = vadd.f32 %v2732_v50, %v2731_v22 }
 0x431   : > { %v2734_v20 = vpop.f32.mrf.mxu1 }
 0x432   : > { %2669 = vst [vmem:[%s4496_s12 + $0x30] sm:$0xff] %v2646_v35   ;;  %v2205_v39 = vadd.f32 %v2733_v24, %v4491_v17 }
 0x433   : > { %v2735_v48 = vpop.f32.mrf.mxu1 }
 0x434   : > { %v2736_v34 = vadd.f32 %v2735_v48, %v2734_v20 }
 0x435   : > { %v2737_v25 = vpop.f32.mrf.mxu1 }
 0x436   : > { %v2208_v11 = vadd.f32 %v2736_v34, %v4491_v17 }
 0x437   : > { %v2738_v59 = vpop.f32.mrf.mxu1 }
 0x438   : > { %v2651_v1 = vpack.c.bf16 %v2208_v11, %v2205_v39  ;;  %v2739_v52 = vadd.f32 %v2738_v59, %v2737_v25 }
 0x439   : > { %v2740_v21 = vpop.f32.mrf.mxu1 }
 0x43a   : > { %2670 = vst [vmem:[%s4496_s12 + $0x38] sm:$0xff] %v2651_v1   ;;  %v2213_v16 = vadd.f32 %v2739_v52, %v4491_v17 }
 0x43b   : > { %v2741_v4 = vpop.f32.mrf.mxu1 }
 0x43c   : > { %v2742_v28 = vadd.f32 %v2741_v4, %v2740_v21 }
 0x43d   : > { %v2743_v18 = vpop.f32.mrf.mxu1 }
 0x43e   : > { %v2216_v45 = vadd.f32 %v2742_v28, %v4491_v17 }
 0x43f   : > { %v2744_v6 = vpop.f32.mrf.mxu1 }
 0x440   : > { %v2656_v19 = vpack.c.bf16 %v2216_v45, %v2213_v16  ;;  %v2745_v42 = vadd.f32 %v2744_v6, %v2743_v18 }
 0x441   : > { %v2746_v26 = vpop.f32.mrf.mxu1 }
 0x442   : > { %2671 = vst [vmem:[%s4496_s12 + $0x40] sm:$0xff] %v2656_v19   ;;  %v2221_v31 = vadd.f32 %v2745_v42, %v4491_v17 }
 0x443   : > { %v2747_v15 = vpop.f32.mrf.mxu1 }
 0x444   : > { %v2748_v38 = vadd.f32 %v2747_v15, %v2746_v26 }
 0x446   : > { %v2224_v0 = vadd.f32 %v2748_v38, %v4491_v17 }
 0x448   : > { %v2661_v51 = vpack.c.bf16 %v2224_v0, %v2221_v31 }
 0x44a   : > { %2672 = vst [vmem:[%s4496_s12 + $0x48] sm:$0xff] %v2661_v51  }
 0x44b   : > { %3268 = shalt.err (!%p3265_p5)
}
 0x44c   : > { %s3269_s8 = scalar_lea.hbm %s4530_s14, 1280  ;;  %s3273_s10 = scalar_lea.hbm %s4582_s6, 2560 }
 0x44d   : > { %p3270_p6 = scmp.ne.s32.totalorder %s4530_s14, %s3269_s8  ;;  %p3274_p1 = scmp.lt.s32.totalorder %s4530_s14, %s4582_s6 }
 0x44e   : > { %p3275_p11 = scmp.lt.s32.totalorder %s3273_s10, %s3269_s8 }
 0x44f   : > { %p3271_p4 = pnand %p3270_p6, %p4652_p12 }
 0x450   : > { %p3276_p0 = por %p3275_p11, %p3274_p1 }
 0x451   : > { %p3272_p8 = pneg %p3271_p4 }
 0x453   : > { %p3277_p2 = pnand %p3276_p0, %p3272_p8 }
 0x455   : > { %3280 = shalt.err (!%p3277_p2)
}
 0x456   : > { %s3339_s7 = smov 64   ;;  %s3340_s16 = smov 4  }
 0x457   : > { %2786 = dma.vmem_to_hbm [thread:$0]  (%p4652_p12), %s4532_s19, 1280, %s4530_s14, %s2328_s15, %s3339_s7, %s3339_s7, %s3340_s16  }
 0x458 PF: > { %s2356_s25 = sand.u32 1, %s3315_s21   ;;  %p4653_p10 = scmp.ne.s32.totalorder %s4606_s28, 0 }
 0x459   : > { %p4654_p7 = scmp.ge.s32.totalorder %s3327_s24, 2  ;;  %s2357_s20 = scalar_lea.sflag [#allocation4], %s2356_s25 }
 0x45b   : > { %p2806_p9 = pnand %p4654_p7, %p4653_p10 }
 0x45d   : > { %p2807_p13 = pneg %p2806_p9 }
 0x45f   : > { %3310 = dma.done.wait (%p2807_p13), %s2357_s20, 1280  }
 0x460   : > { %3312 = vsyncadd (%p2807_p13), %s2357_s20, 4294966016  ;;  %p21_p3 = scmp.ge.s32.totalorder %s3470_s18, 4   ;;  %s4655_s21 = smov %s3319_s22 }
 0x461   : > { %s4656_s22 = smov %s3323_s23  ;;  %s4657_s23 = smov %s3479_s26 }
 0x462   : > { %s4658_s24 = smov %s3470_s18  ;;  %23 = sbr.rel (!%p21_p3) target bundleno = 7 (0x7), region = 107 }
 0x467   :  { %2362 = vsyncpa [#allocation3], 1 }
 0x468   :  { %2364 = vsyncpa [#allocation3 + $0x1], 1 }
 0x469   :  { %2365 = vsyncpa [#allocation6], 1 }
 0x46a   :  { %2366 = vsyncpa [#allocation9], 1 }
 0x46b   :  { %2367 = vsyncpa [#allocation4], 1 }
 0x46c   :  { %2369 = vsyncpa [#allocation4 + $0x1], 1 }

// kernel: _forward_padded.1
= control target key start
LH: loop header
LB: loop body
LE: loop exit
PB: predicated region body
PF: predicated region fallthrough
CT: control target
= control target key end

     0   :  { %11 = vsyncpa [#allocation3], 0  ;;  %s4576_s0 = inlined_call_operand.hbm [shape: bf16[320,256], index: 0, kind: input, shape index: {}]   ;;  %s4577_s1 = inlined_call_operand.hbm [shape: bf16[256,256], index: 1, kind: input, shape index: {}]   ;;  %s4578_s2 = inlined_call_operand.hbm [shape: f32[8,256], index: 2, kind: input, shape index: {}]   ;;  %s4579_s3 = inlined_call_operand.hbm [shape: bf16[256,256], index: 3, kind: input, shape index: {}]   ;;  %s4580_s4 = inlined_call_operand.hbm [shape: bf16[256,128], index: 4, kind: input, shape index: {}]   ;;  %s4581_s5 = inlined_call_operand.vmem [shape: f32[1,128], index: 5, kind: input, shape index: {}]   ;;  %s4582_s6 = inlined_call_operand.hbm [shape: bf16[320,128], index: 6, kind: output, shape index: {}]  }
   0x1   :  { %13 = vsyncpa [#allocation3 + $0x1], 0 }
   0x2   :  { %14 = vsyncpa [#allocation6], 0 }
   0x3   :  { %15 = vsyncpa [#allocation9], 0 }
   0x4   :  { %16 = vsyncpa [#allocation4], 0 }
   0x5   :  { %18 = vsyncpa [#allocation4 + $0x1], 0  ;;  %s3376_s21 = smov 0   ;;  %s3378_s22 = smov 0  }
   0x6   :  { %s3380_s23 = smov 0   ;;  %s3382_s24 = smov 0  }
   0x7 LB: > { %s3397_s25 = sadd.s32 4294967295, %s3327_s24   ;;  %s2452_s26 = sadd.s32 4294967294, %s3327_s24   ;;  %s3327_s24 = sphi %s3382_s24, %s4658_s24   ;;  %s3323_s23 = sphi %s3380_s23, %s4657_s23   ;;  %s3319_s22 = sphi %s3378_s22, %s4656_s22   ;;  %s3315_s21 = sphi %s3376_s21, %s4655_s21  }
   0x8   : > { %p44_p0 = scmp.ne.s32.totalorder %s3319_s22, %s3315_s21  ;;  %p4583_p1 = scmp.eq.s32.totalorder %s3397_s25, 0 }
   0x9   : > { %p179_p3 = scmp.eq.s32.totalorder %s2452_s26, 1  ;;  %p2453_p5 = scmp.ge.s32.totalorder %s3327_s24, 1 }
   0xa   : > { %p3406_p4 = por %p4583_p1, %p44_p0  ;;  %p186_p7 = scmp.lt.s32.totalorder %s3327_s24, 3 }
   0xb   : > { %p3411_p6 = por %p179_p3, %p44_p0  ;;  %s3329_s30 = smov [#allocation5]  }
   0xc   : > { %s4605_s27 = scalar_select %p3406_p4, 1, 0 }
   0xd   : > { %s4606_s28 = scalar_select %p3411_p6, 1, 0 }
   0xe   : > { %p3416_p8 = pnand %p2453_p5, %p186_p7  ;;  %s198_s7 = sshll.u32 %s3329_s30, 4  ;;  %s199_s7 = int_to_ptr.vmem [resolvable:$true] %s198_s7 }
   0xf   : > { %s3330_s9 = smov [#allocation8]   ;;  %s3331_s11 = smov [#allocation7]  }
  0x10   : > { %s4607_s29 = scalar_select %p3416_p8, 1, 0 }
  0x11   : > { %p2788_p9 = pneg %p3416_p8  ;;  %s222_s10 = sshll.u32 %s3330_s9, 4  ;;  %s223_s10 = int_to_ptr.vmem [resolvable:$true] %s222_s10 }
  0x12   : > { %s212_s12 = sshll.u32 %s3331_s11, 4  ;;  %s3134_s13 = scalar_lea.vmem %s199_s7, 4096  ;;  %s213_s12 = int_to_ptr.vmem [resolvable:$true] %s212_s12 }
  0x13   : > { %p3425_p11 = pnand %p2788_p9, %p4583_p1  ;;  %p3135_p13 = scmp.ne.s32.totalorder %s199_s7, %s3134_s13 }
  0x14   : > { %p3142_p5 = scmp.lt.s32.totalorder %s199_s7, %s199_s7  ;;  %p3143_p7 = scmp.lt.s32.totalorder %s3134_s13, %s3134_s13 }
  0x15   : > { %p3125_p12 = pneg %p3425_p11 }
  0x16   : > { %p3144_p9 = por %p3143_p7, %p3142_p5 }
  0x17   : > { %p3137_p0 = pnand %p3135_p13, %p3125_p12 }
  0x19   : > { %p3138_p3 = pneg %p3137_p0 }
  0x1b   : > { %p3145_p10 = pnand %p3144_p9, %p3138_p3 }
  0x1d   : > { %3148 = shalt.err (!%p3145_p10)
}
  0x1e   : > { %s4584_s14 = smov 128   ;;  %s4585_s15 = smov 8  }
  0x1f   : > { %2791 = dma.hbm_to_vmem [thread:$0]  (!%p3425_p11), %s4577_s1, 4096, %s199_s7, [#allocation6], %s4584_s14, %s4584_s14, %s4585_s15  }
  0x20   : > { %s3160_s18 = scalar_lea.vmem %s223_s10, 4096  ;;  %p3168_p3 = scmp.lt.s32.totalorder %s223_s10, %s223_s10 }
  0x21   : > { %p3161_p13 = scmp.ne.s32.totalorder %s223_s10, %s3160_s18  ;;  %p3169_p10 = scmp.lt.s32.totalorder %s3160_s18, %s3160_s18 }
  0x23   : > { %p3163_p0 = pnand %p3161_p13, %p3125_p12  ;;  %p3170_p7 = por %p3169_p10, %p3168_p3 }
  0x25   : > { %p3164_p5 = pneg %p3163_p0 }
  0x27   : > { %p3171_p9 = pnand %p3170_p7, %p3164_p5 }
  0x29   : > { %3174 = shalt.err (!%p3171_p9)
}
  0x2a   : > { %2797 = dma.hbm_to_vmem [thread:$0]  (!%p3425_p11), %s4579_s3, 4096, %s223_s10, [#allocation9], %s4584_s14, %s4584_s14, %s4585_s15  }
  0x2b   : > { %s3186_s26 = scalar_lea.vmem %s213_s12, 256  ;;  %p3194_p3 = scmp.lt.s32.totalorder %s213_s12, %s213_s12 }
  0x2c   : > { %p3187_p1 = scmp.ne.s32.totalorder %s213_s12, %s3186_s26  ;;  %p3195_p5 = scmp.lt.s32.totalorder %s3186_s26, %s3186_s26 }
  0x2e   : > { %p3189_p13 = pnand %p3187_p1, %p3125_p12  ;;  %p3196_p10 = por %p3195_p5, %p3194_p3 }
  0x30   : > { %p3190_p0 = pneg %p3189_p13 }
  0x32   : > { %p3197_p7 = pnand %p3196_p10, %p3190_p0 }
  0x34   : > { %3200 = shalt.err (!%p3197_p7)
}
  0x35   : > { %2794 = dma.hbm_to_vmem [thread:$0]  (!%p3425_p11), %s4578_s2, 256, %s213_s12, [#allocation6]  }
  0x36   : > { %s3334_s9 = smov [#allocation10]  }
  0x37   : > { %s235_s10 = sshll.u32 %s3334_s9, 4  ;;  %s236_s10 = int_to_ptr.vmem [resolvable:$true] %s235_s10 }
  0x38   : > { %s3212_s11 = scalar_lea.vmem %s236_s10, 2048  ;;  %p3220_p2 = scmp.lt.s32.totalorder %s236_s10, %s236_s10 }
  0x39   : > { %p3213_p9 = scmp.ne.s32.totalorder %s236_s10, %s3212_s11  ;;  %p3221_p3 = scmp.lt.s32.totalorder %s3212_s11, %s3212_s11 }
  0x3b   : > { %p3215_p1 = pnand %p3213_p9, %p3125_p12  ;;  %p3222_p0 = por %p3221_p3, %p3220_p2 }
  0x3d   : > { %p3216_p13 = pneg %p3215_p1 }
  0x3f   : > { %p3223_p5 = pnand %p3222_p0, %p3216_p13 }
  0x41   : > { %3226 = shalt.err (!%p3223_p5)
}
  0x42   : > { %s3335_s13 = smov 64   ;;  %s3336_s12 = smov 4  }
  0x43   : > { %2800 = dma.hbm_to_vmem [thread:$0]  (!%p3425_p11), %s4580_s4, 2048, %s236_s10, [#allocation9], %s3335_s13, %s3335_s13, %s3336_s12  }
  0x44   : > { %s3470_s18 = sadd.s32 1, %s3327_s24   ;;  %s31_s20 = sadd.s32 1, %s3323_s23 }
  0x45   : > { %s28_s19 = ssub.s32 %s3327_s24, %s3470_s18  ;;  %p38_p12 = scmp.ne.s32.totalorder %s3323_s23, %s3319_s22 }
  0x46   : > { %p29_p2 = scmp.eq.s32.totalorder %s28_s19, 0  ;;  %p39_p10 = scmp.eq.s32.totalorder %s3327_s24, 0 }
  0x47   : > { %p4609_p9 = scmp.eq.s32.totalorder %s3397_s25, 1  ;;  %p2813_p13 = scmp.lt.s32.totalorder %s3327_s24, 2 }
  0x48   : > { %s3479_s26 = scalar_select %p29_p2, %s3323_s23, %s31_s20  }
  0x49   : > { %p40_p7 = por %p39_p10, %p38_p12  ;;  %p3483_p1 = por %p4609_p9, %p38_p12 }
  0x4a   : > { %s252_s8 = sand.u32 1, %s3323_s23   ;;  %s2663_s9 = smul.u32 2560, %s3327_s24 }
  0x4b   : > { %s4610_s30 = scalar_select %p3483_p1, 1, 0 }
  0x4c   : > { %s2765_s7 = smul.u32 160, %s252_s8  ;;  %p3490_p11 = pnand %p2813_p13, %p40_p7 }
  0x4d   : > { %s3497_s12 = scalar_lea.hbm %s4576_s0, %s2663_s9  ;;  %s3501_s19 = scalar_lea.sflag [#allocation3], %s252_s8 }
  0x4e   : > { %s256_s16 = scalar_lea.vmem [#allocation2], %s2765_s7  ;;  %s3227_s20 = scalar_lea.hbm %s3497_s12, 2560 }
  0x4f   : > { %s264_s17 = sshll.u32 %s256_s16, 4  ;;  %p3228_p3 = scmp.ne.s32.totalorder %s3497_s12, %s3227_s20  ;;  %s3499_s17 = int_to_ptr.vmem [resolvable:$true] %s264_s17 }
  0x50   : > { %p3229_p0 = pneg %p3490_p11  ;;  %s3232_s9 = scalar_lea.hbm %s4576_s0, 5120 }
  0x51   : > { %p3233_p12 = scmp.lt.s32.totalorder %s3497_s12, %s4576_s0  ;;  %p3234_p10 = scmp.lt.s32.totalorder %s3232_s9, %s3227_s20 }
  0x52   : > { %p3230_p5 = pnand %p3229_p0, %p3228_p3 }
  0x53   : > { %p3235_p7 = por %p3234_p10, %p3233_p12 }
  0x54   : > { %p3231_p2 = pneg %p3230_p5 }
  0x56   : > { %p3236_p9 = pnand %p3235_p7, %p3231_p2 }
  0x58   : > { %3239 = shalt.err (!%p3236_p9)
}
  0x59   : > { %s3240_s8 = scalar_lea.vmem %s3499_s17, 2560  ;;  %s3337_s7 = smov [#allocation2]  }
  0x5a   : > { %p3241_p13 = scmp.ne.s32.totalorder %s3499_s17, %s3240_s8  ;;  %s3245_s16 = sshll.u32 %s3337_s7, 4  ;;  %s3246_s16 = int_to_ptr.vmem [resolvable:$false] %s3245_s16 }
  0x5b   : > { %s3247_s14 = scalar_lea.vmem %s3246_s16, 5120  ;;  %p3248_p5 = scmp.lt.s32.totalorder %s3499_s17, %s3246_s16 }
  0x5c   : > { %p3243_p6 = pnand %p3241_p13, %p3229_p0  ;;  %p3249_p1 = scmp.lt.s32.totalorder %s3247_s14, %s3240_s8 }
  0x5e   : > { %p3244_p3 = pneg %p3243_p6  ;;  %p3250_p4 = por %p3249_p1, %p3248_p5 }
  0x60   : > { %p3251_p8 = pnand %p3250_p4, %p3244_p3 }
  0x62   : > { %3254 = shalt.err (!%p3251_p8)
}
  0x63   : > { %s4612_s15 = smov 8   ;;  %s4613_s20 = smov 128  }
  0x64   : > { %2804 = dma.hbm_to_vmem [thread:$0]  (!%p3490_p11), %s3497_s12, 2560, %s3499_s17, %s3501_s19, %s4613_s20, %s4613_s20, %s4612_s15  }
  0x65   : > { %p4614_p6 = scmp.ne.s32.totalorder %s4607_s29, 0 }
  0x67   : > { %276 = sbr.rel (%p4614_p6) target bundleno = 1112 (0x458), region = 44 }
  0x6c   : > { %s3528_s11 = sand.u32 1, %s3319_s22   ;;  %p4615_p4 = scmp.ne.s32.totalorder %s4605_s27, 0 }
  0x6d   : > { %s2766_s9 = smul.u32 160, %s3528_s11  ;;  %s279_s13 = scalar_lea.sflag [#allocation3], %s3528_s11 }
  0x6f   : > { %s3532_s8 = scalar_lea.vmem [#allocation2], %s2766_s9 }
  0x70   : > { %3298 = dma.done.wait (%p4615_p4), %s279_s13, 2560  }
  0x71   : > { %3300 = vsyncadd (%p4615_p4), %s279_s13, 4294964736  ;;  %p4616_p8 = scmp.eq.s32.totalorder %s3397_s25, 0 }
  0x73   : > { %3302 = dma.done.wait (%p4616_p8), [#allocation6], 4352   ;;  %p4617_p1 = pmov %p4616_p8 }
  0x75   : > { %3304 = vsyncadd (%p4617_p1), [#allocation6], 4294962944  ;;  %p4618_p11 = pmov %p4617_p1 }
  0x76   : > { %p4619_p0 = pmov %p4617_p1 }
  0x77   : > { %3306 = dma.done.wait (%p4618_p11), [#allocation9], 6144  }
  0x78   : > { %3308 = vsyncadd (%p4619_p0), [#allocation9], 4294961152  ;;  %v2861_v0 = vld [vmem:[#allocation5 + $0x74] ss:$8 sps:$4 sm:$0xff]   ;;  %v2863_v1 = vld [vmem:[#allocation5 + $0x70] ss:$8 sps:$4 sm:$0xff]   ;;  %v384_v52 = vlaneseq }
  0x79   : > { %654 = vmatprep.subr.bf16.mxu0 %v2861_v0  ;;  %v2864_v2 = vld [vmem:[#allocation5 + $0x64] ss:$8 sps:$4 sm:$0xff]   ;;  %v2866_v3 = vld [vmem:[#allocation5 + $0x60] ss:$8 sps:$4 sm:$0xff]   ;;  %v2867_v4 = vld [vmem:[#allocation5 + $0x54] ss:$8 sps:$4 sm:$0xff]  }
  0x7a   : > { %655 = vmatpush1.bf16.msra.mxu0 %v2863_v1  ;;  %v2869_v5 = vld [vmem:[#allocation5 + $0x50] ss:$8 sps:$4 sm:$0xff]   ;;  %v2870_v6 = vld [vmem:[#allocation5 + $0x44] ss:$8 sps:$4 sm:$0xff]   ;;  %v2872_v7 = vld [vmem:[#allocation5 + $0x40] ss:$8 sps:$4 sm:$0xff]  }
  0x7b   : > { %656 = vmatprep.subr.bf16.mxu0 %v2864_v2  ;;  %v2873_v8 = vld [vmem:[#allocation5 + $0x34] ss:$8 sps:$4 sm:$0xff]   ;;  %v2875_v9 = vld [vmem:[#allocation5 + $0x30] ss:$8 sps:$4 sm:$0xff]   ;;  %v2876_v10 = vld [vmem:[#allocation5 + $0x24] ss:$8 sps:$4 sm:$0xff]  }
  0x7c   : > { %v2878_v11 = vld [vmem:[#allocation5 + $0x20] ss:$8 sps:$4 sm:$0xff]   ;;  %v2879_v12 = vld [vmem:[#allocation5 + $0x14] ss:$8 sps:$4 sm:$0xff]   ;;  %v2911_v13 = vld [vmem:[%s3532_s8 + $0x4] ss:$8 sps:$4 sm:$0xff]  }
  0x7d   : > { %v2881_v14 = vld [vmem:[#allocation5 + $0x10] ss:$8 sps:$4 sm:$0xff]   ;;  %v2882_v15 = vld [vmem:[#allocation5 + $0x4] ss:$8 sps:$4 sm:$0xff]   ;;  %686 = vmatprep.mubr.bf16.mxu0 %v2911_v13  ;;  %v2884_v16 = vld [vmem:[#allocation5] ss:$8 sps:$4 sm:$0xff]  }
  0x7e   : > { %657 = vmatpush1.bf16.msra.mxu0 %v2866_v3  ;;  %v2885_v17 = vld [vmem:[#allocation5 + $0xf4] ss:$8 sps:$4 sm:$0xff]   ;;  %v2887_v18 = vld [vmem:[#allocation5 + $0xf0] ss:$8 sps:$4 sm:$0xff]   ;;  %v2888_v19 = vld [vmem:[#allocation5 + $0xe4] ss:$8 sps:$4 sm:$0xff]  }
  0x7f   : > { %658 = vmatprep.subr.bf16.mxu0 %v2867_v4  ;;  %v2890_v20 = vld [vmem:[#allocation5 + $0xe0] ss:$8 sps:$4 sm:$0xff]   ;;  %v2891_v21 = vld [vmem:[#allocation5 + $0xd4] ss:$8 sps:$4 sm:$0xff]   ;;  %v2893_v22 = vld [vmem:[#allocation5 + $0xd0] ss:$8 sps:$4 sm:$0xff]  }
  0x80   : > { %v2894_v23 = vld [vmem:[#allocation5 + $0xc4] ss:$8 sps:$4 sm:$0xff]   ;;  %v2896_v24 = vld [vmem:[#allocation5 + $0xc0] ss:$8 sps:$4 sm:$0xff]   ;;  %v2897_v25 = vld [vmem:[#allocation5 + $0xb4] ss:$8 sps:$4 sm:$0xff]  }
  0x81   : > { %v2899_v26 = vld [vmem:[#allocation5 + $0xb0] ss:$8 sps:$4 sm:$0xff]   ;;  %v2900_v27 = vld [vmem:[#allocation5 + $0xa4] ss:$8 sps:$4 sm:$0xff]   ;;  %v2902_v28 = vld [vmem:[#allocation5 + $0xa0] ss:$8 sps:$4 sm:$0xff]  }
  0x82   : > { %659 = vmatpush1.bf16.msra.mxu0 %v2869_v5  ;;  %v2903_v29 = vld [vmem:[#allocation5 + $0x94] ss:$8 sps:$4 sm:$0xff]   ;;  %v2905_v30 = vld [vmem:[#allocation5 + $0x90] ss:$8 sps:$4 sm:$0xff]   ;;  %v2906_v31 = vld [vmem:[#allocation5 + $0x84] ss:$8 sps:$4 sm:$0xff]  }
  0x83   : > { %660 = vmatprep.subr.bf16.mxu0 %v2870_v6  ;;  %v2908_v32 = vld [vmem:[#allocation5 + $0x80] ss:$8 sps:$4 sm:$0xff]   ;;  %v2912_v34 = vld [vmem:[%s3532_s8 + $0x14] ss:$8 sps:$4 sm:$0xff]   ;;  %v2914_v35 = vld [vmem:[%s3532_s8 + $0x10] ss:$8 sps:$4 sm:$0xff]  }
  0x84   : > { %v2909_v33 = vld [vmem:[%s3532_s8] ss:$8 sps:$4 sm:$0xff]   ;;  %v2915_v36 = vld [vmem:[%s3532_s8 + $0x24] ss:$8 sps:$4 sm:$0xff]   ;;  %v2918_v38 = vld [vmem:[%s3532_s8 + $0x34] ss:$8 sps:$4 sm:$0xff]  }
  0x85   : > { %v2917_v37 = vld [vmem:[%s3532_s8 + $0x20] ss:$8 sps:$4 sm:$0xff]   ;;  %v2920_v39 = vld [vmem:[%s3532_s8 + $0x30] ss:$8 sps:$4 sm:$0xff]   ;;  %v2921_v40 = vld [vmem:[%s3532_s8 + $0x44] ss:$8 sps:$4 sm:$0xff]  }
  0x86   : > { %661 = vmatpush1.bf16.msra.mxu0 %v2872_v7  ;;  %v2923_v41 = vld [vmem:[%s3532_s8 + $0x40] ss:$8 sps:$4 sm:$0xff]   ;;  %v2924_v42 = vld [vmem:[%s3532_s8 + $0x54] ss:$8 sps:$4 sm:$0xff]   ;;  %v2926_v43 = vld [vmem:[%s3532_s8 + $0x50] ss:$8 sps:$4 sm:$0xff]  }
  0x87   : > { %662 = vmatprep.subr.bf16.mxu0 %v2873_v8  ;;  %v2927_v44 = vld [vmem:[%s3532_s8 + $0x64] ss:$8 sps:$4 sm:$0xff]   ;;  %v2929_v45 = vld [vmem:[%s3532_s8 + $0x60] ss:$8 sps:$4 sm:$0xff]   ;;  %v2930_v46 = vld [vmem:[%s3532_s8 + $0x74] ss:$8 sps:$4 sm:$0xff]  }
  0x88   : > { %v2932_v47 = vld [vmem:[%s3532_s8 + $0x70] ss:$8 sps:$4 sm:$0xff]   ;;  %v2933_v48 = vld [vmem:[%s3532_s8 + $0x84] ss:$8 sps:$4 sm:$0xff]   ;;  %v2935_v49 = vld [vmem:[%s3532_s8 + $0x80] ss:$8 sps:$4 sm:$0xff]  }
  0x89   : > { %v2936_v50 = vld [vmem:[%s3532_s8 + $0x94] ss:$8 sps:$4 sm:$0xff]   ;;  %v2938_v51 = vld [vmem:[%s3532_s8 + $0x90] ss:$8 sps:$4 sm:$0xff]   ;;  %v385_v53 = vshrl.u32 %v384_v52, 7  ;;  %s2767_s10 = smul.u32 80, %s3528_s11 }
  0x8a   : > { %663 = vmatpush1.bf16.msra.mxu0 %v2875_v9  ;;  %v382_v55 = vld [vmem:[#allocation7] ss:$8 sm:$0x3]  ;;  %s2612_s17 = smul.u32 1280, %s3397_s25  ;;  %s2328_s15 = scalar_lea.sflag [#allocation4], %s3528_s11 }
  0x8b   : > { %664 = vmatprep.subr.bf16.mxu0 %v2876_v10  ;;  %v3566_v54 = vsub.s32 0, %v385_v53  ;;  %v3568_v56 = vsub.s32 1, %v385_v53  ;;  %s4496_s12 = scalar_lea.vmem [#allocation11], %s2767_s10  ;;  %p4652_p12 = scmp.ne.s32.totalorder %s4610_s30, 0 }
  0x8c   : > { %s2341_s19 = sshll.u32 %s4496_s12, 4  ;;  %s4530_s14 = scalar_lea.hbm %s4582_s6, %s2612_s17  ;;  %s4532_s19 = int_to_ptr.vmem [resolvable:$true] %s2341_s19 }
  0x8d   : > { %v3571_v57 = vrot.slane %v382_v55, %v3566_v54  ;;  %v3574_v58 = vrot.slane %v382_v55, %v3568_v56  ;;  %s3255_s25 = scalar_lea.vmem %s4532_s19, 1280  ;;  %s3338_s20 = smov [#allocation11]  }
  0x8e   : > { %665 = vmatpush1.bf16.msra.mxu0 %v2878_v11  ;;  %p3256_p2 = scmp.ne.s32.totalorder %s4532_s19, %s3255_s25  ;;  %s3259_s9 = sshll.u32 %s3338_s20, 4  ;;  %s3260_s9 = int_to_ptr.vmem [resolvable:$false] %s3259_s9 }
  0x8f   : > { %666 = vmatprep.subr.bf16.mxu0 %v2879_v12  ;;  %s3261_s13 = scalar_lea.vmem %s3260_s9, 2560  ;;  %p3262_p9 = scmp.lt.s32.totalorder %s4532_s19, %s3260_s9 }
  0x90   : > { %p3257_p10 = pnand %p3256_p2, %p4652_p12  ;;  %p3263_p13 = scmp.lt.s32.totalorder %s3261_s13, %s3255_s25 }
  0x92   : > { %667 = vmatpush1.bf16.msra.mxu0 %v2881_v14  ;;  %p3258_p7 = pneg %p3257_p10  ;;  %p3264_p3 = por %p3263_p13, %p3262_p9 }
  0x93   : > { %668 = vmatprep.subr.bf16.mxu0 %v2882_v15 }
  0x94   : > { %p3265_p5 = pnand %p3264_p3, %p3258_p7 }
  0x96   : > { %669 = vmatpush1.bf16.msra.mxu0 %v2884_v16 }
  0x97   : > { %670 = vmatprep.subr.bf16.mxu0 %v2885_v17 }
  0x9a   : > { %671 = vmatpush2.bf16.msra.mxu0 %v2887_v18 }
  0x9b   : > { %672 = vmatprep.subr.bf16.mxu0 %v2888_v19 }
  0x9e   : > { %673 = vmatpush2.bf16.msra.mxu0 %v2890_v20 }
  0x9f   : > { %674 = vmatprep.subr.bf16.mxu0 %v2891_v21 }
  0xa2   : > { %675 = vmatpush2.bf16.msra.mxu0 %v2893_v22 }
  0xa3   : > { %676 = vmatprep.subr.bf16.mxu0 %v2894_v23 }
  0xa6   : > { %677 = vmatpush2.bf16.msra.mxu0 %v2896_v24 }
  0xa7   : > { %678 = vmatprep.subr.bf16.mxu0 %v2897_v25 }
  0xaa   : > { %679 = vmatpush2.bf16.msra.mxu0 %v2899_v26 }
  0xab   : > { %680 = vmatprep.subr.bf16.mxu0 %v2900_v27 }
  0xae   : > { %681 = vmatpush2.bf16.msra.mxu0 %v2902_v28 }
  0xaf   : > { %682 = vmatprep.subr.bf16.mxu0 %v2903_v29 }
  0xb2   : > { %683 = vmatpush2.bf16.msra.mxu0 %v2905_v30 }
  0xb3   : > { %684 = vmatprep.subr.bf16.mxu0 %v2906_v31 }
  0xb6   : > { %685 = vmatpush2.bf16.msra.mxu0 %v2908_v32 }
  0xb9   : > { %687 = vmatmul.mubr.bf16.vlgmr.msra.gmra.mxu0 %v2909_v33 }
  0xba   : > { %696 = vmatprep.mubr.bf16.mxu0 %v2912_v34 }
  0xc1   : > { %697 = vmatmul.mubr.bf16.gmra.mxu0 %v2914_v35 }
  0xc2   : > { %706 = vmatprep.mubr.bf16.mxu0 %v2915_v36 }
  0xc9   : > { %707 = vmatmul.mubr.bf16.gmra.mxu0 %v2917_v37 }
  0xca   : > { %716 = vmatprep.mubr.bf16.mxu0 %v2918_v38 }
  0xd1   : > { %717 = vmatmul.mubr.bf16.gmra.mxu0 %v2920_v39 }
  0xd2   : > { %726 = vmatprep.mubr.bf16.mxu0 %v2921_v40 }
  0xd9   : > { %727 = vmatmul.mubr.bf16.gmra.mxu0 %v2923_v41 }
  0xda   : > { %736 = vmatprep.mubr.bf16.mxu0 %v2924_v42 }
  0xe1   : > { %737 = vmatmul.mubr.bf16.gmra.mxu0 %v2926_v43 }
  0xe2   : > { %746 = vmatprep.mubr.bf16.mxu0 %v2927_v44 }
  0xe9   : > { %747 = vmatmul.mubr.bf16.gmra.mxu0 %v2929_v45 }
  0xea   : > { %756 = vmatprep.mubr.bf16.mxu0 %v2930_v46 }
  0xf1   : > { %757 = vmatmul.mubr.bf16.gmra.mxu0 %v2932_v47  ;;  %v2939_v47 = vld [vmem:[#allocation8 + $0x74] ss:$8 sps:$4 sm:$0xff]  }
  0xf2   : > { %766 = vmatprep.mubr.bf16.mxu0 %v2933_v48  ;;  %v2941_v48 = vld [vmem:[#allocation8 + $0x70] ss:$8 sps:$4 sm:$0xff]   ;;  %1826 = vmatprep.subr.bf16.mxu1 %v2939_v47  ;;  %v2950_v47 = vld [vmem:[#allocation8 + $0x40] ss:$8 sps:$4 sm:$0xff]  }
  0xf3   : > { %1827 = vmatpush1.bf16.msra.mxu1 %v2941_v48 }
  0xf9   : > { %767 = vmatmul.mubr.bf16.gmra.mxu0 %v2935_v49  ;;  %v2942_v49 = vld [vmem:[#allocation8 + $0x64] ss:$8 sps:$4 sm:$0xff]  }
  0xfa   : > { %776 = vmatprep.mubr.bf16.mxu0 %v2936_v50  ;;  %1828 = vmatprep.subr.bf16.mxu1 %v2942_v49 }
 0x101   : > { %777 = vmatmul.mubr.bf16.gmra.mxu0 %v2938_v51 }
 0x179   : > { %v688_v59 = vpop.f32.mrf.mxu0 }
 0x17a   : > { %v3577_v60 = vadd.f32 %v688_v59, %v3571_v57 }
 0x17b   : > { %v690_v61 = vpop.f32.mrf.mxu0 }
 0x17c   : > { %v787_v62 = vmul.f32 %v3577_v60, %v3577_v60  ;;  %v3582_v63 = vadd.f32 %v690_v61, %v3574_v58 }
 0x17d   : > { %v692_v0 = vpop.f32.mrf.mxu0 }
 0x17e   : > { %v827_v1 = vmul.f32 %v787_v62, %v3577_v60  ;;  %v788_v2 = vmul.f32 %v3582_v63, %v3582_v63  ;;  %v3588_v3 = vadd.f32 %v692_v0, %v3571_v57 }
 0x17f   : > { %v694_v4 = vpop.f32.mrf.mxu0 }
 0x180   : > { %v867_v5 = vmul.f32 0.044715, %v827_v1  ;;  %v828_v6 = vmul.f32 %v788_v2, %v3582_v63  ;;  %v789_v7 = vmul.f32 %v3588_v3, %v3588_v3  ;;  %v3594_v8 = vadd.f32 %v694_v4, %v3574_v58  ;;  %v2944_v4 = vld [vmem:[#allocation8 + $0x60] ss:$8 sps:$4 sm:$0xff]  }
 0x181   : > { %v698_v9 = vpop.f32.mrf.mxu0  ;;  %1829 = vmatpush1.bf16.msra.mxu1 %v2944_v4 }
 0x182   : > { %v907_v10 = vadd.f32 %v867_v5, %v3577_v60  ;;  %v868_v11 = vmul.f32 0.044715, %v828_v6  ;;  %v829_v12 = vmul.f32 %v789_v7, %v3588_v3  ;;  %v790_v13 = vmul.f32 %v3594_v8, %v3594_v8 }
 0x183   : > { %v3601_v14 = vadd.f32 %v698_v9, %v3571_v57  ;;  %v700_v15 = vpop.f32.mrf.mxu0 }
 0x184   : > { %v947_v16 = vmul.f32 0.7978846, %v907_v10  ;;  %v908_v17 = vadd.f32 %v868_v11, %v3582_v63  ;;  %v869_v18 = vmul.f32 0.044715, %v829_v12  ;;  %v830_v19 = vmul.f32 %v790_v13, %v3594_v8  ;;  %v2945_v10 = vld [vmem:[#allocation8 + $0x54] ss:$8 sps:$4 sm:$0xff]  }
 0x185   : > { %v791_v20 = vmul.f32 %v3601_v14, %v3601_v14  ;;  %v3608_v21 = vadd.f32 %v700_v15, %v3574_v58  ;;  %v702_v22 = vpop.f32.mrf.mxu0  ;;  %1830 = vmatprep.subr.bf16.mxu1 %v2945_v10 }
 0x186   : > { %3003 = vtanh.f32 %v947_v16  ;;  %v948_v23 = vmul.f32 0.7978846, %v908_v17  ;;  %v909_v24 = vadd.f32 %v869_v18, %v3588_v3  ;;  %v870_v25 = vmul.f32 0.044715, %v830_v19 }
 0x187   : > { %v831_v26 = vmul.f32 %v791_v20, %v3601_v14  ;;  %v792_v27 = vmul.f32 %v3608_v21, %v3608_v21  ;;  %v3615_v28 = vadd.f32 %v702_v22, %v3571_v57  ;;  %v704_v29 = vpop.f32.mrf.mxu0 }
 0x188   : > { %3005 = vtanh.f32 %v948_v23  ;;  %v949_v30 = vmul.f32 0.7978846, %v909_v24  ;;  %v910_v31 = vadd.f32 %v870_v25, %v3594_v8  ;;  %v3619_v32 = vadd.f32 %v704_v29, %v3574_v58  ;;  %v2947_v24 = vld [vmem:[#allocation8 + $0x50] ss:$8 sps:$4 sm:$0xff]   ;;  %v2948_v29 = vld [vmem:[#allocation8 + $0x44] ss:$8 sps:$4 sm:$0xff]  }
 0x189   : > { %v871_v33 = vmul.f32 0.044715, %v831_v26  ;;  %v832_v34 = vmul.f32 %v792_v27, %v3608_v21  ;;  %v793_v35 = vmul.f32 %v3615_v28, %v3615_v28  ;;  %v708_v36 = vpop.f32.mrf.mxu0  ;;  %1831 = vmatpush1.bf16.msra.mxu1 %v2947_v24 }
 0x18a   : > { %v950_v37 = vmul.f32 0.7978846, %v910_v31  ;;  %v794_v38 = vmul.f32 %v3619_v32, %v3619_v32  ;;  %v3627_v39 = vadd.f32 %v708_v36, %v3571_v57  ;;  %3007 = vtanh.f32 %v949_v30  ;;  %1832 = vmatprep.subr.bf16.mxu1 %v2948_v29 }
 0x18b   : > { %v911_v40 = vadd.f32 %v871_v33, %v3601_v14  ;;  %v872_v41 = vmul.f32 0.044715, %v832_v34  ;;  %v833_v42 = vmul.f32 %v793_v35, %v3615_v28  ;;  %v710_v43 = vpop.f32.mrf.mxu0 }
 0x18c   : > { %v834_v44 = vmul.f32 %v794_v38, %v3619_v32  ;;  %v795_v45 = vmul.f32 %v3627_v39, %v3627_v39  ;;  %v3635_v46 = vadd.f32 %v710_v43, %v3574_v58  ;;  %3009 = vtanh.f32 %v950_v37 }
 0x18d   : > { %v951_v50 = vmul.f32 0.7978846, %v911_v40  ;;  %v912_v51 = vadd.f32 %v872_v41, %v3608_v21  ;;  %v873_v52 = vmul.f32 0.044715, %v833_v42  ;;  %v712_v53 = vpop.f32.mrf.mxu0  ;;  %1833 = vmatpush1.bf16.msra.mxu1 %v2950_v47 }
 0x18e   : > { %v874_v55 = vmul.f32 0.044715, %v834_v44  ;;  %v835_v59 = vmul.f32 %v795_v45, %v3627_v39  ;;  %v796_v61 = vmul.f32 %v3635_v46, %v3635_v46  ;;  %v3642_v62 = vadd.f32 %v712_v53, %v3571_v57 }
 0x18f   : > { %3011 = vtanh.f32 %v951_v50  ;;  %v952_v0 = vmul.f32 0.7978846, %v912_v51  ;;  %v913_v1 = vadd.f32 %v873_v52, %v3615_v28  ;;  %v714_v2 = vpop.f32.mrf.mxu0  ;;  %v2951_v51 = vld [vmem:[#allocation8 + $0x34] ss:$8 sps:$4 sm:$0xff]  }
 0x190   : > { %v914_v5 = vadd.f32 %v874_v55, %v3619_v32  ;;  %v875_v6 = vmul.f32 0.044715, %v835_v59  ;;  %v836_v7 = vmul.f32 %v796_v61, %v3635_v46  ;;  %v797_v9 = vmul.f32 %v3642_v62, %v3642_v62  ;;  %1834 = vmatprep.subr.bf16.mxu1 %v2951_v51 }
 0x191   : > { %3013 = vtanh.f32 %v952_v0  ;;  %v953_v11 = vmul.f32 0.7978846, %v913_v1  ;;  %v3650_v12 = vadd.f32 %v714_v2, %v3574_v58  ;;  %v718_v13 = vpop.f32.mrf.mxu0 }
 0x192   : > { %v954_v15 = vmul.f32 0.7978846, %v914_v5  ;;  %v915_v16 = vadd.f32 %v875_v6, %v3627_v39  ;;  %v876_v17 = vmul.f32 0.044715, %v836_v7  ;;  %v837_v18 = vmul.f32 %v797_v9, %v3642_v62  ;;  %v2953_v6 = vld [vmem:[#allocation8 + $0x30] ss:$8 sps:$4 sm:$0xff]  }
 0x193   : > { %v3004_v19 = vpop.eup %3003  ;;  %3015 = vtanh.f32 %v953_v11  ;;  %v798_v20 = vmul.f32 %v3650_v12, %v3650_v12  ;;  %v3657_v22 = vadd.f32 %v718_v13, %v3571_v57  ;;  %v720_v23 = vpop.f32.mrf.mxu0  ;;  %1835 = vmatpush1.bf16.msra.mxu1 %v2953_v6 }
 0x194   : > { %3017 = vtanh.f32 %v954_v15  ;;  %v955_v25 = vmul.f32 0.7978846, %v915_v16  ;;  %v916_v26 = vadd.f32 %v876_v17, %v3635_v46  ;;  %v877_v27 = vmul.f32 0.044715, %v837_v18 }
 0x195   : > { %v3006_v30 = vpop.eup %3005  ;;  %v838_v31 = vmul.f32 %v798_v20, %v3650_v12  ;;  %v799_v33 = vmul.f32 %v3657_v22, %v3657_v22  ;;  %v3664_v34 = vadd.f32 %v720_v23, %v3574_v58  ;;  %v722_v35 = vpop.f32.mrf.mxu0  ;;  %v1027_v36 = vadd.f32 1.0, %v3004_v19  ;;  %v2954_v20 = vld [vmem:[#allocation8 + $0x24] ss:$8 sps:$4 sm:$0xff]  }
 0x196   : > { %3019 = vtanh.f32 %v955_v25  ;;  %v956_v37 = vmul.f32 0.7978846, %v916_v26  ;;  %v917_v38 = vadd.f32 %v877_v27, %v3642_v62  ;;  %v3668_v40 = vadd.f32 %v722_v35, %v3571_v57  ;;  %1836 = vmatprep.subr.bf16.mxu1 %v2954_v20 }
 0x197   : > { %v878_v41 = vmul.f32 0.044715, %v838_v31  ;;  %v839_v42 = vmul.f32 %v799_v33, %v3657_v22  ;;  %v800_v43 = vmul.f32 %v3664_v34, %v3664_v34  ;;  %v724_v44 = vpop.f32.mrf.mxu0  ;;  %v1028_v45 = vadd.f32 1.0, %v3006_v30  ;;  %v3678_v52 = vpop.eup %3007 }
 0x198   : > { %3021 = vtanh.f32 %v956_v37  ;;  %v957_v48 = vmul.f32 0.7978846, %v917_v38  ;;  %v801_v49 = vmul.f32 %v3668_v40, %v3668_v40  ;;  %v3676_v50 = vadd.f32 %v724_v44, %v3574_v58 }
 0x199   : > { %v918_v53 = vadd.f32 %v878_v41, %v3650_v12  ;;  %v879_v55 = vmul.f32 0.044715, %v839_v42  ;;  %v840_v59 = vmul.f32 %v800_v43, %v3664_v34  ;;  %v728_v61 = vpop.f32.mrf.mxu0  ;;  %v1067_v0 = vmul.f32 0.5, %v1027_v36  ;;  %v3682_v1 = vpop.eup %3009 }
 0x19a   : > { %3023 = vtanh.f32 %v957_v48  ;;  %v841_v2 = vmul.f32 %v801_v49, %v3668_v40  ;;  %v802_v4 = vmul.f32 %v3676_v50, %v3676_v50  ;;  %v3688_v5 = vadd.f32 %v728_v61, %v3571_v57 }
 0x19b   : > { %v958_v7 = vmul.f32 0.7978846, %v918_v53  ;;  %v919_v9 = vadd.f32 %v879_v55, %v3657_v22  ;;  %v880_v10 = vmul.f32 0.044715, %v840_v59  ;;  %v730_v11 = vpop.f32.mrf.mxu0  ;;  %v1068_v13 = vmul.f32 0.5, %v1028_v45 }
 0x19c   : > { %v3691_v15 = vpop.eup %3011  ;;  %v881_v16 = vmul.f32 0.044715, %v841_v2  ;;  %v842_v17 = vmul.f32 %v802_v4, %v3676_v50  ;;  %v803_v18 = vmul.f32 %v3688_v5, %v3688_v5  ;;  %v3697_v19 = vadd.f32 %v730_v11, %v3574_v58  ;;  %v2956_v45 = vld [vmem:[#allocation8 + $0x20] ss:$8 sps:$4 sm:$0xff]   ;;  %v2957_v53 = vld [vmem:[#allocation8 + $0x14] ss:$8 sps:$4 sm:$0xff]  }
 0x19d   : > { %3025 = vtanh.f32 %v958_v7  ;;  %v959_v23 = vmul.f32 0.7978846, %v919_v9  ;;  %v920_v24 = vadd.f32 %v880_v10, %v3664_v34  ;;  %v732_v25 = vpop.f32.mrf.mxu0  ;;  %v3701_v26 = vmul.f32 %v1067_v0, %v3577_v60  ;;  %1837 = vmatpush1.bf16.msra.mxu1 %v2956_v45 }
 0x19e   : > { %v3703_v27 = vpop.eup %3013  ;;  %v921_v29 = vadd.f32 %v881_v16, %v3668_v40  ;;  %v882_v30 = vmul.f32 0.044715, %v842_v17  ;;  %v843_v31 = vmul.f32 %v803_v18, %v3688_v5  ;;  %v804_v33 = vmul.f32 %v3697_v19, %v3697_v19  ;;  %v2959_v16 = vld [vmem:[#allocation8 + $0x10] ss:$8 sps:$4 sm:$0xff]   ;;  %1838 = vmatprep.subr.bf16.mxu1 %v2957_v53 }
 0x19f   : > { %3027 = vtanh.f32 %v959_v23  ;;  %v960_v35 = vmul.f32 0.7978846, %v920_v24  ;;  %v3710_v36 = vadd.f32 %v732_v25, %v3571_v57  ;;  %v3713_v37 = vmul.f32 %v1068_v13, %v3582_v63  ;;  %v734_v60 = vpop.f32.mrf.mxu0 }
 0x1a0   : > { %v3715_v38 = vpop.eup %3015  ;;  %v961_v41 = vmul.f32 0.7978846, %v921_v29  ;;  %v922_v42 = vadd.f32 %v882_v30, %v3676_v50  ;;  %v883_v43 = vmul.f32 0.044715, %v843_v31  ;;  %v844_v44 = vmul.f32 %v804_v33, %v3697_v19  ;;  %v2960_v29 = vld [vmem:[#allocation8 + $0x4] ss:$8 sps:$4 sm:$0xff]  }
 0x1a1   : > { %v3719_v47 = vpop.eup %3017  ;;  %3029 = vtanh.f32 %v960_v35  ;;  %v805_v48 = vmul.f32 %v3710_v36, %v3710_v36  ;;  %v1147_v63 = vadd.f32 %v3713_v37, %v3701_v26  ;;  %v3726_v49 = vadd.f32 %v734_v60, %v3574_v58  ;;  %v738_v51 = vpop.f32.mrf.mxu0  ;;  %1839 = vmatpush1.bf16.msra.mxu1 %v2959_v16 }
 0x1a2   : > { %3031 = vtanh.f32 %v961_v41  ;;  %v962_v55 = vmul.f32 0.7978846, %v922_v42  ;;  %v923_v59 = vadd.f32 %v883_v43, %v3688_v5  ;;  %v884_v61 = vmul.f32 0.044715, %v844_v44  ;;  %1840 = vmatprep.subr.bf16.mxu1 %v2960_v29 }
 0x1a3   : > { %v3729_v0 = vpop.eup %3019  ;;  %v845_v2 = vmul.f32 %v805_v48, %v3710_v36  ;;  %1148 = vadd.xlane.f32.xlu0 %v1147_v63  ;;  %v806_v4 = vmul.f32 %v3726_v49, %v3726_v49  ;;  %v1228_v6 = vmul.f32 %v3701_v26, %v3701_v26  ;;  %v1229_v7 = vmul.f32 %v3713_v37, %v3713_v37  ;;  %v740_v9 = vpop.f32.mrf.mxu0 }
 0x1a4   : > { %3033 = vtanh.f32 %v962_v55  ;;  %v963_v10 = vmul.f32 0.7978846, %v923_v59  ;;  %v924_v11 = vadd.f32 %v884_v61, %v3697_v19  ;;  %v3740_v13 = vadd.f32 %v738_v51, %v3571_v57 }
 0x1a5   : > { %v3742_v17 = vpop.eup %3021  ;;  %v885_v18 = vmul.f32 0.044715, %v845_v2  ;;  %v846_v20 = vmul.f32 %v806_v4, %v3726_v49  ;;  %v1268_v23 = vadd.f32 %v1229_v7, %v1228_v6  ;;  %v1029_v24 = vadd.f32 1.0, %v3678_v52  ;;  %v742_v25 = vpop.f32.mrf.mxu0 }
 0x1a6   : > { %3035 = vtanh.f32 %v963_v10  ;;  %v964_v30 = vmul.f32 0.7978846, %v924_v11  ;;  %v807_v31 = vmul.f32 %v3740_v13, %v3740_v13  ;;  %v1030_v33 = vadd.f32 1.0, %v3682_v1 }
 0x1a7   : > { %v3749_v35 = vpop.eup %3023  ;;  %v925_v60 = vadd.f32 %v885_v18, %v3710_v36  ;;  %v886_v41 = vmul.f32 0.044715, %v846_v20  ;;  %1269 = vadd.xlane.f32.xlu1 %v1268_v23  ;;  %v1069_v42 = vmul.f32 0.5, %v1029_v24  ;;  %v3753_v43 = vadd.f32 %v740_v9, %v3574_v58  ;;  %v744_v52 = vpop.f32.mrf.mxu0 }
 0x1a8   : > { %3037 = vtanh.f32 %v964_v30  ;;  %v847_v44 = vmul.f32 %v807_v31, %v3740_v13  ;;  %v1070_v45 = vmul.f32 0.5, %v1030_v33  ;;  %v3757_v48 = vadd.f32 %v742_v25, %v3571_v57 }
 0x1a9   : > { %v965_v1 = vmul.f32 0.7978846, %v925_v60  ;;  %v926_v63 = vadd.f32 %v886_v41, %v3726_v49  ;;  %v3761_v51 = vmul.f32 %v1069_v42, %v3588_v3  ;;  %v808_v53 = vmul.f32 %v3753_v43, %v3753_v43  ;;  %v748_v55 = vpop.f32.mrf.mxu0 }
 0x1aa   : > { %v3765_v59 = vpop.eup %3025  ;;  %v887_v61 = vmul.f32 0.044715, %v847_v44  ;;  %v3768_v2 = vmul.f32 %v1070_v45, %v3594_v8  ;;  %v809_v4 = vmul.f32 %v3757_v48, %v3757_v48  ;;  %v1031_v6 = vadd.f32 1.0, %v3691_v15 }
 0x1ab   : > { %3039 = vtanh.f32 %v965_v1  ;;  %v966_v7 = vmul.f32 0.7978846, %v926_v63  ;;  %v848_v3 = vmul.f32 %v808_v53, %v3753_v43  ;;  %v1230_v9 = vmul.f32 %v3761_v51, %v3761_v51  ;;  %v750_v10 = vpop.f32.mrf.mxu0  ;;  %v2962_v63 = vld [vmem:[#allocation8] ss:$8 sps:$4 sm:$0xff]  }
 0x1ac   : > { %v3776_v11 = vpop.eup %3027  ;;  %v927_v16 = vadd.f32 %v887_v61, %v3740_v13  ;;  %v1150_v8 = vadd.f32 %v3768_v2, %v3761_v51  ;;  %v1231_v18 = vmul.f32 %v3768_v2, %v3768_v2  ;;  %v849_v15 = vmul.f32 %v809_v4, %v3757_v48  ;;  %1841 = vmatpush1.bf16.msra.mxu1 %v2962_v63 }
 0x1ad   : > { %3041 = vtanh.f32 %v966_v7  ;;  %v888_v20 = vmul.f32 0.044715, %v848_v3  ;;  %v1032_v23 = vadd.f32 1.0, %v3703_v27  ;;  %v1071_v24 = vmul.f32 0.5, %v1031_v6  ;;  %v752_v25 = vpop.f32.mrf.mxu0 }
 0x1ae   : > { %v3785_v29 = vpop.eup %3029  ;;  %v967_v30 = vmul.f32 0.7978846, %v927_v16  ;;  %1151 = vadd.xlane.f32.xlu0 %v1150_v8  ;;  %v1271_v31 = vadd.f32 %v1231_v18, %v1230_v9  ;;  %v889_v33 = vmul.f32 0.044715, %v849_v15  ;;  %v3788_v60 = vadd.f32 %v744_v52, %v3574_v58 }
 0x1af   : > { %v3790_v41 = vpop.eup %3031  ;;  %v928_v42 = vadd.f32 %v888_v20, %v3753_v43  ;;  %v1072_v44 = vmul.f32 0.5, %v1032_v23  ;;  %v3794_v45 = vmul.f32 %v1071_v24, %v3601_v14  ;;  %v3797_v27 = vadd.f32 %v748_v55, %v3571_v57  ;;  %v754_v1 = vpop.f32.mrf.mxu0 }
 0x1b0   : > { %3043 = vtanh.f32 %v967_v30  ;;  %1272 = vadd.xlane.f32.xlu1 %v1271_v31  ;;  %v929_v53 = vadd.f32 %v889_v33, %v3757_v48  ;;  %v810_v52 = vmul.f32 %v3788_v60, %v3788_v60  ;;  %v1033_v61 = vadd.f32 1.0, %v3715_v38 }
 0x1b1   : > { %v3803_v4 = vpop.eup %3033  ;;  %v968_v6 = vmul.f32 0.7978846, %v928_v42  ;;  %v3806_v14 = vmul.f32 %v1072_v44, %v3608_v21  ;;  %v811_v55 = vmul.f32 %v3797_v27, %v3797_v27  ;;  %v1034_v7 = vadd.f32 1.0, %v3719_v47  ;;  %v758_v3 = vpop.f32.mrf.mxu0 }
 0x1b2   : > { %v969_v9 = vmul.f32 0.7978846, %v929_v53  ;;  %v850_v16 = vmul.f32 %v810_v52, %v3788_v60  ;;  %v1073_v8 = vmul.f32 0.5, %v1033_v61  ;;  %v1232_v38 = vmul.f32 %v3794_v45, %v3794_v45 }
 0x1b3   : > { %v3814_v18 = vpop.eup %3035  ;;  %3045 = vtanh.f32 %v968_v6  ;;  %v1153_v21 = vadd.f32 %v3806_v14, %v3794_v45  ;;  %v851_v15 = vmul.f32 %v811_v55, %v3797_v27  ;;  %v1074_v20 = vmul.f32 0.5, %v1034_v7  ;;  %v3819_v23 = vpop.f32.mrf.mxu0  ;;  %v2963_v7 = vld [vmem:[#allocation8 + $0xf4] ss:$8 sps:$4 sm:$0xff]  }
 0x1b4   : > { %3047 = vtanh.f32 %v969_v9  ;;  %v890_v47 = vmul.f32 0.044715, %v850_v16  ;;  %v3822_v24 = vmul.f32 %v1073_v8, %v3615_v28  ;;  %v1233_v30 = vmul.f32 %v3806_v14, %v3806_v14  ;;  %1842 = vmatprep.subr.bf16.mxu1 %v2963_v7 }
 0x1b5   : > { %v3826_v31 = vpop.eup %3037  ;;  %1154 = vadd.xlane.f32.xlu0 %v1153_v21  ;;  %v891_v33 = vmul.f32 0.044715, %v851_v15  ;;  %v3829_v42 = vmul.f32 %v1074_v20, %v3619_v32  ;;  %v3832_v44 = vadd.f32 %v750_v10, %v3574_v58  ;;  %v3835_v63 = vadd.f32 %v752_v25, %v3571_v57  ;;  %v762_v6 = vpop.f32.mrf.mxu0 }
 0x1b6   : > { %4620 = vst [vmem:[#allocation16_spill] sm:$0xff] %v3822_v24  ;;  %v930_v53 = vadd.f32 %v890_v47, %v3788_v60  ;;  %v1274_v28 = vadd.f32 %v1233_v30, %v1232_v38  ;;  %v1234_v52 = vmul.f32 %v3822_v24, %v3822_v24  ;;  %v1035_v61 = vadd.f32 1.0, %v3729_v0 }
 0x1b7   : > { %v931_v55 = vadd.f32 %v891_v33, %v3797_v27  ;;  %v1156_v32 = vadd.f32 %v3829_v42, %v3822_v24  ;;  %v812_v10 = vmul.f32 %v3832_v44, %v3832_v44  ;;  %v813_v25 = vmul.f32 %v3835_v63, %v3835_v63 }
 0x1b8   : > { %v3848_v9 = vpop.eup %3039  ;;  %v970_v16 = vmul.f32 0.7978846, %v930_v53  ;;  %v1235_v8 = vmul.f32 %v3829_v42, %v3829_v42  ;;  %v1036_v0 = vadd.f32 1.0, %v3742_v17  ;;  %v1075_v38 = vmul.f32 0.5, %v1035_v61  ;;  %v764_v17 = vpop.f32.mrf.mxu0  ;;  %v2965_v61 = vld [vmem:[#allocation8 + $0xf0] ss:$8 sps:$4 sm:$0xff]  }
 0x1b9   : > { %v971_v21 = vmul.f32 0.7978846, %v931_v55  ;;  %1157 = vadd.xlane.f32.xlu1 %v1156_v32  ;;  %1275 = vadd.xlane.f32.xlu0 %v1274_v28  ;;  %v852_v15 = vmul.f32 %v812_v10, %v3832_v44  ;;  %v853_v20 = vmul.f32 %v813_v25, %v3835_v63  ;;  %v3856_v47 = vadd.f32 %v754_v1, %v3574_v58 }
 0x1ba   : > { %v3858_v30 = vpop.eup %3041  ;;  %3049 = vtanh.f32 %v970_v16  ;;  %v1277_v33 = vadd.f32 %v1235_v8, %v1234_v52  ;;  %v1076_v53 = vmul.f32 0.5, %v1036_v0  ;;  %v3861_v24 = vmul.f32 %v1075_v38, %v3627_v39  ;;  %1843 = vmatpush2.bf16.msra.mxu1 %v2965_v61  ;;  %v768_v38 = vpop.f32.mrf.mxu0 }
 0x1bb   : > { %3051 = vtanh.f32 %v971_v21  ;;  %v892_v28 = vmul.f32 0.044715, %v852_v15  ;;  %v893_v55 = vmul.f32 0.044715, %v853_v20  ;;  %v814_v32 = vmul.f32 %v3856_v47, %v3856_v47 }
 0x1bc   : > { %4621 = vst [vmem:[#allocation17_spill] sm:$0xff] %v3861_v24  ;;  %v3866_v1 = vmul.f32 %v1076_v53, %v3635_v46  ;;  %v3869_v10 = vadd.f32 %v758_v3, %v3571_v57  ;;  %v1037_v52 = vadd.f32 1.0, %v3749_v35  ;;  %v1038_v39 = vadd.f32 1.0, %v3765_v59 }
 0x1bd   : > { %v3873_v25 = vpop.eup %3043  ;;  %v932_v7 = vadd.f32 %v892_v28, %v3832_v44  ;;  %v933_v16 = vadd.f32 %v893_v55, %v3835_v63  ;;  %1278 = vadd.xlane.f32.xlu1 %v1277_v33  ;;  %v854_v8 = vmul.f32 %v814_v32, %v3856_v47  ;;  %v1236_v46 = vmul.f32 %v3861_v24, %v3861_v24 }
 0x1be   : > { %v1159_v3 = vadd.f32 %v3866_v1, %v3861_v24  ;;  %v815_v35 = vmul.f32 %v3869_v10, %v3869_v10  ;;  %v1077_v59 = vmul.f32 0.5, %v1037_v52  ;;  %v1078_v0 = vmul.f32 0.5, %v1038_v39  ;;  %v2966_v52 = vld [vmem:[#allocation8 + $0xe4] ss:$8 sps:$4 sm:$0xff]  }
 0x1bf   : > { %v972_v21 = vmul.f32 0.7978846, %v932_v7  ;;  %v973_v15 = vmul.f32 0.7978846, %v933_v16  ;;  %v894_v20 = vmul.f32 0.044715, %v854_v8  ;;  %v1237_v33 = vmul.f32 %v3866_v1, %v3866_v1  ;;  %1844 = vmatprep.subr.bf16.mxu1 %v2966_v52 }
 0x1c0   : > { %v3886_v53 = vpop.eup %3045  ;;  %1160 = vadd.xlane.f32.xlu0 %v1159_v3  ;;  %v855_v61 = vmul.f32 %v815_v35, %v3869_v10  ;;  %v3890_v28 = vmul.f32 %v1077_v59, %v3642_v62  ;;  %v3893_v55 = vmul.f32 %v1078_v0, %v3650_v12  ;;  %v3897_v32 = vadd.f32 %v3819_v23, %v3574_v58  ;;  %v2968_v3 = vld [vmem:[#allocation8 + $0xe0] ss:$8 sps:$4 sm:$0xff]   ;;  %v2969_v62 = vld [vmem:[#allocation8 + $0xd4] ss:$8 sps:$4 sm:$0xff]   ;;  %v770_v59 = vpop.f32.mrf.mxu0 }
 0x1c1   : > { %v3899_v39 = vpop.eup %3047  ;;  %3053 = vtanh.f32 %v972_v21  ;;  %v934_v7 = vadd.f32 %v894_v20, %v3856_v47  ;;  %v1280_v16 = vadd.f32 %v1237_v33, %v1236_v46  ;;  %v3903_v8 = vadd.f32 %v762_v6, %v3571_v57  ;;  %1845 = vmatpush2.bf16.msra.mxu1 %v2968_v3 }
 0x1c2   : > { %4622 = vst [vmem:[#allocation18_spill] sm:$0xff] %v3890_v28  ;;  %4623 = vst [vmem:[#allocation19_spill] sm:$0xff] %v3893_v55  ;;  %3055 = vtanh.f32 %v973_v15  ;;  %v895_v35 = vmul.f32 0.044715, %v855_v61  ;;  %v1162_v12 = vadd.f32 %v3893_v55, %v3890_v28  ;;  %v816_v23 = vmul.f32 %v3897_v32, %v3897_v32  ;;  %1846 = vmatprep.subr.bf16.mxu1 %v2969_v62 }
 0x1c3   : > { %v974_v0 = vmul.f32 0.7978846, %v934_v7  ;;  %v817_v21 = vmul.f32 %v3903_v8, %v3903_v8  ;;  %v1238_v6 = vmul.f32 %v3890_v28, %v3890_v28  ;;  %v1239_v46 = vmul.f32 %v3893_v55, %v3893_v55 }
 0x1c4   : > { %v935_v15 = vadd.f32 %v895_v35, %v3869_v10  ;;  %1163 = vadd.xlane.f32.xlu1 %v1162_v12  ;;  %1281 = vadd.xlane.f32.xlu0 %v1280_v16  ;;  %v856_v20 = vmul.f32 %v816_v23, %v3897_v32  ;;  %v1039_v33 = vadd.f32 1.0, %v3776_v11  ;;  %v1040_v61 = vadd.f32 1.0, %v3785_v29  ;;  %v772_v12 = vpop.f32.mrf.mxu0 }
 0x1c5   : > { %3057 = vtanh.f32 %v974_v0  ;;  %v857_v52 = vmul.f32 %v817_v21, %v3903_v8  ;;  %v1283_v7 = vadd.f32 %v1239_v46, %v1238_v6  ;;  %v3921_v28 = vadd.f32 %v764_v17, %v3574_v58 }
 0x1c6   : > { %v975_v55 = vmul.f32 0.7978846, %v935_v15  ;;  %v896_v3 = vmul.f32 0.044715, %v856_v20  ;;  %v1079_v24 = vmul.f32 0.5, %v1039_v33  ;;  %v1080_v35 = vmul.f32 0.5, %v1040_v61 }
 0x1c7   : > { %v3923_v16 = vpop.eup %3049  ;;  %v897_v23 = vmul.f32 0.044715, %v857_v52  ;;  %v818_v11 = vmul.f32 %v3921_v28, %v3921_v28  ;;  %v3928_v29 = vadd.f32 %v768_v38, %v3571_v57  ;;  %v1041_v0 = vadd.f32 1.0, %v3790_v41  ;;  %v2971_v20 = vld [vmem:[#allocation8 + $0xd0] ss:$8 sps:$4 sm:$0xff]  }
 0x1c8   : > { %v3931_v21 = vpop.eup %3051  ;;  %3059 = vtanh.f32 %v975_v55  ;;  %v936_v17 = vadd.f32 %v896_v3, %v3897_v32  ;;  %1284 = vadd.xlane.f32.xlu1 %v1283_v7  ;;  %v3935_v62 = vmul.f32 %v1079_v24, %v3657_v22  ;;  %v3938_v6 = vmul.f32 %v1080_v35, %v3664_v34  ;;  %v2972_v55 = vld [vmem:[#allocation8 + $0xc4] ss:$8 sps:$4 sm:$0xff]   ;;  %v774_v24 = vpop.f32.mrf.mxu0  ;;  %1847 = vmatpush2.bf16.msra.mxu1 %v2971_v20 }
 0x1c9   : > { %v937_v46 = vadd.f32 %v897_v23, %v3903_v8  ;;  %v858_v15 = vmul.f32 %v818_v11, %v3921_v28  ;;  %v819_v38 = vmul.f32 %v3928_v29, %v3928_v29  ;;  %v1042_v41 = vadd.f32 1.0, %v3803_v4  ;;  %1848 = vmatprep.subr.bf16.mxu1 %v2972_v55 }
 0x1ca   : > { %4624 = vst [vmem:[#allocation20_spill] sm:$0xff] %v3938_v6  ;;  %v976_v33 = vmul.f32 0.7978846, %v936_v17  ;;  %v1165_v61 = vadd.f32 %v3938_v6, %v3935_v62  ;;  %v1081_v22 = vmul.f32 0.5, %v1041_v0  ;;  %v1240_v34 = vmul.f32 %v3935_v62, %v3935_v62  ;;  %v778_v55 = vpop.f32.mrf.mxu0 }
 0x1cb   : > { %v977_v52 = vmul.f32 0.7978846, %v937_v46  ;;  %v898_v7 = vmul.f32 0.044715, %v858_v15  ;;  %v859_v3 = vmul.f32 %v819_v38, %v3928_v29  ;;  %v1082_v35 = vmul.f32 0.5, %v1042_v41 }
 0x1cc   : > { %3061 = vtanh.f32 %v976_v33  ;;  %1166 = vadd.xlane.f32.xlu0 %v1165_v61  ;;  %v3951_v4 = vmul.f32 %v1081_v22, %v3668_v40  ;;  %v1241_v23 = vmul.f32 %v3938_v6, %v3938_v6  ;;  %v3956_v11 = vadd.f32 %v770_v59, %v3574_v58  ;;  %v2974_v15 = vld [vmem:[#allocation8 + $0xc0] ss:$8 sps:$4 sm:$0xff]   ;;  %v2975_v38 = vld [vmem:[#allocation8 + $0xb4] ss:$8 sps:$4 sm:$0xff]   ;;  %v780_v6 = vpop.f32.mrf.mxu0 }
 0x1cd   : > { %3063 = vtanh.f32 %v977_v52  ;;  %v938_v0 = vadd.f32 %v898_v7, %v3921_v28  ;;  %v899_v17 = vmul.f32 0.044715, %v859_v3  ;;  %v3960_v46 = vmul.f32 %v1082_v35, %v3676_v50  ;;  %1849 = vmatpush2.bf16.msra.mxu1 %v2974_v15 }
 0x1ce   : > { %4625 = vst [vmem:[#allocation21_spill] sm:$0xff] %v3951_v4  ;;  %v3962_v41 = vpop.eup %3053  ;;  %v1286_v40 = vadd.f32 %v1241_v23, %v1240_v34  ;;  %v820_v20 = vmul.f32 %v3956_v11, %v3956_v11  ;;  %v3967_v33 = vadd.f32 %v772_v12, %v3571_v57  ;;  %v1242_v59 = vmul.f32 %v3951_v4, %v3951_v4 }
 0x1cf   : > { %4626 = vst [vmem:[#allocation22_spill] sm:$0xff] %v3960_v46  ;;  %v3971_v61 = vpop.eup %3055  ;;  %v978_v22 = vmul.f32 0.7978846, %v938_v0  ;;  %v939_v50 = vadd.f32 %v899_v17, %v3928_v29  ;;  %v1168_v52 = vadd.f32 %v3960_v46, %v3951_v4  ;;  %v1243_v34 = vmul.f32 %v3960_v46, %v3960_v46  ;;  %1850 = vmatprep.subr.bf16.mxu1 %v2975_v38 }
 0x1d0   : > { %1287 = vadd.xlane.f32.xlu0 %v1286_v40  ;;  %v860_v12 = vmul.f32 %v820_v20, %v3956_v11  ;;  %v821_v7 = vmul.f32 %v3967_v33, %v3967_v33  ;;  %v1043_v3 = vadd.f32 1.0, %v3814_v18  ;;  %v1044_v35 = vadd.f32 1.0, %v3826_v31 }
 0x1d1   : > { %3065 = vtanh.f32 %v978_v22  ;;  %v979_v23 = vmul.f32 0.7978846, %v939_v50  ;;  %1169 = vadd.xlane.f32.xlu1 %v1168_v52  ;;  %v1289_v0 = vadd.f32 %v1243_v34, %v1242_v59  ;;  %v3984_v17 = vadd.f32 %v774_v24, %v3574_v58  ;;  %v2977_v52 = vld [vmem:[#allocation8 + $0xb0] ss:$8 sps:$4 sm:$0xff]   ;;  %v2978_v34 = vld [vmem:[#allocation8 + $0xa4] ss:$8 sps:$4 sm:$0xff]  }
 0x1d2   : > { %v3986_v46 = vpop.eup %3057  ;;  %v900_v15 = vmul.f32 0.044715, %v860_v12  ;;  %v861_v40 = vmul.f32 %v821_v7, %v3967_v33  ;;  %v1083_v20 = vmul.f32 0.5, %v1043_v3  ;;  %v1084_v4 = vmul.f32 0.5, %v1044_v35  ;;  %1851 = vmatpush2.bf16.msra.mxu1 %v2977_v52 }
 0x1d3   : > { %3067 = vtanh.f32 %v979_v23  ;;  %v822_v18 = vmul.f32 %v3984_v17, %v3984_v17  ;;  %v3992_v31 = vadd.f32 %v778_v55, %v3571_v57  ;;  %v1045_v38 = vadd.f32 1.0, %v3848_v9  ;;  %v782_v23 = vpop.f32.mrf.mxu0  ;;  %1852 = vmatprep.subr.bf16.mxu1 %v2978_v34 }
 0x1d4   : > { %v940_v24 = vadd.f32 %v900_v15, %v3956_v11  ;;  %v901_v59 = vmul.f32 0.044715, %v861_v40  ;;  %v3997_v22 = vmul.f32 %v1083_v20, %v3688_v5  ;;  %v4000_v50 = vmul.f32 %v1084_v4, %v3697_v19 }
 0x1d5   : > { %v4002_v12 = vpop.eup %3059  ;;  %1290 = vadd.xlane.f32.xlu1 %v1289_v0  ;;  %v862_v7 = vmul.f32 %v822_v18, %v3984_v17  ;;  %v823_v55 = vmul.f32 %v3992_v31, %v3992_v31  ;;  %v1046_v9 = vadd.f32 1.0, %v3858_v30  ;;  %v1085_v3 = vmul.f32 0.5, %v1045_v38 }
 0x1d6   : > { %v980_v35 = vmul.f32 0.7978846, %v940_v24  ;;  %v941_v5 = vadd.f32 %v901_v59, %v3967_v33  ;;  %v1171_v19 = vadd.f32 %v4000_v50, %v3997_v22  ;;  %v1244_v4 = vmul.f32 %v3997_v22, %v3997_v22  ;;  %v2980_v24 = vld [vmem:[#allocation8 + $0xa0] ss:$8 sps:$4 sm:$0xff]   ;;  %v2981_v59 = vld [vmem:[#allocation8 + $0x94] ss:$8 sps:$4 sm:$0xff]  }
 0x1d7   : > { %v902_v0 = vmul.f32 0.044715, %v862_v7  ;;  %v863_v15 = vmul.f32 %v823_v55, %v3992_v31  ;;  %v1086_v40 = vmul.f32 0.5, %v1046_v9  ;;  %v4015_v20 = vmul.f32 %v1085_v3, %v3710_v36  ;;  %1853 = vmatpush2.bf16.msra.mxu1 %v2980_v24 }
 0x1d8   : > { %3069 = vtanh.f32 %v980_v35  ;;  %v981_v30 = vmul.f32 0.7978846, %v941_v5  ;;  %1172 = vadd.xlane.f32.xlu0 %v1171_v19  ;;  %v1245_v18 = vmul.f32 %v4000_v50, %v4000_v50  ;;  %v4020_v38 = vadd.f32 %v780_v6, %v3574_v58  ;;  %v784_v5 = vpop.f32.mrf.mxu0  ;;  %1854 = vmatprep.subr.bf16.mxu1 %v2981_v59 }
 0x1d9   : > { %v4022_v52 = vpop.eup %3061  ;;  %v942_v7 = vadd.f32 %v902_v0, %v3984_v17  ;;  %v903_v55 = vmul.f32 0.044715, %v863_v15  ;;  %v4026_v36 = vmul.f32 %v1086_v40, %v3726_v49  ;;  %v4029_v34 = vadd.f32 %v782_v23, %v3571_v57 }
 0x1da   : > { %v4031_v9 = vpop.eup %3063  ;;  %3071 = vtanh.f32 %v981_v30  ;;  %v1292_v3 = vadd.f32 %v1245_v18, %v1244_v4  ;;  %v824_v6 = vmul.f32 %v4020_v38, %v4020_v38  ;;  %v1246_v35 = vmul.f32 %v4015_v20, %v4015_v20 }
 0x1db   : > { %4627 = vst [vmem:[#allocation23_spill] sm:$0xff] %v4026_v36  ;;  %v982_v19 = vmul.f32 0.7978846, %v942_v7  ;;  %v943_v0 = vadd.f32 %v903_v55, %v3992_v31  ;;  %v1174_v49 = vadd.f32 %v4026_v36, %v4015_v20  ;;  %v825_v57 = vmul.f32 %v4029_v34, %v4029_v34 }
 0x1dc   : > { %1293 = vadd.xlane.f32.xlu0 %v1292_v3  ;;  %v864_v4 = vmul.f32 %v824_v6, %v4020_v38  ;;  %v1247_v23 = vmul.f32 %v4026_v36, %v4026_v36  ;;  %v1047_v15 = vadd.f32 1.0, %v3873_v25  ;;  %v1048_v40 = vadd.f32 1.0, %v3886_v53 }
 0x1dd   : > { %3073 = vtanh.f32 %v982_v19  ;;  %v983_v30 = vmul.f32 0.7978846, %v943_v0  ;;  %1175 = vadd.xlane.f32.xlu1 %v1174_v49  ;;  %v865_v18 = vmul.f32 %v825_v57, %v4029_v34  ;;  %v4049_v24 = vadd.f32 %v784_v5, %v3574_v58  ;;  %v2983_v49 = vld [vmem:[#allocation8 + $0x90] ss:$8 sps:$4 sm:$0xff]   ;;  %v2984_v57 = vld [vmem:[#allocation8 + $0x84] ss:$8 sps:$4 sm:$0xff]  }
 0x1de   : > { %v4051_v7 = vpop.eup %3065  ;;  %v904_v59 = vmul.f32 0.044715, %v864_v4  ;;  %v1295_v55 = vadd.f32 %v1247_v23, %v1246_v35  ;;  %v1087_v3 = vmul.f32 0.5, %v1047_v15  ;;  %v1088_v6 = vmul.f32 0.5, %v1048_v40  ;;  %1855 = vmatpush2.bf16.msra.mxu1 %v2983_v49 }
 0x1df   : > { %3075 = vtanh.f32 %v983_v30  ;;  %v905_v36 = vmul.f32 0.044715, %v865_v18  ;;  %v826_v25 = vmul.f32 %v4049_v24, %v4049_v24  ;;  %v1049_v53 = vadd.f32 1.0, %v3899_v39  ;;  %1856 = vmatprep.subr.bf16.mxu1 %v2984_v57 }
 0x1e0   : > { %v4056_v19 = vpop.eup %3067  ;;  %v944_v0 = vadd.f32 %v904_v59, %v4020_v38  ;;  %v4060_v58 = vmul.f32 %v1087_v3, %v3740_v13  ;;  %v4063_v5 = vmul.f32 %v1088_v6, %v3753_v43  ;;  %v1050_v35 = vadd.f32 1.0, %v3923_v16 }
 0x1e1   : > { %v945_v4 = vadd.f32 %v905_v36, %v4029_v34  ;;  %1296 = vadd.xlane.f32.xlu1 %v1295_v55  ;;  %v866_v23 = vmul.f32 %v826_v25, %v4049_v24  ;;  %v1089_v39 = vmul.f32 0.5, %v1049_v53  ;;  %v1051_v15 = vadd.f32 1.0, %v3931_v21 }
 0x1e2   : > { %v984_v40 = vmul.f32 0.7978846, %v944_v0  ;;  %v1177_v13 = vadd.f32 %v4063_v5, %v4060_v58  ;;  %v1090_v30 = vmul.f32 0.5, %v1050_v35  ;;  %v1248_v43 = vmul.f32 %v4060_v58, %v4060_v58  ;;  %v2986_v0 = vld [vmem:[#allocation8 + $0x80] ss:$8 sps:$4 sm:$0xff]  }
 0x1e3   : > { %v985_v16 = vmul.f32 0.7978846, %v945_v4  ;;  %v906_v18 = vmul.f32 0.044715, %v866_v23  ;;  %v4074_v59 = vmul.f32 %v1089_v39, %v3757_v48  ;;  %v1249_v36 = vmul.f32 %v4063_v5, %v4063_v5  ;;  %1857 = vmatpush2.bf16.msra.mxu1 %v2986_v0 }
 0x1e4   : > { %3077 = vtanh.f32 %v984_v40  ;;  %1178 = vadd.xlane.f32.xlu0 %v1177_v13  ;;  %v4079_v21 = vmul.f32 %v1090_v30, %v3788_v60  ;;  %v1052_v55 = vadd.f32 1.0, %v3962_v41  ;;  %v1091_v3 = vmul.f32 0.5, %v1051_v15 }
 0x1e5   : > { %v3070_v6 = vpop.eup %3069  ;;  %3079 = vtanh.f32 %v985_v16  ;;  %v946_v25 = vadd.f32 %v906_v18, %v4049_v24  ;;  %v1298_v53 = vadd.f32 %v1249_v36, %v1248_v43  ;;  %v1250_v35 = vmul.f32 %v4074_v59, %v4074_v59 }
 0x1e6   : > { %v1180_v48 = vadd.f32 %v4079_v21, %v4074_v59  ;;  %v1251_v49 = vmul.f32 %v4079_v21, %v4079_v21  ;;  %v1092_v60 = vmul.f32 0.5, %v1052_v55  ;;  %v1053_v41 = vadd.f32 1.0, %v3971_v61 }
 0x1e7   : > { %v3072_v57 = vpop.eup %3071  ;;  %v986_v4 = vmul.f32 0.7978846, %v946_v25  ;;  %v1054_v23 = vadd.f32 1.0, %v3986_v46  ;;  %v1055_v39 = vadd.f32 1.0, %v4002_v12  ;;  %v4093_v40 = vmul.f32 %v1091_v3, %v3797_v27 }
 0x1e8   : > { %1181 = vadd.xlane.f32.xlu1 %v1180_v48  ;;  %1299 = vadd.xlane.f32.xlu0 %v1298_v53  ;;  %v1301_v15 = vadd.f32 %v1251_v49, %v1250_v35  ;;  %v4096_v13 = vmul.f32 %v1092_v60, %v3832_v44  ;;  %v1056_v30 = vadd.f32 1.0, %v4022_v52  ;;  %v1093_v43 = vmul.f32 0.5, %v1053_v41 }
 0x1e9   : > { %3081 = vtanh.f32 %v986_v4  ;;  %v1094_v16 = vmul.f32 0.5, %v1054_v23  ;;  %v1095_v61 = vmul.f32 0.5, %v1055_v39  ;;  %v1057_v27 = vadd.f32 1.0, %v4031_v9 }
 0x1ea   : > { %v3074_v18 = vpop.eup %3073  ;;  %v1183_v46 = vadd.f32 %v4096_v13, %v4093_v40  ;;  %v1253_v12 = vmul.f32 %v4096_v13, %v4096_v13  ;;  %v1096_v36 = vmul.f32 0.5, %v1056_v30  ;;  %v4105_v55 = vmul.f32 %v1093_v43, %v3835_v63 }
 0x1eb   : > { %v4108_v44 = vmul.f32 %v1094_v16, %v3856_v47  ;;  %v1058_v52 = vadd.f32 1.0, %v4051_v7  ;;  %v1252_v25 = vmul.f32 %v4093_v40, %v4093_v40  ;;  %v1097_v0 = vmul.f32 0.5, %v1057_v27 }
 0x1ec   : > { %v3076_v3 = vpop.eup %3075  ;;  %1302 = vadd.xlane.f32.xlu1 %v1301_v15  ;;  %1184 = vadd.xlane.f32.xlu0 %v1183_v46  ;;  %v4114_v53 = vmul.f32 %v1096_v36, %v3897_v32  ;;  %v4121_v7 = vmul.f32 %v1095_v61, %v3869_v10  ;;  %v1059_v35 = vadd.f32 1.0, %v4056_v19  ;;  %v1060_v49 = vadd.f32 1.0, %v3070_v6 }
 0x1ed   : > { %v1186_v9 = vadd.f32 %v4108_v44, %v4105_v55  ;;  %v1098_v63 = vmul.f32 0.5, %v1058_v52  ;;  %v1304_v48 = vadd.f32 %v1253_v12, %v1252_v25  ;;  %v1255_v47 = vmul.f32 %v4108_v44, %v4108_v44 }
 0x1ee   : > { %v1254_v32 = vmul.f32 %v4105_v55, %v4105_v55  ;;  %v1189_v60 = vadd.f32 %v4114_v53, %v4121_v7  ;;  %v1062_v41 = vadd.f32 1.0, %v3074_v18  ;;  %v4132_v39 = vmul.f32 %v1097_v0, %v3903_v8 }
 0x1ef   : > { %v4129_v4 = vmul.f32 %v1098_v63, %v3921_v28  ;;  %v1100_v10 = vmul.f32 0.5, %v1060_v49  ;;  %v1257_v6 = vmul.f32 %v4114_v53, %v4114_v53  ;;  %v1099_v30 = vmul.f32 0.5, %v1059_v35 }
 0x1f0   : > { %1187 = vadd.xlane.f32.xlu1 %v1186_v9  ;;  %1305 = vadd.xlane.f32.xlu0 %v1304_v48  ;;  %v1307_v19 = vadd.f32 %v1255_v47, %v1254_v32  ;;  %v1061_v43 = vadd.f32 1.0, %v3072_v57  ;;  %v1256_v16 = vmul.f32 %v4121_v7, %v4121_v7  ;;  %v1102_v8 = vmul.f32 0.5, %v1062_v41 }
 0x1f1   : > { %v3078_v23 = vpop.eup %3077  ;;  %v1192_v28 = vadd.f32 %v4129_v4, %v4132_v39  ;;  %v4141_v61 = vmul.f32 %v1100_v10, %v3956_v11  ;;  %v1259_v46 = vmul.f32 %v4129_v4, %v4129_v4  ;;  %v4146_v57 = vmul.f32 %v1099_v30, %v3928_v29 }
 0x1f2   : > { %v3080_v15 = vpop.eup %3079  ;;  %v1064_v18 = vadd.f32 1.0, %v3078_v23  ;;  %v1310_v36 = vadd.f32 %v1257_v6, %v1256_v16  ;;  %v1101_v27 = vmul.f32 0.5, %v1061_v43  ;;  %v1063_v52 = vadd.f32 1.0, %v3076_v3 }
 0x1f3   : > { %4628 = vst [vmem:[#allocation24_spill] sm:$0xff] %v4141_v61  ;;  %4629 = vst [vmem:[#allocation25_spill] sm:$0xff] %v4146_v57  ;;  %v1258_v25 = vmul.f32 %v4132_v39, %v4132_v39  ;;  %v1195_v11 = vadd.f32 %v4141_v61, %v4146_v57  ;;  %v4153_v9 = vmul.f32 %v1102_v8, %v3984_v17  ;;  %v1065_v35 = vadd.f32 1.0, %v3080_v15 }
 0x1f4   : > { %1308 = vadd.xlane.f32.xlu1 %v1307_v19  ;;  %1190 = vadd.xlane.f32.xlu0 %v1189_v60  ;;  %v1104_v0 = vmul.f32 0.5, %v1064_v18  ;;  %v4156_v47 = vmul.f32 %v1101_v27, %v3967_v33  ;;  %v1261_v29 = vmul.f32 %v4141_v61, %v4141_v61  ;;  %v1103_v3 = vmul.f32 0.5, %v1063_v52 }
 0x1f5   : > { %4630 = vst [vmem:[#allocation26_spill] sm:$0xff] %v4153_v9  ;;  %v1313_v48 = vadd.f32 %v1259_v46, %v1258_v25  ;;  %v1260_v17 = vmul.f32 %v4146_v57, %v4146_v57  ;;  %v1263_v33 = vmul.f32 %v4153_v9, %v4153_v9  ;;  %v1105_v10 = vmul.f32 0.5, %v1065_v35  ;;  %v2987_v25 = vld [vmem:[#allocation10 + $0x78] sm:$0xff]   ;;  %v4206_v35 = vld [vmem:[#allocation10 + $0x68] sm:$0xff]  }
 0x1f6   : > { %v3082_v12 = vpop.eup %3081  ;;  %4631 = vst [vmem:[#allocation27_spill] sm:$0xff] %v4156_v47  ;;  %v1198_v49 = vadd.f32 %v4153_v9, %v4156_v47  ;;  %v4165_v32 = vmul.f32 %v1104_v0, %v4020_v38  ;;  %v4170_v23 = vmul.f32 %v1103_v3, %v3992_v31  ;;  %v1262_v15 = vmul.f32 %v4156_v47, %v4156_v47  ;;  %v4198_v0 = vld [vmem:[#allocation10 + $0x70] sm:$0xff]  }
 0x1f7   : > { %v1066_v63 = vadd.f32 1.0, %v3082_v12  ;;  %v1316_v41 = vadd.f32 %v1261_v29, %v1260_v17  ;;  %v4180_v30 = vmul.f32 %v1105_v10, %v4029_v34  ;;  %2673 = vmatprep.subr.bf16.mxu0 %v2987_v25  ;;  %2749 = vmatprep.subr.bf16.mxu1 %v2987_v25  ;;  %v4201_v29 = vld [vmem:[#allocation10 + $0x30] sm:$0xff]   ;;  %v4214_v10 = vld [vmem:[#allocation10 + $0x60] sm:$0xff]  }
 0x1f8   : > { %1193 = vadd.xlane.f32.xlu1 %v1192_v28  ;;  %1311 = vadd.xlane.f32.xlu0 %v1310_v36  ;;  %4632 = vst [vmem:[#allocation28_spill] sm:$0xff] %v4165_v32  ;;  %4633 = vst [vmem:[#allocation29_spill] sm:$0xff] %v4170_v23  ;;  %v1201_v19 = vadd.f32 %v4165_v32, %v4170_v23  ;;  %v1319_v6 = vadd.f32 %v1263_v33, %v1262_v15 }
 0x1f9   : > { %v1106_v60 = vmul.f32 0.5, %v1066_v63  ;;  %4635 = vst [vmem:[#allocation31_spill] sm:$0xff] %v4180_v30  ;;  %v1265_v31 = vmul.f32 %v4165_v32, %v4165_v32  ;;  %v1264_v16 = vmul.f32 %v4170_v23, %v4170_v23  ;;  %v1266_v34 = vmul.f32 %v4180_v30, %v4180_v30 }
 0x1fb   : > { %v4177_v38 = vmul.f32 %v1106_v60, %v4049_v24  ;;  %v1322_v28 = vadd.f32 %v1265_v31, %v1264_v16  ;;  %v4219_v31 = vld [vmem:[#allocation10 + $0x20] sm:$0xff]  }
 0x1fc   : > { %1314 = vadd.xlane.f32.xlu1 %v1313_v48  ;;  %1196 = vadd.xlane.f32.xlu0 %v1195_v11  ;;  %v4196_v11 = vld [vmem:[#allocation10 + $0x38] sm:$0xff]  }
 0x1fd   : > { %4634 = vst [vmem:[#allocation30_spill] sm:$0xff] %v4177_v38  ;;  %v1204_v43 = vadd.f32 %v4177_v38, %v4180_v30  ;;  %v1267_v24 = vmul.f32 %v4177_v38, %v4177_v38  ;;  %2674 = vmatpush3.bf16.msra.mxu0 %v4196_v11 }
 0x1fe   : > { %2675 = vmatprep.subr.bf16.mxu0 %v4198_v0 }
 0x1ff   : > { %v1325_v8 = vadd.f32 %v1267_v24, %v1266_v34 }
 0x200   : > { %1199 = vadd.xlane.f32.xlu1 %v1198_v49  ;;  %1317 = vadd.xlane.f32.xlu0 %v1316_v41  ;;  %v4211_v41 = vld [vmem:[#allocation10 + $0x28] sm:$0xff]  }
 0x201   : > { %2676 = vmatpush3.bf16.msra.mxu0 %v4201_v29 }
 0x202   : > { %2677 = vmatprep.subr.bf16.mxu0 %v4206_v35 }
 0x204   : > { %1320 = vadd.xlane.f32.xlu1 %v1319_v6  ;;  %1202 = vadd.xlane.f32.xlu0 %v1201_v19 }
 0x205   : > { %2678 = vmatpush3.bf16.msra.mxu0 %v4211_v41 }
 0x206   : > { %2679 = vmatprep.subr.bf16.mxu0 %v4214_v10 }
 0x208   : > { %1205 = vadd.xlane.f32.xlu1 %v1204_v43  ;;  %1323 = vadd.xlane.f32.xlu0 %v1322_v28  ;;  %v4222_v43 = vld [vmem:[#allocation10 + $0x58] sm:$0xff]  }
 0x209   : > { %2680 = vmatpush3.bf16.msra.mxu0 %v4219_v31 }
 0x20a   : > { %2681 = vmatprep.subr.bf16.mxu0 %v4222_v43 }
 0x20c   : > { %1326 = vadd.xlane.f32.xlu1 %v1325_v8 }
 0x22c   : > { %v1149_v18 = vpop.xlane.xlu0 %1148 }
 0x22d   : > { %v4192_v46 = vmul.f32 0.00390625, %v1149_v18  ;;  %v1429_v18 = vld [vmem:[#allocation7 + $0x1] ss:$8 sm:$0x3] }
 0x22e   : > { %v4235_v25 = vrot.slane %v1429_v18, %v3566_v54 }
 0x22f   : > { %v1348_v12 = vmul.f32 %v4192_v46, %v4192_v46 }
 0x230   : > { %v1270_v36 = vpop.xlane.xlu1 %1269 }
 0x231   : > { %v1328_v27 = vmul.f32 0.00390625, %v1270_v36  ;;  %v4232_v36 = vld [vmem:[#allocation10 + $0x50] sm:$0xff]  }
 0x233   : > { %v1368_v52 = vsub.f32 %v1328_v27, %v1348_v12  ;;  %v4229_v12 = vld [vmem:[#allocation10 + $0x18] sm:$0xff]  }
 0x234   : > { %2682 = vmatpush3.bf16.msra.mxu0 %v4229_v12 }
 0x235   : > { %v1388_v63 = vadd.f32 1e-06, %v1368_v52  ;;  %2683 = vmatprep.subr.bf16.mxu0 %v4232_v36 }
 0x237   : > { %v1152_v48 = vpop.xlane.xlu0 %1151  ;;  %3083 = vrsqrt.f32 %v1388_v63 }
 0x238   : > { %v4203_v3 = vmul.f32 0.00390625, %v1152_v48 }
 0x239   : > { %v1273_v49 = vpop.xlane.xlu1 %1272 }
 0x23a   : > { %v1329_v17 = vmul.f32 0.00390625, %v1273_v49  ;;  %v1349_v60 = vmul.f32 %v4203_v3, %v4203_v3 }
 0x23c   : > { %v1369_v33 = vsub.f32 %v1329_v17, %v1349_v60  ;;  %v4240_v17 = vrot.slane %v1429_v18, %v3568_v56  ;;  %v4243_v60 = vld [vmem:[#allocation10 + $0x10] sm:$0xff]  }
 0x23d   : > { %2684 = vmatpush3.bf16.msra.mxu0 %v4243_v60 }
 0x23e   : > { %v1389_v15 = vadd.f32 1e-06, %v1369_v33  ;;  %v1155_v19 = vpop.xlane.xlu0 %1154 }
 0x23f   : > { %v4216_v6 = vmul.f32 0.00390625, %v1155_v19 }
 0x240   : > { %3085 = vrsqrt.f32 %v1389_v15 }
 0x241   : > { %v1350_v34 = vmul.f32 %v4216_v6, %v4216_v6 }
 0x242   : > { %v1158_v16 = vpop.xlane.xlu1 %1157  ;;  %v1276_v28 = vpop.xlane.xlu0 %1275 }
 0x243   : > { %v4224_v24 = vmul.f32 0.00390625, %v1158_v16  ;;  %v1330_v8 = vmul.f32 0.00390625, %v1276_v28  ;;  %v1562_v16 = vld [vmem:[#allocation7 + $0x2] ss:$8 sm:$0x3] }
 0x244   : > { %v3084_v33 = vpop.eup %3083  ;;  %v4252_v18 = vrot.slane %v1562_v16, %v3566_v54 }
 0x245   : > { %v1370_v27 = vsub.f32 %v1330_v8, %v1350_v34  ;;  %v1351_v48 = vmul.f32 %v4224_v24, %v4224_v24  ;;  %v1442_v8 = vmul.f32 %v3084_v33, %v4240_v17 }
 0x246   : > { %v1279_v52 = vpop.xlane.xlu1 %1278 }
 0x247   : > { %v1390_v63 = vadd.f32 1e-06, %v1370_v27  ;;  %v1331_v49 = vmul.f32 0.00390625, %v1279_v52  ;;  %v1441_v27 = vmul.f32 %v3084_v33, %v4235_v25  ;;  %v4255_v52 = vrot.slane %v1562_v16, %v3568_v56 }
 0x248   : > { %v1483_v16 = vsub.f32 %v3761_v51, %v4203_v3 }
 0x249   : > { %3087 = vrsqrt.f32 %v1390_v63  ;;  %v1371_v15 = vsub.f32 %v1331_v49, %v1351_v48  ;;  %v1161_v19 = vpop.xlane.xlu0 %1160  ;;  %v1481_v63 = vsub.f32 %v3701_v26, %v4192_v46  ;;  %v1482_v48 = vsub.f32 %v3713_v37, %v4192_v46 }
 0x24a   : > { %v4246_v28 = vmul.f32 0.00390625, %v1161_v19  ;;  %v1484_v26 = vsub.f32 %v3768_v2, %v4203_v3 }
 0x24b   : > { %v1391_v34 = vadd.f32 1e-06, %v1371_v15  ;;  %v1522_v37 = vmul.f32 %v1482_v48, %v1442_v8  ;;  %v1521_v46 = vmul.f32 %v1481_v63, %v1441_v27 }
 0x24c   : > { %v1352_v33 = vmul.f32 %v4246_v28, %v4246_v28 }
 0x24d   : > { %v3086_v38 = vpop.eup %3085  ;;  %3089 = vrsqrt.f32 %v1391_v34  ;;  %v1164_v49 = vpop.xlane.xlu1 %1163  ;;  %v1575_v61 = vadd.f32 %v4255_v52, %v1522_v37  ;;  %v1574_v51 = vadd.f32 %v4252_v18, %v1521_v46  ;;  %v4636_v46 = vld [vmem:[#allocation16_spill] sm:$0xff] }
 0x24e   : > { %v1282_v15 = vpop.xlane.xlu0 %1281  ;;  %v4263_v19 = vmul.f32 0.00390625, %v1164_v49  ;;  %v1444_v30 = vmul.f32 %v3086_v38, %v4240_v17  ;;  %v1443_v56 = vmul.f32 %v3086_v38, %v4235_v25 }
 0x24f   : > { %v1332_v54 = vmul.f32 0.00390625, %v1282_v15 }
 0x250   : > { %v1524_v23 = vmul.f32 %v1484_v26, %v1444_v30  ;;  %v1523_v9 = vmul.f32 %v1483_v16, %v1443_v56  ;;  %v1353_v49 = vmul.f32 %v4263_v19, %v4263_v19 }
 0x251   : > { %v1372_v34 = vsub.f32 %v1332_v54, %v1352_v33  ;;  %v1285_v32 = vpop.xlane.xlu1 %1284  ;;  %v1486_v33 = vsub.f32 %v3806_v14, %v4216_v6 }
 0x252   : > { %v1333_v15 = vmul.f32 0.00390625, %v1285_v32  ;;  %v1577_v38 = vadd.f32 %v4255_v52, %v1524_v23  ;;  %v1576_v57 = vadd.f32 %v4252_v18, %v1523_v9 }
 0x253   : > { %v1392_v47 = vadd.f32 1e-06, %v1372_v34 }
 0x254   : > { %v1373_v2 = vsub.f32 %v1333_v15, %v1353_v49  ;;  %v1615_v8 = vpack.c.bf16 %v1577_v38, %v1575_v61  ;;  %v1614_v27 = vpack.c.bf16 %v1576_v57, %v1574_v51  ;;  %v1485_v61 = vsub.f32 %v3794_v45, %v4216_v6 }
 0x255   : > { %3091 = vrsqrt.f32 %v1392_v47  ;;  %v1167_v3 = vpop.xlane.xlu0 %1166  ;;  %v1488_v57 = vsub.f32 %v3829_v42, %v4224_v24  ;;  %v1487_v45 = vsub.f32 %v4636_v46, %v4224_v24 }
 0x256   : > { %v3088_v30 = vpop.eup %3087  ;;  %v1393_v63 = vadd.f32 1e-06, %v1373_v2  ;;  %v4277_v48 = vmul.f32 0.00390625, %v1167_v3  ;;  %1858 = vmatprep.mubr.bf16.mxu1 %v1615_v8 }
 0x257   : > { %v1446_v32 = vmul.f32 %v3088_v30, %v4240_v17  ;;  %1859 = vmatmul.mubr.bf16.vlgmr.msra.gmra.mxu1 %v1614_v27  ;;  %v1445_v23 = vmul.f32 %v3088_v30, %v4235_v25 }
 0x258   : > { %3093 = vrsqrt.f32 %v1393_v63  ;;  %2757 = vmatpush3.bf16.msra.mxu1 %v4196_v11  ;;  %v1354_v56 = vmul.f32 %v4277_v48, %v4277_v48 }
 0x259   : > { %v1288_v9 = vpop.xlane.xlu0 %1287  ;;  %2750 = vmatprep.subr.bf16.mxu1 %v4198_v0  ;;  %v1526_v37 = vmul.f32 %v1486_v33, %v1446_v32  ;;  %v1525_v34 = vmul.f32 %v1485_v61, %v1445_v23  ;;  %v4637_v61 = vld [vmem:[#allocation17_spill] sm:$0xff] }
 0x25a   : > { %v3090_v47 = vpop.eup %3089  ;;  %v1170_v54 = vpop.xlane.xlu1 %1169  ;;  %v1334_v16 = vmul.f32 0.00390625, %v1288_v9  ;;  %v1490_v9 = vsub.f32 %v3866_v1, %v4246_v28 }
 0x25b   : > { %v4291_v26 = vmul.f32 0.00390625, %v1170_v54  ;;  %v1448_v14 = vmul.f32 %v3090_v47, %v4240_v17  ;;  %v1447_v11 = vmul.f32 %v3090_v47, %v4235_v25  ;;  %v1579_v2 = vadd.f32 %v4255_v52, %v1526_v37  ;;  %v4638_v54 = vld [vmem:[#allocation18_spill] sm:$0xff] }
 0x25c   : > { %v1374_v6 = vsub.f32 %v1334_v16, %v1354_v56  ;;  %2758 = vmatpush3.bf16.msra.mxu1 %v4201_v29  ;;  %v1578_v24 = vadd.f32 %v4252_v18, %v1525_v34  ;;  %v4639_v16 = vld [vmem:[#allocation19_spill] sm:$0xff] }
 0x25d   : > { %v1528_v42 = vmul.f32 %v1488_v57, %v1448_v14  ;;  %v1527_v38 = vmul.f32 %v1487_v45, %v1447_v11  ;;  %2751 = vmatprep.subr.bf16.mxu1 %v4206_v35  ;;  %v1355_v0 = vmul.f32 %v4291_v26, %v4291_v26  ;;  %v1489_v57 = vsub.f32 %v4637_v61, %v4246_v28 }
 0x25e   : > { %v1394_v49 = vadd.f32 1e-06, %v1374_v6  ;;  %v1291_v15 = vpop.xlane.xlu1 %1290  ;;  %v1492_v14 = vsub.f32 %v4639_v16, %v4263_v19 }
 0x25f   : > { %v1335_v51 = vmul.f32 0.00390625, %v1291_v15  ;;  %v1581_v3 = vadd.f32 %v4255_v52, %v1528_v42  ;;  %v1580_v8 = vadd.f32 %v4252_v18, %v1527_v38 }
 0x260   : > { %3095 = vrsqrt.f32 %v1394_v49  ;;  %2759 = vmatpush3.bf16.msra.mxu1 %v4211_v41  ;;  %v1491_v41 = vsub.f32 %v4638_v54, %v4263_v19 }
 0x261   : > { %v1375_v29 = vsub.f32 %v1335_v51, %v1355_v0  ;;  %v1173_v30 = vpop.xlane.xlu0 %1172  ;;  %v1617_v63 = vpack.c.bf16 %v1581_v3, %v1579_v2  ;;  %v1616_v32 = vpack.c.bf16 %v1580_v8, %v1578_v24  ;;  %2752 = vmatprep.subr.bf16.mxu1 %v4214_v10 }
 0x262   : > { %v3092_v27 = vpop.eup %3091  ;;  %v4306_v35 = vmul.f32 0.00390625, %v1173_v30 }
 0x263   : > { %v1450_v23 = vmul.f32 %v3092_v27, %v4240_v17  ;;  %v1449_v33 = vmul.f32 %v3092_v27, %v4235_v25  ;;  %v1395_v47 = vadd.f32 1e-06, %v1375_v29  ;;  %1868 = vmatprep.mubr.bf16.mxu1 %v1617_v63 }
 0x264   : > { %1869 = vmatmul.mubr.bf16.gmra.mxu1 %v1616_v32  ;;  %v1356_v10 = vmul.f32 %v4306_v35, %v4306_v35 }
 0x265   : > { %v3094_v56 = vpop.eup %3093  ;;  %3097 = vrsqrt.f32 %v1395_v47  ;;  %v1294_v37 = vpop.xlane.xlu0 %1293  ;;  %v1530_v11 = vmul.f32 %v1490_v9, %v1450_v23  ;;  %2760 = vmatpush3.bf16.msra.mxu1 %v4219_v31  ;;  %v1529_v6 = vmul.f32 %v1489_v57, %v1449_v33  ;;  %v1493_v23 = vsub.f32 %v3935_v62, %v4277_v48  ;;  %v4640_v33 = vld [vmem:[#allocation20_spill] sm:$0xff]  ;;  %v4641_v47 = vld [vmem:[#allocation21_spill] sm:$0xff] }
 0x266   : > { %v1176_v1 = vpop.xlane.xlu1 %1175  ;;  %v1336_v46 = vmul.f32 0.00390625, %v1294_v37  ;;  %v1452_v28 = vmul.f32 %v3094_v56, %v4240_v17  ;;  %v1451_v45 = vmul.f32 %v3094_v56, %v4235_v25  ;;  %2753 = vmatprep.subr.bf16.mxu1 %v4222_v43  ;;  %v1494_v9 = vsub.f32 %v4640_v33, %v4277_v48 }
 0x267   : > { %v4325_v34 = vmul.f32 0.00390625, %v1176_v1  ;;  %v1583_v15 = vadd.f32 %v4255_v52, %v1530_v11  ;;  %v1582_v51 = vadd.f32 %v4252_v18, %v1529_v6  ;;  %v1495_v61 = vsub.f32 %v4641_v47, %v4291_v26 }
 0x268   : > { %v1376_v19 = vsub.f32 %v1336_v46, %v1356_v10  ;;  %v1532_v42 = vmul.f32 %v1492_v14, %v1452_v28  ;;  %v1531_v49 = vmul.f32 %v1491_v41, %v1451_v45  ;;  %v4642_v41 = vld [vmem:[#allocation22_spill] sm:$0xff]  ;;  %v1497_v33 = vsub.f32 %v3997_v22, %v4306_v35 }
 0x269   : > { %2761 = vmatpush3.bf16.msra.mxu1 %v4229_v12  ;;  %v1357_v43 = vmul.f32 %v4325_v34, %v4325_v34  ;;  %v1496_v56 = vsub.f32 %v4642_v41, %v4291_v26  ;;  %v1499_v47 = vsub.f32 %v4015_v20, %v4325_v34 }
 0x26a   : > { %v1396_v38 = vadd.f32 1e-06, %v1376_v19  ;;  %v1297_v31 = vpop.xlane.xlu1 %1296  ;;  %v1585_v0 = vadd.f32 %v4255_v52, %v1532_v42  ;;  %v1584_v2 = vadd.f32 %v4252_v18, %v1531_v49  ;;  %2754 = vmatprep.subr.bf16.mxu1 %v4232_v36 }
 0x26b   : > { %v1337_v3 = vmul.f32 0.00390625, %v1297_v31 }
 0x26c   : > { %3099 = vrsqrt.f32 %v1396_v38  ;;  %v1619_v24 = vpack.c.bf16 %v1585_v0, %v1583_v15  ;;  %v1618_v8 = vpack.c.bf16 %v1584_v2, %v1582_v51 }
 0x26d   : > { %v3096_v27 = vpop.eup %3095  ;;  %v1377_v29 = vsub.f32 %v1337_v3, %v1357_v43  ;;  %v1179_v12 = vpop.xlane.xlu0 %1178  ;;  %2762 = vmatpush3.bf16.msra.mxu1 %v4243_v60 }
 0x26e   : > { %v4336_v30 = vmul.f32 0.00390625, %v1179_v12  ;;  %1878 = vmatprep.mubr.bf16.mxu1 %v1619_v24  ;;  %v1454_v32 = vmul.f32 %v3096_v27, %v4240_v17  ;;  %v1453_v36 = vmul.f32 %v3096_v27, %v4235_v25 }
 0x26f   : > { %v1397_v63 = vadd.f32 1e-06, %v1377_v29  ;;  %1879 = vmatmul.mubr.bf16.gmra.mxu1 %v1618_v8 }
 0x270   : > { %v1358_v14 = vmul.f32 %v4336_v30, %v4336_v30  ;;  %v1534_v37 = vmul.f32 %v1494_v9, %v1454_v32  ;;  %v1533_v11 = vmul.f32 %v1493_v23, %v1453_v36  ;;  %v1498_v9 = vsub.f32 %v4000_v50, %v4306_v35 }
 0x271   : > { %3101 = vrsqrt.f32 %v1397_v63  ;;  %v1182_v60 = vpop.xlane.xlu1 %1181  ;;  %v1300_v57 = vpop.xlane.xlu0 %1299 }
 0x272   : > { %v3098_v54 = vpop.eup %3097  ;;  %v4348_v16 = vmul.f32 0.00390625, %v1182_v60  ;;  %v1338_v10 = vmul.f32 0.00390625, %v1300_v57  ;;  %v1587_v15 = vadd.f32 %v4255_v52, %v1534_v37  ;;  %v1586_v31 = vadd.f32 %v4252_v18, %v1533_v11 }
 0x273   : > { %v1456_v62 = vmul.f32 %v3098_v54, %v4240_v17  ;;  %v1455_v48 = vmul.f32 %v3098_v54, %v4235_v25 }
 0x274   : > { %v1378_v1 = vsub.f32 %v1338_v10, %v1358_v14  ;;  %v1359_v26 = vmul.f32 %v4348_v16, %v4348_v16 }
 0x275   : > { %v1303_v46 = vpop.xlane.xlu1 %1302  ;;  %v1185_v28 = vpop.xlane.xlu0 %1184  ;;  %v1536_v45 = vmul.f32 %v1496_v56, %v1456_v62  ;;  %v1535_v6 = vmul.f32 %v1495_v61, %v1455_v48  ;;  %v4643_v61 = vld [vmem:[#allocation23_spill] sm:$0xff] }
 0x276   : > { %v1398_v19 = vadd.f32 1e-06, %v1378_v1  ;;  %v1339_v42 = vmul.f32 0.00390625, %v1303_v46  ;;  %v4356_v49 = vmul.f32 0.00390625, %v1185_v28  ;;  %v1500_v60 = vsub.f32 %v4643_v61, %v4325_v34 }
 0x277   : > { %v1589_v38 = vadd.f32 %v4255_v52, %v1536_v45  ;;  %v1588_v0 = vadd.f32 %v4252_v18, %v1535_v6 }
 0x278   : > { %3103 = vrsqrt.f32 %v1398_v19  ;;  %v1379_v51 = vsub.f32 %v1339_v42, %v1359_v26  ;;  %v1360_v12 = vmul.f32 %v4356_v49, %v4356_v49 }
 0x279   : > { %v3100_v2 = vpop.eup %3099  ;;  %v1188_v43 = vpop.xlane.xlu1 %1187  ;;  %v1621_v24 = vpack.c.bf16 %v1589_v38, %v1587_v15  ;;  %v1620_v8 = vpack.c.bf16 %v1588_v0, %v1586_v31 }
 0x27a   : > { %v1306_v3 = vpop.xlane.xlu0 %1305  ;;  %v1399_v27 = vadd.f32 1e-06, %v1379_v51  ;;  %v4362_v29 = vmul.f32 0.00390625, %v1188_v43  ;;  %v1458_v32 = vmul.f32 %v3100_v2, %v4240_v17  ;;  %v1457_v36 = vmul.f32 %v3100_v2, %v4235_v25 }
 0x27b   : > { %v1340_v63 = vmul.f32 0.00390625, %v1306_v3  ;;  %1888 = vmatprep.mubr.bf16.mxu1 %v1621_v24 }
 0x27c   : > { %3105 = vrsqrt.f32 %v1399_v27  ;;  %1889 = vmatmul.mubr.bf16.gmra.mxu1 %v1620_v8  ;;  %v1361_v14 = vmul.f32 %v4362_v29, %v4362_v29  ;;  %v1538_v37 = vmul.f32 %v1498_v9, %v1458_v32  ;;  %v1537_v35 = vmul.f32 %v1497_v33, %v1457_v36 }
 0x27d   : > { %v1380_v23 = vsub.f32 %v1340_v63, %v1360_v12  ;;  %v1309_v57 = vpop.xlane.xlu1 %1308  ;;  %v1501_v63 = vsub.f32 %v4060_v58, %v4336_v30  ;;  %v1502_v32 = vsub.f32 %v4063_v5, %v4336_v30  ;;  %v1503_v30 = vsub.f32 %v4074_v59, %v4348_v16 }
 0x27e   : > { %v1191_v54 = vpop.xlane.xlu0 %1190  ;;  %v3102_v41 = vpop.eup %3101  ;;  %v1341_v10 = vmul.f32 0.00390625, %v1309_v57  ;;  %v1591_v19 = vadd.f32 %v4255_v52, %v1538_v37  ;;  %v1590_v42 = vadd.f32 %v4252_v18, %v1537_v35 }
 0x27f   : > { %v1400_v56 = vadd.f32 1e-06, %v1380_v23  ;;  %v4378_v62 = vmul.f32 0.00390625, %v1191_v54  ;;  %v1460_v22 = vmul.f32 %v3102_v41, %v4240_v17  ;;  %v1459_v50 = vmul.f32 %v3102_v41, %v4235_v25 }
 0x280   : > { %v1381_v20 = vsub.f32 %v1341_v10, %v1361_v14 }
 0x281   : > { %3107 = vrsqrt.f32 %v1400_v56  ;;  %v1194_v48 = vpop.xlane.xlu1 %1193  ;;  %v1540_v11 = vmul.f32 %v1500_v60, %v1460_v22  ;;  %v1539_v1 = vmul.f32 %v1499_v47, %v1459_v50  ;;  %v1362_v45 = vmul.f32 %v4378_v62, %v4378_v62 }
 0x282   : > { %v1312_v34 = vpop.xlane.xlu0 %1311  ;;  %v1401_v46 = vadd.f32 1e-06, %v1381_v20  ;;  %v4382_v28 = vmul.f32 0.00390625, %v1194_v48  ;;  %v1504_v56 = vsub.f32 %v4079_v21, %v4348_v16 }
 0x283   : > { %v1342_v6 = vmul.f32 0.00390625, %v1312_v34  ;;  %v1593_v26 = vadd.f32 %v4255_v52, %v1540_v11  ;;  %v1592_v15 = vadd.f32 %v4252_v18, %v1539_v1 }
 0x284   : > { %3109 = vrsqrt.f32 %v1401_v46  ;;  %v1363_v0 = vmul.f32 %v4382_v28, %v4382_v28 }
 0x285   : > { %v1382_v38 = vsub.f32 %v1342_v6, %v1362_v45  ;;  %v3104_v31 = vpop.eup %3103  ;;  %v1315_v51 = vpop.xlane.xlu1 %1314  ;;  %v1623_v43 = vpack.c.bf16 %v1593_v26, %v1591_v19  ;;  %v1622_v3 = vpack.c.bf16 %v1592_v15, %v1590_v42  ;;  %v1505_v19 = vsub.f32 %v4093_v40, %v4356_v49 }
 0x286   : > { %v1197_v2 = vpop.xlane.xlu0 %1196  ;;  %v1343_v8 = vmul.f32 0.00390625, %v1315_v51  ;;  %v1462_v12 = vmul.f32 %v3104_v31, %v4240_v17  ;;  %v1461_v36 = vmul.f32 %v3104_v31, %v4235_v25  ;;  %v1506_v26 = vsub.f32 %v4096_v13, %v4356_v49 }
 0x287   : > { %v1402_v24 = vadd.f32 1e-06, %v1382_v38  ;;  %v4392_v27 = vmul.f32 0.00390625, %v1197_v2  ;;  %1898 = vmatprep.mubr.bf16.mxu1 %v1623_v43  ;;  %v1507_v38 = vsub.f32 %v4105_v55, %v4362_v29  ;;  %v1508_v13 = vsub.f32 %v4108_v44, %v4362_v29 }
 0x288   : > { %v1383_v23 = vsub.f32 %v1343_v8, %v1363_v0  ;;  %1899 = vmatmul.mubr.bf16.gmra.mxu1 %v1622_v3  ;;  %v1542_v60 = vmul.f32 %v1502_v32, %v1462_v12  ;;  %v1541_v57 = vmul.f32 %v1501_v63, %v1461_v36  ;;  %v1509_v63 = vsub.f32 %v4121_v7, %v4378_v62 }
 0x289   : > { %3111 = vrsqrt.f32 %v1402_v24  ;;  %v3106_v33 = vpop.eup %3105  ;;  %v1200_v9 = vpop.xlane.xlu1 %1199  ;;  %v1364_v47 = vmul.f32 %v4392_v27, %v4392_v27 }
 0x28a   : > { %v1318_v61 = vpop.xlane.xlu0 %1317  ;;  %v1403_v54 = vadd.f32 1e-06, %v1383_v23  ;;  %v4402_v41 = vmul.f32 0.00390625, %v1200_v9  ;;  %v1464_v5 = vmul.f32 %v3106_v33, %v4240_v17  ;;  %v1463_v14 = vmul.f32 %v3106_v33, %v4235_v25 }
 0x28b   : > { %v1344_v58 = vmul.f32 0.00390625, %v1318_v61  ;;  %v1595_v20 = vadd.f32 %v4255_v52, %v1542_v60  ;;  %v1594_v34 = vadd.f32 %v4252_v18, %v1541_v57  ;;  %v1510_v23 = vsub.f32 %v4114_v53, %v4378_v62 }
 0x28c   : > { %3113 = vrsqrt.f32 %v1403_v54  ;;  %v1544_v35 = vmul.f32 %v1504_v56, %v1464_v5  ;;  %v1543_v48 = vmul.f32 %v1503_v30, %v1463_v14  ;;  %v1365_v59 = vmul.f32 %v4402_v41, %v4402_v41 }
 0x28d   : > { %v1384_v10 = vsub.f32 %v1344_v58, %v1364_v47  ;;  %v1321_v37 = vpop.xlane.xlu1 %1320  ;;  %v1511_v62 = vsub.f32 %v4132_v39, %v4382_v28 }
 0x28e   : > { %v3108_v22 = vpop.eup %3107  ;;  %v1203_v50 = vpop.xlane.xlu0 %1202  ;;  %v1345_v1 = vmul.f32 0.00390625, %v1321_v37  ;;  %v1597_v21 = vadd.f32 %v4255_v52, %v1544_v35  ;;  %v1596_v16 = vadd.f32 %v4252_v18, %v1543_v48  ;;  %v1512_v37 = vsub.f32 %v4129_v4, %v4382_v28  ;;  %v2999_v48 = vld [vmem:[#allocation10 + $0x48] sm:$0xff]  }
 0x28f   : > { %v1404_v11 = vadd.f32 1e-06, %v1384_v10  ;;  %v4414_v46 = vmul.f32 0.00390625, %v1203_v50  ;;  %v1466_v45 = vmul.f32 %v3108_v22, %v4240_v17  ;;  %v1465_v6 = vmul.f32 %v3108_v22, %v4235_v25  ;;  %2685 = vmatprep.subr.bf16.mxu0 %v2999_v48  ;;  %2755 = vmatprep.subr.bf16.mxu1 %v2999_v48 }
 0x290   : > { %v1385_v42 = vsub.f32 %v1345_v1, %v1365_v59  ;;  %v1625_v2 = vpack.c.bf16 %v1597_v21, %v1595_v20  ;;  %v1624_v43 = vpack.c.bf16 %v1596_v16, %v1594_v34  ;;  %v3000_v34 = vld [vmem:[#allocation10 + $0x8] sm:$0xff]  }
 0x291   : > { %3115 = vrsqrt.f32 %v1404_v11  ;;  %v3110_v15 = vpop.eup %3109  ;;  %v1206_v31 = vpop.xlane.xlu1 %1205  ;;  %v1366_v0 = vmul.f32 %v4414_v46, %v4414_v46  ;;  %v1546_v49 = vmul.f32 %v1506_v26, %v1466_v45  ;;  %v1545_v12 = vmul.f32 %v1505_v19, %v1465_v6  ;;  %2686 = vmatpush3.bf16.msra.mxu0 %v3000_v34  ;;  %2763 = vmatpush3.bf16.msra.mxu1 %v3000_v34  ;;  %v4644_v6 = vld [vmem:[#allocation25_spill] sm:$0xff]  ;;  %v4645_v26 = vld [vmem:[#allocation24_spill] sm:$0xff] }
 0x292   : > { %v1324_v51 = vpop.xlane.xlu0 %1323  ;;  %v1405_v3 = vadd.f32 1e-06, %v1385_v42  ;;  %v4428_v24 = vmul.f32 0.00390625, %v1206_v31  ;;  %v1468_v8 = vmul.f32 %v3110_v15, %v4240_v17  ;;  %1908 = vmatprep.mubr.bf16.mxu1 %v1625_v2  ;;  %v1467_v55 = vmul.f32 %v3110_v15, %v4235_v25  ;;  %v3001_v15 = vld [vmem:[#allocation10 + $0x40] sm:$0xff]  }
 0x293   : > { %v1346_v40 = vmul.f32 0.00390625, %v1324_v51  ;;  %1909 = vmatmul.mubr.bf16.gmra.mxu1 %v1624_v43  ;;  %v1599_v7 = vadd.f32 %v4255_v52, %v1546_v49  ;;  %v1598_v58 = vadd.f32 %v4252_v18, %v1545_v12  ;;  %v1513_v19 = vsub.f32 %v4644_v6, %v4392_v27  ;;  %2687 = vmatprep.subr.bf16.mxu0 %v3001_v15 }
 0x294   : > { %3117 = vrsqrt.f32 %v1405_v3  ;;  %v1367_v33 = vmul.f32 %v4428_v24, %v4428_v24  ;;  %v1548_v44 = vmul.f32 %v1508_v13, %v1468_v8  ;;  %v1547_v29 = vmul.f32 %v1507_v38, %v1467_v55  ;;  %v3002_v38 = vld [vmem:[#allocation10] sm:$0xff]   ;;  %2756 = vmatprep.subr.bf16.mxu1 %v3001_v15  ;;  %v4646_v3 = vld [vmem:[#allocation27_spill] sm:$0xff]  ;;  %v4647_v8 = vld [vmem:[#allocation26_spill] sm:$0xff] }
 0x295   : > { %v1386_v32 = vsub.f32 %v1346_v40, %v1366_v0  ;;  %v1327_v9 = vpop.xlane.xlu1 %1326  ;;  %v1514_v42 = vsub.f32 %v4645_v26, %v4392_v27  ;;  %v1515_v40 = vsub.f32 %v4646_v3, %v4402_v41  ;;  %v1516_v13 = vsub.f32 %v4647_v8, %v4402_v41  ;;  %2688 = vmatpush3.bf16.msra.mxu0 %v3002_v38 }
 0x296   : > { %v3112_v36 = vpop.eup %3111  ;;  %v1347_v61 = vmul.f32 0.00390625, %v1327_v9  ;;  %v1601_v54 = vadd.f32 %v4255_v52, %v1548_v44  ;;  %v1600_v53 = vadd.f32 %v4252_v18, %v1547_v29  ;;  %2764 = vmatpush3.bf16.msra.mxu1 %v3002_v38  ;;  %v4648_v44 = vld [vmem:[#allocation29_spill] sm:$0xff] }
 0x297   : > { %v1406_v47 = vadd.f32 1e-06, %v1386_v32  ;;  %v1470_v60 = vmul.f32 %v3112_v36, %v4240_v17  ;;  %v1469_v57 = vmul.f32 %v3112_v36, %v4235_v25  ;;  %v1517_v29 = vsub.f32 %v4648_v44, %v4414_v46 }
 0x298   : > { %v1387_v5 = vsub.f32 %v1347_v61, %v1367_v33  ;;  %v1627_v56 = vpack.c.bf16 %v1601_v54, %v1599_v7  ;;  %v1626_v14 = vpack.c.bf16 %v1600_v53, %v1598_v58  ;;  %v4650_v54 = vld [vmem:[#allocation31_spill] sm:$0xff]  ;;  %v4651_v53 = vld [vmem:[#allocation30_spill] sm:$0xff] }
 0x299   : > { %3119 = vrsqrt.f32 %v1406_v47  ;;  %v3114_v30 = vpop.eup %3113  ;;  %v1550_v10 = vmul.f32 %v1510_v23, %v1470_v60  ;;  %v1549_v22 = vmul.f32 %v1509_v63, %v1469_v57  ;;  %v4649_v47 = vld [vmem:[#allocation28_spill] sm:$0xff]  ;;  %v1519_v58 = vsub.f32 %v4650_v54, %v4428_v24 }
 0x29a   : > { %v1407_v50 = vadd.f32 1e-06, %v1387_v5  ;;  %v1472_v35 = vmul.f32 %v3114_v30, %v4240_v17  ;;  %v1471_v20 = vmul.f32 %v3114_v30, %v4235_v25  ;;  %1918 = vmatprep.mubr.bf16.mxu1 %v1627_v56  ;;  %v1518_v61 = vsub.f32 %v4649_v47, %v4414_v46 }
 0x29b   : > { %1919 = vmatmul.mubr.bf16.gmra.mxu1 %v1626_v14  ;;  %v1603_v1 = vadd.f32 %v4255_v52, %v1550_v10  ;;  %v1602_v21 = vadd.f32 %v4252_v18, %v1549_v22 }
 0x29c   : > { %3121 = vrsqrt.f32 %v1407_v50  ;;  %v1552_v39 = vmul.f32 %v1512_v37, %v1472_v35  ;;  %v1551_v11 = vmul.f32 %v1511_v62, %v1471_v20  ;;  %v1520_v62 = vsub.f32 %v4651_v53, %v4428_v24 }
 0x29e   : > { %v3116_v59 = vpop.eup %3115  ;;  %v1605_v4 = vadd.f32 %v4255_v52, %v1552_v39  ;;  %v1604_v28 = vadd.f32 %v4252_v18, %v1551_v11 }
 0x29f   : > { %v1474_v16 = vmul.f32 %v3116_v59, %v4240_v17  ;;  %v1473_v45 = vmul.f32 %v3116_v59, %v4235_v25 }
 0x2a0   : > { %v1629_v31 = vpack.c.bf16 %v1605_v4, %v1603_v1  ;;  %v1628_v0 = vpack.c.bf16 %v1604_v28, %v1602_v21 }
 0x2a1   : > { %v3118_v51 = vpop.eup %3117  ;;  %v1554_v2 = vmul.f32 %v1514_v42, %v1474_v16  ;;  %v1553_v43 = vmul.f32 %v1513_v19, %v1473_v45 }
 0x2a2   : > { %1928 = vmatprep.mubr.bf16.mxu1 %v1629_v31  ;;  %v1476_v49 = vmul.f32 %v3118_v51, %v4240_v17  ;;  %v1475_v27 = vmul.f32 %v3118_v51, %v4235_v25 }
 0x2a3   : > { %1929 = vmatmul.mubr.bf16.gmra.mxu1 %v1628_v0  ;;  %v1607_v32 = vadd.f32 %v4255_v52, %v1554_v2  ;;  %v1606_v36 = vadd.f32 %v4252_v18, %v1553_v43 }
 0x2a4   : > { %v1556_v55 = vmul.f32 %v1516_v13, %v1476_v49  ;;  %v1555_v12 = vmul.f32 %v1515_v40, %v1475_v27 }
 0x2a6   : > { %v3120_v63 = vpop.eup %3119  ;;  %v1609_v23 = vadd.f32 %v4255_v52, %v1556_v55  ;;  %v1608_v33 = vadd.f32 %v4252_v18, %v1555_v12 }
 0x2a7   : > { %v1478_v41 = vmul.f32 %v3120_v63, %v4240_v17  ;;  %v1477_v9 = vmul.f32 %v3120_v63, %v4235_v25 }
 0x2a8   : > { %v1631_v60 = vpack.c.bf16 %v1609_v23, %v1607_v32  ;;  %v1630_v57 = vpack.c.bf16 %v1608_v33, %v1606_v36 }
 0x2a9   : > { %v3122_v7 = vpop.eup %3121  ;;  %v1558_v30 = vmul.f32 %v1518_v61, %v1478_v41  ;;  %v1557_v14 = vmul.f32 %v1517_v29, %v1477_v9 }
 0x2aa   : > { %1938 = vmatprep.mubr.bf16.mxu1 %v1631_v60  ;;  %v1480_v5 = vmul.f32 %v3122_v7, %v4240_v17  ;;  %v1479_v56 = vmul.f32 %v3122_v7, %v4235_v25 }
 0x2ab   : > { %1939 = vmatmul.mubr.bf16.gmra.mxu1 %v1630_v57  ;;  %v1611_v46 = vadd.f32 %v4255_v52, %v1558_v30  ;;  %v1610_v50 = vadd.f32 %v4252_v18, %v1557_v14 }
 0x2ac   : > { %v1560_v10 = vmul.f32 %v1520_v62, %v1480_v5  ;;  %v1559_v22 = vmul.f32 %v1519_v58, %v1479_v56 }
 0x2ae   : > { %v1613_v37 = vadd.f32 %v4255_v52, %v1560_v10  ;;  %v1612_v35 = vadd.f32 %v4252_v18, %v1559_v22 }
 0x2b0   : > { %v1633_v20 = vpack.c.bf16 %v1613_v37, %v1611_v46  ;;  %v1632_v24 = vpack.c.bf16 %v1612_v35, %v1610_v50 }
 0x2b2   : > { %1948 = vmatprep.mubr.bf16.mxu1 %v1633_v20 }
 0x2b3   : > { %1949 = vmatmul.mubr.bf16.gmra.mxu1 %v1632_v24 }
 0x317   : > { %v1860_v17 = vpop.f32.mrf.mxu1 }
 0x319   : > { %v1862_v48 = vpop.f32.mrf.mxu1 }
 0x31b   : > { %v1864_v34 = vpop.f32.mrf.mxu1 }
 0x31c   : > { %v1959_v11 = vpack.c.bf16 %v1864_v34, %v1860_v17  ;;  %v4491_v17 = vld [vmem:[%s4581_s5] ss:$0 sm:$0xff] }
 0x31d   : > { %v1866_v25 = vpop.f32.mrf.mxu1 }
 0x31e   : > { %v1960_v39 = vpack.c.bf16 %v1866_v25, %v1862_v48 }
 0x320   : > { %2146 = vmatprep.mubr.bf16.mxu0 %v1960_v39 }
 0x321   : > { %2147 = vmatmul.mubr.bf16.vlgmr.msra.gmra.mxu0 %v1959_v11 }
 0x324   : > { %v1870_v59 = vpop.f32.mrf.mxu1 }
 0x326   : > { %v1872_v1 = vpop.f32.mrf.mxu1 }
 0x328   : > { %v1874_v21 = vpop.f32.mrf.mxu1 }
 0x329   : > { %v1961_v28 = vpack.c.bf16 %v1874_v21, %v1870_v59 }
 0x32a   : > { %v1876_v52 = vpop.f32.mrf.mxu1 }
 0x32b   : > { %v1962_v4 = vpack.c.bf16 %v1876_v52, %v1872_v1 }
 0x32d   : > { %2154 = vmatprep.mubr.bf16.mxu0 %v1962_v4 }
 0x32e   : > { %2155 = vmatmul.mubr.bf16.gmra.mxu0 %v1961_v28 }
 0x32f   : > { %v1880_v18 = vpop.f32.mrf.mxu1 }
 0x331   : > { %v1882_v16 = vpop.f32.mrf.mxu1 }
 0x333   : > { %v1884_v45 = vpop.f32.mrf.mxu1 }
 0x334   : > { %v1963_v26 = vpack.c.bf16 %v1884_v45, %v1880_v18 }
 0x335   : > { %v1886_v6 = vpop.f32.mrf.mxu1 }
 0x336   : > { %v1964_v19 = vpack.c.bf16 %v1886_v6, %v1882_v16 }
 0x338   : > { %2162 = vmatprep.mubr.bf16.mxu0 %v1964_v19 }
 0x339   : > { %2163 = vmatmul.mubr.bf16.gmra.mxu0 %v1963_v26 }
 0x33c   : > { %v1890_v42 = vpop.f32.mrf.mxu1 }
 0x33e   : > { %v1892_v15 = vpop.f32.mrf.mxu1 }
 0x340   : > { %v1894_v38 = vpop.f32.mrf.mxu1 }
 0x341   : > { %v1965_v51 = vpack.c.bf16 %v1894_v38, %v1890_v42 }
 0x342   : > { %v1896_v31 = vpop.f32.mrf.mxu1 }
 0x343   : > { %v1966_v0 = vpack.c.bf16 %v1896_v31, %v1892_v15 }
 0x345   : > { %2170 = vmatprep.mubr.bf16.mxu0 %v1966_v0 }
 0x346   : > { %2171 = vmatmul.mubr.bf16.gmra.mxu0 %v1965_v51 }
 0x348   : > { %v1900_v2 = vpop.f32.mrf.mxu1 }
 0x34a   : > { %v1902_v43 = vpop.f32.mrf.mxu1 }
 0x34c   : > { %v1904_v3 = vpop.f32.mrf.mxu1 }
 0x34d   : > { %v1967_v13 = vpack.c.bf16 %v1904_v3, %v1900_v2 }
 0x34e   : > { %v1906_v40 = vpop.f32.mrf.mxu1 }
 0x34f   : > { %v1968_v8 = vpack.c.bf16 %v1906_v40, %v1902_v43 }
 0x351   : > { %2178 = vmatprep.mubr.bf16.mxu0 %v1968_v8 }
 0x352   : > { %2179 = vmatmul.mubr.bf16.gmra.mxu0 %v1967_v13 }
 0x353   : > { %v1910_v49 = vpop.f32.mrf.mxu1 }
 0x355   : > { %v1912_v27 = vpop.f32.mrf.mxu1 }
 0x357   : > { %v1914_v55 = vpop.f32.mrf.mxu1 }
 0x358   : > { %v1969_v32 = vpack.c.bf16 %v1914_v55, %v1910_v49 }
 0x359   : > { %v1916_v12 = vpop.f32.mrf.mxu1 }
 0x35a   : > { %v1970_v63 = vpack.c.bf16 %v1916_v12, %v1912_v27 }
 0x35b   : > { %v1920_v36 = vpop.f32.mrf.mxu1 }
 0x35c   : > { %2186 = vmatprep.mubr.bf16.mxu1 %v1970_v63 }
 0x35d   : > { %v1922_v23 = vpop.f32.mrf.mxu1  ;;  %2187 = vmatmul.mubr.bf16.vlgmr.msra.gmra.mxu1 %v1969_v32 }
 0x35f   : > { %v1924_v33 = vpop.f32.mrf.mxu1 }
 0x360   : > { %v1971_v44 = vpack.c.bf16 %v1924_v33, %v1920_v36 }
 0x361   : > { %v1926_v41 = vpop.f32.mrf.mxu1 }
 0x362   : > { %v1972_v9 = vpack.c.bf16 %v1926_v41, %v1922_v23 }
 0x363   : > { %v1930_v29 = vpop.f32.mrf.mxu1 }
 0x364   : > { %2194 = vmatprep.mubr.bf16.mxu1 %v1972_v9 }
 0x365   : > { %v1932_v47 = vpop.f32.mrf.mxu1  ;;  %2195 = vmatmul.mubr.bf16.gmra.mxu1 %v1971_v44 }
 0x367   : > { %v1934_v61 = vpop.f32.mrf.mxu1 }
 0x368   : > { %v1973_v7 = vpack.c.bf16 %v1934_v61, %v1930_v29 }
 0x369   : > { %v1936_v60 = vpop.f32.mrf.mxu1 }
 0x36a   : > { %v1974_v57 = vpack.c.bf16 %v1936_v60, %v1932_v47 }
 0x36b   : > { %v1940_v54 = vpop.f32.mrf.mxu1 }
 0x36c   : > { %2202 = vmatprep.mubr.bf16.mxu1 %v1974_v57 }
 0x36d   : > { %v1942_v58 = vpop.f32.mrf.mxu1  ;;  %2203 = vmatmul.mubr.bf16.gmra.mxu1 %v1973_v7 }
 0x36f   : > { %v1944_v53 = vpop.f32.mrf.mxu1 }
 0x370   : > { %v1975_v30 = vpack.c.bf16 %v1944_v53, %v1940_v54 }
 0x371   : > { %v1946_v62 = vpop.f32.mrf.mxu1 }
 0x372   : > { %v1976_v5 = vpack.c.bf16 %v1946_v62, %v1942_v58 }
 0x373   : > { %v1950_v56 = vpop.f32.mrf.mxu1 }
 0x374   : > { %2210 = vmatprep.mubr.bf16.mxu1 %v1976_v5 }
 0x375   : > { %v1952_v14 = vpop.f32.mrf.mxu1  ;;  %2211 = vmatmul.mubr.bf16.gmra.mxu1 %v1975_v30 }
 0x377   : > { %v1954_v10 = vpop.f32.mrf.mxu1 }
 0x378   : > { %v1977_v37 = vpack.c.bf16 %v1954_v10, %v1950_v56 }
 0x379   : > { %v1956_v22 = vpop.f32.mrf.mxu1 }
 0x37a   : > { %v1978_v46 = vpack.c.bf16 %v1956_v22, %v1952_v14 }
 0x37c   : > { %2218 = vmatprep.mubr.bf16.mxu1 %v1978_v46 }
 0x37d   : > { %2219 = vmatmul.mubr.bf16.gmra.mxu1 %v1977_v37 }
 0x3e1   : > { %v2689_v50 = vpop.f32.mrf.mxu0 }
 0x3e3   : > { %v2690_v35 = vpop.f32.mrf.mxu0 }
 0x3e4   : > { %v2691_v24 = vadd.f32 %v2690_v35, %v2689_v50 }
 0x3e5   : > { %v2692_v20 = vpop.f32.mrf.mxu0 }
 0x3e6   : > { %v2149_v25 = vadd.f32 %v2691_v24, %v4491_v17 }
 0x3e7   : > { %v2693_v48 = vpop.f32.mrf.mxu0 }
 0x3e8   : > { %v2694_v34 = vadd.f32 %v2693_v48, %v2692_v20 }
 0x3ea   : > { %v2152_v39 = vadd.f32 %v2694_v34, %v4491_v17 }
 0x3ec   : > { %v2616_v11 = vpack.c.bf16 %v2152_v39, %v2149_v25 }
 0x3ee   : > { %v2695_v59 = vpop.f32.mrf.mxu0  ;;  %2617 = vst [vmem:[%s4496_s12] sm:$0xff] %v2616_v11  }
 0x3f0   : > { %v2696_v1 = vpop.f32.mrf.mxu0 }
 0x3f1   : > { %v2697_v52 = vadd.f32 %v2696_v1, %v2695_v59 }
 0x3f2   : > { %v2698_v21 = vpop.f32.mrf.mxu0 }
 0x3f3   : > { %v2157_v18 = vadd.f32 %v2697_v52, %v4491_v17 }
 0x3f4   : > { %v2699_v4 = vpop.f32.mrf.mxu0 }
 0x3f5   : > { %v2700_v28 = vadd.f32 %v2699_v4, %v2698_v21 }
 0x3f7   : > { %v2160_v16 = vadd.f32 %v2700_v28, %v4491_v17 }
 0x3f9   : > { %v2621_v45 = vpack.c.bf16 %v2160_v16, %v2157_v18  ;;  %v2701_v6 = vpop.f32.mrf.mxu0 }
 0x3fb   : > { %2664 = vst [vmem:[%s4496_s12 + $0x8] sm:$0xff] %v2621_v45   ;;  %v2702_v19 = vpop.f32.mrf.mxu0 }
 0x3fc   : > { %v2703_v42 = vadd.f32 %v2702_v19, %v2701_v6 }
 0x3fd   : > { %v2704_v26 = vpop.f32.mrf.mxu0 }
 0x3fe   : > { %v2165_v31 = vadd.f32 %v2703_v42, %v4491_v17 }
 0x3ff   : > { %v2705_v15 = vpop.f32.mrf.mxu0 }
 0x400   : > { %v2706_v38 = vadd.f32 %v2705_v15, %v2704_v26 }
 0x402   : > { %v2168_v0 = vadd.f32 %v2706_v38, %v4491_v17 }
 0x404   : > { %v2626_v51 = vpack.c.bf16 %v2168_v0, %v2165_v31 }
 0x406   : > { %2665 = vst [vmem:[%s4496_s12 + $0x10] sm:$0xff] %v2626_v51   ;;  %v2707_v2 = vpop.f32.mrf.mxu0 }
 0x408   : > { %v2708_v43 = vpop.f32.mrf.mxu0 }
 0x409   : > { %v2709_v40 = vadd.f32 %v2708_v43, %v2707_v2 }
 0x40a   : > { %v2710_v3 = vpop.f32.mrf.mxu0 }
 0x40b   : > { %v2173_v49 = vadd.f32 %v2709_v40, %v4491_v17 }
 0x40c   : > { %v2711_v8 = vpop.f32.mrf.mxu0 }
 0x40d   : > { %v2712_v13 = vadd.f32 %v2711_v8, %v2710_v3 }
 0x40f   : > { %v2176_v27 = vadd.f32 %v2712_v13, %v4491_v17 }
 0x411   : > { %v2631_v55 = vpack.c.bf16 %v2176_v27, %v2173_v49 }
 0x412   : > { %v2713_v12 = vpop.f32.mrf.mxu0 }
 0x413   : > { %2666 = vst [vmem:[%s4496_s12 + $0x18] sm:$0xff] %v2631_v55  }
 0x414   : > { %v2714_v63 = vpop.f32.mrf.mxu0 }
 0x415   : > { %v2715_v36 = vadd.f32 %v2714_v63, %v2713_v12 }
 0x416   : > { %v2716_v32 = vpop.f32.mrf.mxu0 }
 0x417   : > { %v2181_v41 = vadd.f32 %v2715_v36, %v4491_v17 }
 0x418   : > { %v2717_v23 = vpop.f32.mrf.mxu0 }
 0x419   : > { %v2718_v33 = vadd.f32 %v2717_v23, %v2716_v32 }
 0x41b   : > { %v2184_v9 = vadd.f32 %v2718_v33, %v4491_v17 }
 0x41d   : > { %v2636_v44 = vpack.c.bf16 %v2184_v9, %v2181_v41  ;;  %v2719_v29 = vpop.f32.mrf.mxu1 }
 0x41f   : > { %2667 = vst [vmem:[%s4496_s12 + $0x20] sm:$0xff] %v2636_v44   ;;  %v2720_v47 = vpop.f32.mrf.mxu1 }
 0x420   : > { %v2721_v60 = vadd.f32 %v2720_v47, %v2719_v29 }
 0x421   : > { %v2722_v61 = vpop.f32.mrf.mxu1 }
 0x422   : > { %v2189_v58 = vadd.f32 %v2721_v60, %v4491_v17 }
 0x423   : > { %v2723_v57 = vpop.f32.mrf.mxu1 }
 0x424   : > { %v2724_v7 = vadd.f32 %v2723_v57, %v2722_v61 }
 0x425   : > { %v2725_v54 = vpop.f32.mrf.mxu1 }
 0x426   : > { %v2192_v53 = vadd.f32 %v2724_v7, %v4491_v17 }
 0x427   : > { %v2726_v62 = vpop.f32.mrf.mxu1 }
 0x428   : > { %v2641_v5 = vpack.c.bf16 %v2192_v53, %v2189_v58  ;;  %v2727_v56 = vadd.f32 %v2726_v62, %v2725_v54 }
 0x429   : > { %v2728_v30 = vpop.f32.mrf.mxu1 }
 0x42a   : > { %2668 = vst [vmem:[%s4496_s12 + $0x28] sm:$0xff] %v2641_v5   ;;  %v2197_v46 = vadd.f32 %v2727_v56, %v4491_v17 }
 0x42b   : > { %v2729_v14 = vpop.f32.mrf.mxu1 }
 0x42c   : > { %v2730_v10 = vadd.f32 %v2729_v14, %v2728_v30 }
 0x42d   : > { %v2731_v22 = vpop.f32.mrf.mxu1 }
 0x42e   : > { %v2200_v37 = vadd.f32 %v2730_v10, %v4491_v17 }
 0x42f   : > { %v2732_v50 = vpop.f32.mrf.mxu1 }
 0x430   : > { %v2646_v35 = vpack.c.bf16 %v2200_v37, %v2197_v46  ;;  %v2733_v24 = vadd.f32 %v2732_v50, %v2731_v22 }
 0x431   : > { %v2734_v20 = vpop.f32.mrf.mxu1 }
 0x432   : > { %2669 = vst [vmem:[%s4496_s12 + $0x30] sm:$0xff] %v2646_v35   ;;  %v2205_v39 = vadd.f32 %v2733_v24, %v4491_v17 }
 0x433   : > { %v2735_v48 = vpop.f32.mrf.mxu1 }
 0x434   : > { %v2736_v34 = vadd.f32 %v2735_v48, %v2734_v20 }
 0x435   : > { %v2737_v25 = vpop.f32.mrf.mxu1 }
 0x436   : > { %v2208_v11 = vadd.f32 %v2736_v34, %v4491_v17 }
 0x437   : > { %v2738_v59 = vpop.f32.mrf.mxu1 }
 0x438   : > { %v2651_v1 = vpack.c.bf16 %v2208_v11, %v2205_v39  ;;  %v2739_v52 = vadd.f32 %v2738_v59, %v2737_v25 }
 0x439   : > { %v2740_v21 = vpop.f32.mrf.mxu1 }
 0x43a   : > { %2670 = vst [vmem:[%s4496_s12 + $0x38] sm:$0xff] %v2651_v1   ;;  %v2213_v16 = vadd.f32 %v2739_v52, %v4491_v17 }
 0x43b   : > { %v2741_v4 = vpop.f32.mrf.mxu1 }
 0x43c   : > { %v2742_v28 = vadd.f32 %v2741_v4, %v2740_v21 }
 0x43d   : > { %v2743_v18 = vpop.f32.mrf.mxu1 }
 0x43e   : > { %v2216_v45 = vadd.f32 %v2742_v28, %v4491_v17 }
 0x43f   : > { %v2744_v6 = vpop.f32.mrf.mxu1 }
 0x440   : > { %v2656_v19 = vpack.c.bf16 %v2216_v45, %v2213_v16  ;;  %v2745_v42 = vadd.f32 %v2744_v6, %v2743_v18 }
 0x441   : > { %v2746_v26 = vpop.f32.mrf.mxu1 }
 0x442   : > { %2671 = vst [vmem:[%s4496_s12 + $0x40] sm:$0xff] %v2656_v19   ;;  %v2221_v31 = vadd.f32 %v2745_v42, %v4491_v17 }
 0x443   : > { %v2747_v15 = vpop.f32.mrf.mxu1 }
 0x444   : > { %v2748_v38 = vadd.f32 %v2747_v15, %v2746_v26 }
 0x446   : > { %v2224_v0 = vadd.f32 %v2748_v38, %v4491_v17 }
 0x448   : > { %v2661_v51 = vpack.c.bf16 %v2224_v0, %v2221_v31 }
 0x44a   : > { %2672 = vst [vmem:[%s4496_s12 + $0x48] sm:$0xff] %v2661_v51  }
 0x44b   : > { %3268 = shalt.err (!%p3265_p5)
}
 0x44c   : > { %s3269_s8 = scalar_lea.hbm %s4530_s14, 1280  ;;  %s3273_s10 = scalar_lea.hbm %s4582_s6, 2560 }
 0x44d   : > { %p3270_p6 = scmp.ne.s32.totalorder %s4530_s14, %s3269_s8  ;;  %p3274_p1 = scmp.lt.s32.totalorder %s4530_s14, %s4582_s6 }
 0x44e   : > { %p3275_p11 = scmp.lt.s32.totalorder %s3273_s10, %s3269_s8 }
 0x44f   : > { %p3271_p4 = pnand %p3270_p6, %p4652_p12 }
 0x450   : > { %p3276_p0 = por %p3275_p11, %p3274_p1 }
 0x451   : > { %p3272_p8 = pneg %p3271_p4 }
 0x453   : > { %p3277_p2 = pnand %p3276_p0, %p3272_p8 }
 0x455   : > { %3280 = shalt.err (!%p3277_p2)
}
 0x456   : > { %s3339_s7 = smov 64   ;;  %s3340_s16 = smov 4  }
 0x457   : > { %2786 = dma.vmem_to_hbm [thread:$0]  (%p4652_p12), %s4532_s19, 1280, %s4530_s14, %s2328_s15, %s3339_s7, %s3339_s7, %s3340_s16  }
 0x458 PF: > { %s2356_s25 = sand.u32 1, %s3315_s21   ;;  %p4653_p10 = scmp.ne.s32.totalorder %s4606_s28, 0 }
 0x459   : > { %p4654_p7 = scmp.ge.s32.totalorder %s3327_s24, 2  ;;  %s2357_s20 = scalar_lea.sflag [#allocation4], %s2356_s25 }
 0x45b   : > { %p2806_p9 = pnand %p4654_p7, %p4653_p10 }
 0x45d   : > { %p2807_p13 = pneg %p2806_p9 }
 0x45f   : > { %3310 = dma.done.wait (%p2807_p13), %s2357_s20, 1280  }
 0x460   : > { %3312 = vsyncadd (%p2807_p13), %s2357_s20, 4294966016  ;;  %p21_p3 = scmp.ge.s32.totalorder %s3470_s18, 4   ;;  %s4655_s21 = smov %s3319_s22 }
 0x461   : > { %s4656_s22 = smov %s3323_s23  ;;  %s4657_s23 = smov %s3479_s26 }
 0x462   : > { %s4658_s24 = smov %s3470_s18  ;;  %23 = sbr.rel (!%p21_p3) target bundleno = 7 (0x7), region = 107 }
 0x467   :  { %2362 = vsyncpa [#allocation3], 1 }
 0x468   :  { %2364 = vsyncpa [#allocation3 + $0x1], 1 }
 0x469   :  { %2365 = vsyncpa [#allocation6], 1 }
 0x46a   :  { %2366 = vsyncpa [#allocation9], 1 }
 0x46b   :  { %2367 = vsyncpa [#allocation4], 1 }
 0x46c   :  { %2369 = vsyncpa [#allocation4 + $0x1], 1 }

</bundles_post_ra>
